<compile_context>
chip_gen: v7x
topology: tpu7x:2x2x1
jax: 0.10.0
libtpu: 0.0.40
codegen_flags: <defaults>
</compile_context>

<pallas_src>
import jax
import jax.numpy as jnp
from jax import lax
from jax.experimental import pallas as pl
from jax.experimental.pallas import tpu as pltpu


# ----------------------------------------------------------------------------
# Pallas kernel: fused 3-layer MLP head  (2048 -> 1024 -> ReLU -> 256 -> ReLU -> 128[:10])
# bf16 MXU operands on the big weight stream, f32 accumulation / bias / ReLU / activations.
# ----------------------------------------------------------------------------
def mlp_kernel(x_ref, w1_ref, b1_ref, w2_ref, b2_ref, w3_ref, b3_ref, o_ref):
    x = x_ref[...]                                                        # [tm, 2048] bf16
    h1 = jnp.dot(x, w1_ref[...], preferred_element_type=jnp.float32) + b1_ref[...]
    h1 = jnp.maximum(h1, 0.0)                                             # [tm, 1024] f32
    h2 = jnp.dot(h1, w2_ref[...].astype(jnp.float32),
                 preferred_element_type=jnp.float32) + b2_ref[...]
    h2 = jnp.maximum(h2, 0.0)                                             # [tm, 256] f32
    out = jnp.dot(h2, w3_ref[...].astype(jnp.float32),
                  preferred_element_type=jnp.float32) + b3_ref[...]       # [tm, 128] f32
    o_ref[...] = out.astype(o_ref.dtype)


def mlp_pallas(feats, w1, b1, w2, b2, w3p, b3p, tile_m=512):
    """feats: [B, 2048] float.  Weights bf16 ([2048,1024], [1024,256], [256,128] lane-padded),
    biases f32 ([1,1024], [1,256], [1,128]).  Returns [B, 10] f32."""
    B = feats.shape[0]
    x = feats if feats.dtype == jnp.bfloat16 else feats.astype(jnp.bfloat16)

    # Whole-array-in-VMEM operand spec: weights/biases are grid-invariant, so they are kept
    # resident for the entire kernel instead of flowing through the per-tile double-buffered
    # pipeline (perf review: don't double-buffer the constant operands; spend VMEM on x tiles).
    vmem = pl.BlockSpec(memory_space=pltpu.MemorySpace.VMEM)
    cp_kwargs = dict(vmem_limit_bytes=24 * 1024 * 1024)

    if B <= tile_m:
        # Small batch: everything fits in VMEM; single whole-block invocation.
        # (At tiny B this is no faster than an XLA fusion; the real payoff needs the P10
        #  weight prefetch -- see TODO at the top of the file.)
        out = pl.pallas_call(
            mlp_kernel,
            out_shape=jax.ShapeDtypeStruct((B, 128), jnp.float32),
            in_specs=[vmem] * 7,
            out_specs=vmem,
            compiler_params=pltpu.CompilerParams(**cp_kwargs),
        )(x, w1, b1, w2, b2, w3p, b3p)
        return out[:, :10]

    # Large batch: tile M with a ragged last block (no jnp.pad copy of the activations);
    # Pallas masks the out-of-bounds rows of the final tile on write.
    # "arbitrary" keeps the whole MLP on one TensorCore so the HBM-bound weight stream is
    # read exactly once (relevant on v7x with 2 TCs; no-op on v5e/v6e).
    grid = (pl.cdiv(B, tile_m),)
    out = pl.pallas_call(
        mlp_kernel,
        out_shape=jax.ShapeDtypeStruct((B, 128), jnp.float32),
        grid=grid,
        in_specs=[
            pl.BlockSpec((tile_m, 2048), lambda i: (i, 0)),   # x: pipelined per tile
            vmem, vmem, vmem, vmem, vmem, vmem,               # weights/biases: VMEM-resident
        ],
        out_specs=pl.BlockSpec((tile_m, 128), lambda i: (i, 0)),
        compiler_params=pltpu.CompilerParams(
            dimension_semantics=("arbitrary",), **cp_kwargs),
    )(x, w1, b1, w2, b2, w3p, b3p)
    return out[:, :10]


def mlp_reference(feats, w1, b1, w2, b2, w3p, b3p):
    """Plain-JAX mirror of mlp_kernel (same dtypes / accumulation) for correctness checks."""
    x = feats.astype(jnp.bfloat16)
    h1 = jax.nn.relu(jnp.dot(x, w1, preferred_element_type=jnp.float32) + b1)
    h2 = jax.nn.relu(jnp.dot(h1, w2.astype(jnp.float32),
                             preferred_element_type=jnp.float32) + b2)
    out = jnp.dot(h2, w3p.astype(jnp.float32), preferred_element_type=jnp.float32) + b3p
    return out[:, :10]


# ----------------------------------------------------------------------------
# Plain-JAX ResNet50 backbone (eval mode), NHWC, BatchNorm folded into convs,
# bf16 conv operands with f32 accumulation.
# ----------------------------------------------------------------------------
def conv_bn(x, w_hwio, b, stride, padding):
    y = lax.conv_general_dilated(
        x.astype(jnp.bfloat16), w_hwio,
        window_strides=(stride, stride),
        padding=[(padding, padding), (padding, padding)],
        dimension_numbers=("NHWC", "HWIO", "NHWC"),
        preferred_element_type=jnp.float32,
    )
    return y + b[None, None, None, :]


def maxpool3x3s2_nhwc(x):
    return lax.reduce_window(
        x, -jnp.inf, lax.max,
        window_dimensions=(1, 3, 3, 1),
        window_strides=(1, 2, 2, 1),
        padding=((0, 0), (1, 1), (1, 1), (0, 0)),
    )


def fold_bn(w_oihw, bn, eps=1e-5):
    """Fold eval-mode BN (gamma,beta,mean,var) into the preceding conv. Returns HWIO bf16 + f32 bias."""
    gamma, beta, mean, var = bn
    scale = gamma * lax.rsqrt(var + eps)
    w = w_oihw * scale[:, None, None, None]
    b = beta - mean * scale
    w_hwio = jnp.transpose(w, (2, 3, 1, 0)).astype(jnp.bfloat16)
    return w_hwio, b.astype(jnp.float32)


class ParamGen:
    """Deterministic parameter factory."""

    def __init__(self, seed=0):
        self.key = jax.random.PRNGKey(seed)

    def _next(self):
        self.key, sub = jax.random.split(self.key)
        return sub

    def conv(self, out_c, in_c, kh, kw):
        fan_in = in_c * kh * kw
        return jax.random.normal(self._next(), (out_c, in_c, kh, kw), jnp.float32) * (2.0 / fan_in) ** 0.5

    def bn(self, c):
        # (gamma, beta, running_mean, running_var) -- eval-mode stats
        return (jnp.ones((c,), jnp.float32), jnp.zeros((c,), jnp.float32),
                jnp.zeros((c,), jnp.float32), jnp.ones((c,), jnp.float32))

    def linear(self, in_f, out_f):
        bound = 1.0 / (in_f ** 0.5)
        w = jax.random.uniform(self._next(), (in_f, out_f), jnp.float32, -bound, bound)
        b = jax.random.uniform(self._next(), (1, out_f), jnp.float32, -bound, bound)
        return w, b


def make_bottleneck(pg, in_c, width, stride):
    p = {"stride": stride}
    p["w1"], p["b1"] = fold_bn(pg.conv(width, in_c, 1, 1), pg.bn(width))
    p["w2"], p["b2"] = fold_bn(pg.conv(width, width, 3, 3), pg.bn(width))
    p["w3"], p["b3"] = fold_bn(pg.conv(width * 4, width, 1, 1), pg.bn(width * 4))
    if stride != 1 or in_c != width * 4:
        p["wd"], p["bd"] = fold_bn(pg.conv(width * 4, in_c, 1, 1), pg.bn(width * 4))
    return p


def bottleneck_forward(x, p):
    identity = x
    out = jax.nn.relu(conv_bn(x, p["w1"], p["b1"], 1, 0))
    out = jax.nn.relu(conv_bn(out, p["w2"], p["b2"], p["stride"], 1))
    out = conv_bn(out, p["w3"], p["b3"], 1, 0)
    if "wd" in p:
        identity = conv_bn(x, p["wd"], p["bd"], p["stride"], 0)
    return jax.nn.relu(out + identity)


def make_layer(pg, in_c, width, blocks, stride):
    params = [make_bottleneck(pg, in_c, width, stride)]
    for _ in range(blocks - 1):
        params.append(make_bottleneck(pg, width * 4, width, 1))
    return params


def make_resnet50_params(pg):
    params = {}
    params["stem_w"], params["stem_b"] = fold_bn(pg.conv(64, 3, 7, 7), pg.bn(64))
    params["layer1"] = make_layer(pg, 64, 64, 3, 1)
    params["layer2"] = make_layer(pg, 256, 128, 4, 2)
    params["layer3"] = make_layer(pg, 512, 256, 6, 2)
    params["layer4"] = make_layer(pg, 1024, 512, 3, 2)
    return params


def resnet50_backbone(x_nchw, params):
    # named_children order minus `fc`: conv1, bn1, relu, maxpool, layer1..4, avgpool
    x = jnp.transpose(x_nchw, (0, 2, 3, 1))                   # NCHW -> NHWC
    x = jax.nn.relu(conv_bn(x, params["stem_w"], params["stem_b"], 2, 3))
    x = maxpool3x3s2_nhwc(x)
    for name in ("layer1", "layer2", "layer3", "layer4"):
        for p in params[name]:
            x = bottleneck_forward(x, p)
    x = jnp.mean(x, axis=(1, 2))                              # AdaptiveAvgPool2d((1,1)) + view(-1, 2048)
    return x.astype(jnp.bfloat16)                             # [B, 2048] bf16 (feeds MXU directly)


# ----------------------------------------------------------------------------
# Full My_model forward
# ----------------------------------------------------------------------------
def my_model_forward(x, backbone_params, mlp_params):
    feats = resnet50_backbone(x, backbone_params)             # [B, 2048]
    w1, b1, w2, b2, w3p, b3p = mlp_params
    return mlp_pallas(feats, w1, b1, w2, b2, w3p, b3p)        # [B, 10]


if __name__ == "__main__":
    pg = ParamGen(seed=0)
    backbone_params = make_resnet50_params(pg)
    w1, b1 = pg.linear(2048, 1024)
    w2, b2 = pg.linear(1024, 256)
    w3, b3 = pg.linear(256, 10)
    # bf16 weights (halves kernel HBM traffic), f32 biases; final layer lane-padded 10 -> 128
    # once here so the kernel's output block is lane-dense (unmasked stores).
    mlp_params = (w1.astype(jnp.bfloat16), b1,
                  w2.astype(jnp.bfloat16), b2,
                  jnp.pad(w3, ((0, 0), (0, 128 - 10))).astype(jnp.bfloat16),
                  jnp.pad(b3, ((0, 0), (0, 128 - 10))))

    key = jax.random.PRNGKey(0)
    k_img, k_small, k_big = jax.random.split(key, 3)

    # Full model forward (small batch -> whole-block Pallas path).
    x = jax.random.normal(k_img, (2, 3, 32, 32), jnp.float32)   # NCHW, like PyTorch
    fwd = jax.jit(lambda inp: my_model_forward(inp, backbone_params, mlp_params))
    out = fwd(x)
    jax.block_until_ready(out)
    assert out.shape == (2, 10) and out.dtype == jnp.float32
    assert bool(jnp.all(jnp.isfinite(out)))

    # MLP-head numerics: whole-block path (B=16) and M-tiled path with a ragged last
    # block (B=640, tile_m=512 -> 2 tiles, second tile only 128 valid rows).
    feats_small = jax.random.normal(k_small, (16, 2048), jnp.float32)
    feats_big = jax.random.normal(k_big, (640, 2048), jnp.float32)
    for feats in (feats_small, feats_big):
        got = mlp_pallas(feats, *mlp_params)
        jax.block_until_ready(got)
        ref = mlp_reference(feats, *mlp_params)
        assert got.shape == (feats.shape[0], 10) and got.dtype == jnp.float32
        assert bool(jnp.allclose(got, ref, rtol=5e-2, atol=5e-2))

    print("KERNEL_OK")
</pallas_src>

<mosaic_0001>
module attributes {stable_mosaic.version = 11 : i64} {
  func.func @mlp_kernel(%arg0: memref<2x2048xbf16, #tpu.memory_space<vmem>>, %arg1: memref<2048x1024xbf16, #tpu.memory_space<vmem>>, %arg2: memref<1x1024xf32, #tpu.memory_space<vmem>>, %arg3: memref<1024x256xbf16, #tpu.memory_space<vmem>>, %arg4: memref<1x256xf32, #tpu.memory_space<vmem>>, %arg5: memref<256x128xbf16, #tpu.memory_space<vmem>>, %arg6: memref<1x128xf32, #tpu.memory_space<vmem>>, %arg7: memref<2x128xf32, #tpu.memory_space<vmem>>) attributes {dimension_semantics = [], scalar_prefetch = 0 : i64, scratch_operands = 0 : i64, tpu.core_type = #tpu.core_type<tc>} {
    %c0 = arith.constant 0 : index
    %c0_0 = arith.constant 0 : index
    %0 = vector.load %arg0[%c0, %c0_0] : memref<2x2048xbf16, #tpu.memory_space<vmem>>, vector<2x2048xbf16>
    %c0_1 = arith.constant 0 : index
    %c0_2 = arith.constant 0 : index
    %1 = vector.load %arg1[%c0_1, %c0_2] : memref<2048x1024xbf16, #tpu.memory_space<vmem>>, vector<2048x1024xbf16>
    %cst = arith.constant dense<0.000000e+00> : vector<2x1024xf32>
    %2 = tpu.matmul %0, %1, %cst {dimension_numbers = #tpu.dot_dimension_numbers<[1], [0], [0], [1], [0, 0, 1, 1], [], []>} : vector<2x2048xbf16>, vector<2048x1024xbf16>, vector<2x1024xf32> -> vector<2x1024xf32>
    %c0_3 = arith.constant 0 : index
    %c0_4 = arith.constant 0 : index
    %3 = vector.load %arg2[%c0_3, %c0_4] : memref<1x1024xf32, #tpu.memory_space<vmem>>, vector<1x1024xf32>
    %4 = vector.broadcast %3 : vector<1x1024xf32> to vector<2x1024xf32>
    %5 = arith.addf %2, %4 : vector<2x1024xf32>
    %cst_5 = arith.constant 0.000000e+00 : f32
    %6 = vector.broadcast %cst_5 : f32 to vector<2x1024xf32>
    %7 = arith.maximumf %5, %6 : vector<2x1024xf32>
    %c0_6 = arith.constant 0 : index
    %c0_7 = arith.constant 0 : index
    %8 = vector.load %arg3[%c0_6, %c0_7] : memref<1024x256xbf16, #tpu.memory_space<vmem>>, vector<1024x256xbf16>
    %9 = arith.extf %8 : vector<1024x256xbf16> to vector<1024x256xf32>
    %cst_8 = arith.constant dense<0.000000e+00> : vector<2x256xf32>
    %10 = tpu.matmul %7, %9, %cst_8 {dimension_numbers = #tpu.dot_dimension_numbers<[1], [0], [0], [1], [0, 0, 1, 1], [], []>} : vector<2x1024xf32>, vector<1024x256xf32>, vector<2x256xf32> -> vector<2x256xf32>
    %c0_9 = arith.constant 0 : index
    %c0_10 = arith.constant 0 : index
    %11 = vector.load %arg4[%c0_9, %c0_10] : memref<1x256xf32, #tpu.memory_space<vmem>>, vector<1x256xf32>
    %12 = vector.broadcast %11 : vector<1x256xf32> to vector<2x256xf32>
    %13 = arith.addf %10, %12 : vector<2x256xf32>
    %cst_11 = arith.constant 0.000000e+00 : f32
    %14 = vector.broadcast %cst_11 : f32 to vector<2x256xf32>
    %15 = arith.maximumf %13, %14 : vector<2x256xf32>
    %c0_12 = arith.constant 0 : index
    %c0_13 = arith.constant 0 : index
    %16 = vector.load %arg5[%c0_12, %c0_13] : memref<256x128xbf16, #tpu.memory_space<vmem>>, vector<256x128xbf16>
    %17 = arith.extf %16 : vector<256x128xbf16> to vector<256x128xf32>
    %cst_14 = arith.constant dense<0.000000e+00> : vector<2x128xf32>
    %18 = tpu.matmul %15, %17, %cst_14 {dimension_numbers = #tpu.dot_dimension_numbers<[1], [0], [0], [1], [0, 0, 1, 1], [], []>} : vector<2x256xf32>, vector<256x128xf32>, vector<2x128xf32> -> vector<2x128xf32>
    %c0_15 = arith.constant 0 : index
    %c0_16 = arith.constant 0 : index
    %19 = vector.load %arg6[%c0_15, %c0_16] : memref<1x128xf32, #tpu.memory_space<vmem>>, vector<1x128xf32>
    %20 = vector.broadcast %19 : vector<1x128xf32> to vector<2x128xf32>
    %21 = arith.addf %18, %20 : vector<2x128xf32>
    %c0_17 = arith.constant 0 : index
    %c0_18 = arith.constant 0 : index
    %22 = vector.load %arg7[%c0_17, %c0_18] : memref<2x128xf32, #tpu.memory_space<vmem>>, vector<2x128xf32>
    tpu.vector_store %arg7[%c0_17, %c0_18], %21 {strides = array<i32>} : memref<2x128xf32, #tpu.memory_space<vmem>>, vector<2x128xf32>,
    return
  }
}

</mosaic_0001>

<bundles_post_ra>
// kernel: _lambda_.1
= control target key start
LH: loop header
LB: loop body
LE: loop exit
PB: predicated region body
PF: predicated region fallthrough
CT: control target
= control target key end

     0   :  { %v1055_v32 = vlaneseq  ;;  %v10392_v33 = vmov 1966171168   ;;  %s14165_s0 = inlined_call_operand.vmem [shape: bf16[2,2048], index: 0, kind: input, shape index: {}]   ;;  %s14166_s1 = inlined_call_operand.vmem [shape: bf16[2048,1024], index: 1, kind: input, shape index: {}]   ;;  %s14167_s2 = inlined_call_operand.vmem [shape: f32[1,1024], index: 2, kind: input, shape index: {}]   ;;  %s14168_s3 = inlined_call_operand.vmem [shape: bf16[1024,256], index: 3, kind: input, shape index: {}]   ;;  %s14169_s4 = inlined_call_operand.vmem [shape: f32[1,256], index: 4, kind: input, shape index: {}]   ;;  %s14170_s5 = inlined_call_operand.vmem [shape: bf16[256,128], index: 5, kind: input, shape index: {}]   ;;  %s14171_s6 = inlined_call_operand.vmem [shape: f32[1,128], index: 6, kind: input, shape index: {}]   ;;  %s14172_s7 = inlined_call_operand.hbm [shape: f32[2,128], index: 7, kind: output, shape index: {}]  }
   0x1   :  { %v29_v0 = vld [vmem:[%s14166_s1] sm:$0xff]  ;;  %v1099_v34 = vunpack.c.l.s4 %v10392_v33 }
   0x2   :  { %v33_v1 = vld [vmem:[%s14166_s1 + $0x20] sm:$0xff]  ;;  %v10500_v43 = vshrl.u32 %v1055_v32, 7 }
   0x3   :  { %v285_v2 = vld [vmem:[%s14166_s1 + $0x800] sm:$0xff]  ;;  %v8490_v3 = vcombine.high %v29_v0, %v33_v1  ;;  %v8489_v5 = vcombine.low %v29_v0, %v33_v1  ;;  %v1100_v44 = vunpack.c.0.s8 %v1099_v34 }
   0x4   :  { %v289_v4 = vld [vmem:[%s14166_s1 + $0x820] sm:$0xff] }
   0x5   :  { %v37_v6 = vld [vmem:[%s14166_s1 + $0x40] sm:$0xff]  ;;  %v8746_v8 = vcombine.high %v285_v2, %v289_v4  ;;  %v8745_v9 = vcombine.low %v285_v2, %v289_v4  ;;  %6331 = vmatprep.subr.bf16.mxu1 %v8490_v3  ;;  %v10515_v53 = vsub.s32 %v1100_v44, %v10500_v43 }
   0x6   :  { %v41_v7 = vld [vmem:[%s14166_s1 + $0x60] sm:$0xff]  ;;  %6332 = vmatpush1.bf16.msra.mxu1 %v8489_v5 }
   0x7   :  { %v8498_v10 = vcombine.high %v37_v6, %v41_v7  ;;  %v293_v11 = vld [vmem:[%s14166_s1 + $0x840] sm:$0xff]  ;;  %6413 = vmatprep.subr.bf16.mxu0 %v8746_v8  ;;  %v8497_v18 = vcombine.low %v37_v6, %v41_v7 }
   0x8   :  { %v297_v12 = vld [vmem:[%s14166_s1 + $0x860] sm:$0xff]  ;;  %6414 = vmatpush1.bf16.msra.mxu0 %v8745_v9 }
   0x9   :  { %v45_v13 = vld [vmem:[%s14166_s1 + $0x80] sm:$0xff]  ;;  %v8754_v14 = vcombine.high %v293_v11, %v297_v12  ;;  %6333 = vmatprep.subr.bf16.mxu1 %v8498_v10  ;;  %v8753_v19 = vcombine.low %v293_v11, %v297_v12 }
   0xa   :  { %v49_v15 = vld [vmem:[%s14166_s1 + $0xa0] sm:$0xff]  ;;  %6334 = vmatpush1.bf16.msra.mxu1 %v8497_v18 }
   0xb   :  { %v301_v16 = vld [vmem:[%s14166_s1 + $0x880] sm:$0xff]  ;;  %v8506_v20 = vcombine.high %v45_v13, %v49_v15  ;;  %6415 = vmatprep.subr.bf16.mxu0 %v8754_v14  ;;  %v8505_v26 = vcombine.low %v45_v13, %v49_v15 }
   0xc   :  { %v305_v17 = vld [vmem:[%s14166_s1 + $0x8a0] sm:$0xff]  ;;  %6416 = vmatpush1.bf16.msra.mxu0 %v8753_v19 }
   0xd   :  { %v8762_v21 = vcombine.high %v301_v16, %v305_v17  ;;  %v53_v22 = vld [vmem:[%s14166_s1 + $0xc0] sm:$0xff]  ;;  %6335 = vmatprep.subr.bf16.mxu1 %v8506_v20  ;;  %v8761_v27 = vcombine.low %v301_v16, %v305_v17 }
   0xe   :  { %v57_v23 = vld [vmem:[%s14166_s1 + $0xe0] sm:$0xff]  ;;  %6336 = vmatpush1.bf16.msra.mxu1 %v8505_v26 }
   0xf   :  { %v309_v24 = vld [vmem:[%s14166_s1 + $0x8c0] sm:$0xff]  ;;  %v8514_v28 = vcombine.high %v53_v22, %v57_v23  ;;  %6417 = vmatprep.subr.bf16.mxu0 %v8762_v21  ;;  %v8513_v37 = vcombine.low %v53_v22, %v57_v23 }
  0x10   :  { %v313_v25 = vld [vmem:[%s14166_s1 + $0x8e0] sm:$0xff]  ;;  %6418 = vmatpush1.bf16.msra.mxu0 %v8761_v27 }
  0x11   :  { %v8770_v29 = vcombine.high %v309_v24, %v313_v25  ;;  %v61_v30 = vld [vmem:[%s14166_s1 + $0x100] sm:$0xff]  ;;  %6337 = vmatprep.subr.bf16.mxu1 %v8514_v28  ;;  %v8769_v38 = vcombine.low %v309_v24, %v313_v25 }
  0x12   :  { %v65_v31 = vld [vmem:[%s14166_s1 + $0x120] sm:$0xff]  ;;  %6338 = vmatpush1.bf16.msra.mxu1 %v8513_v37 }
  0x13   :  { %v317_v35 = vld [vmem:[%s14166_s1 + $0x900] sm:$0xff]  ;;  %v8522_v39 = vcombine.high %v61_v30, %v65_v31  ;;  %6419 = vmatprep.subr.bf16.mxu0 %v8770_v29  ;;  %v8521_v47 = vcombine.low %v61_v30, %v65_v31 }
  0x14   :  { %v321_v36 = vld [vmem:[%s14166_s1 + $0x920] sm:$0xff]  ;;  %6420 = vmatpush1.bf16.msra.mxu0 %v8769_v38 }
  0x15   :  { %v8778_v40 = vcombine.high %v317_v35, %v321_v36  ;;  %v69_v41 = vld [vmem:[%s14166_s1 + $0x140] sm:$0xff]  ;;  %6339 = vmatprep.subr.bf16.mxu1 %v8522_v39  ;;  %v8777_v48 = vcombine.low %v317_v35, %v321_v36 }
  0x16   :  { %v73_v42 = vld [vmem:[%s14166_s1 + $0x160] sm:$0xff]  ;;  %6340 = vmatpush1.bf16.msra.mxu1 %v8521_v47 }
  0x17   :  { %v325_v45 = vld [vmem:[%s14166_s1 + $0x940] sm:$0xff]  ;;  %v8530_v49 = vcombine.high %v69_v41, %v73_v42  ;;  %6421 = vmatprep.subr.bf16.mxu0 %v8778_v40  ;;  %v8529_v56 = vcombine.low %v69_v41, %v73_v42 }
  0x18   :  { %v329_v46 = vld [vmem:[%s14166_s1 + $0x960] sm:$0xff]  ;;  %6422 = vmatpush1.bf16.msra.mxu0 %v8777_v48 }
  0x19   :  { %v8786_v50 = vcombine.high %v325_v45, %v329_v46  ;;  %v77_v51 = vld [vmem:[%s14166_s1 + $0x180] sm:$0xff]  ;;  %6341 = vmatprep.subr.bf16.mxu1 %v8530_v49  ;;  %v8785_v57 = vcombine.low %v325_v45, %v329_v46 }
  0x1a   :  { %v81_v52 = vld [vmem:[%s14166_s1 + $0x1a0] sm:$0xff]  ;;  %6342 = vmatpush1.bf16.msra.mxu1 %v8529_v56 }
  0x1b   :  { %v333_v54 = vld [vmem:[%s14166_s1 + $0x980] sm:$0xff]  ;;  %v8538_v58 = vcombine.high %v77_v51, %v81_v52  ;;  %6423 = vmatprep.subr.bf16.mxu0 %v8786_v50  ;;  %v8537_v3 = vcombine.low %v77_v51, %v81_v52 }
  0x1c   :  { %v337_v55 = vld [vmem:[%s14166_s1 + $0x9a0] sm:$0xff]  ;;  %6424 = vmatpush1.bf16.msra.mxu0 %v8785_v57 }
  0x1d   :  { %v27_v59 = vld [vmem:[%s14165_s0] sm:$0xff]  ;;  %v8794_v60 = vcombine.high %v333_v54, %v337_v55  ;;  %6343 = vmatprep.subr.bf16.mxu1 %v8538_v58  ;;  %v8793_v6 = vcombine.low %v333_v54, %v337_v55 }
  0x1e   :  { %v85_v61 = vld [vmem:[%s14166_s1 + $0x1c0] sm:$0xff]  ;;  %v10533_v63 = vrot.slane %v27_v59, %v10515_v53  ;;  %v1097_v0 = vcombine.high %v27_v59, %v27_v59  ;;  %6344 = vmatpush1.bf16.msra.mxu1 %v8537_v3 }
  0x1f   :  { %v89_v62 = vld [vmem:[%s14166_s1 + $0x1e0] sm:$0xff]  ;;  %6425 = vmatprep.subr.bf16.mxu0 %v8794_v60 }
  0x20   :  { %v341_v1 = vld [vmem:[%s14166_s1 + $0x9c0] sm:$0xff]  ;;  %v1112_v4 = vcombine.high %v10533_v63, %v10533_v63  ;;  %v10544_v5 = vrot.slane %v1097_v0, %v10515_v53  ;;  %v8546_v7 = vcombine.high %v85_v61, %v89_v62  ;;  %v8545_v15 = vcombine.low %v85_v61, %v89_v62  ;;  %6426 = vmatpush1.bf16.msra.mxu0 %v8793_v6 }
  0x21   :  { %v345_v2 = vld [vmem:[%s14166_s1 + $0x9e0] sm:$0xff] }
  0x22   :  { %v8802_v8 = vcombine.high %v341_v1, %v345_v2  ;;  %v93_v9 = vld [vmem:[%s14166_s1 + $0x200] sm:$0xff]  ;;  %v10553_v11 = vrot.slane %v1112_v4, %v10515_v53  ;;  %v1113_v12 = vcombine.high %v10544_v5, %v10544_v5  ;;  %6345 = vmatprep.subr.bf16.mxu1 %v8546_v7  ;;  %v8801_v17 = vcombine.low %v341_v1, %v345_v2 }
  0x23   :  { %v97_v10 = vld [vmem:[%s14166_s1 + $0x220] sm:$0xff]  ;;  %6346 = vmatpush1.bf16.msra.mxu1 %v8545_v15 }
  0x24   :  { %v349_v13 = vld [vmem:[%s14166_s1 + $0xa00] sm:$0xff]  ;;  %6363 = vmatprep.mubr.bf16.mxu1 %v10553_v11  ;;  %v10565_v16 = vrot.slane %v1113_v12, %v10515_v53  ;;  %v8554_v18 = vcombine.high %v93_v9, %v97_v10  ;;  %6427 = vmatprep.subr.bf16.mxu0 %v8802_v8  ;;  %v8553_v24 = vcombine.low %v93_v9, %v97_v10 }
  0x25   :  { %v353_v14 = vld [vmem:[%s14166_s1 + $0xa20] sm:$0xff]  ;;  %6428 = vmatpush1.bf16.msra.mxu0 %v8801_v17 }
  0x26   :  { %v8810_v19 = vcombine.high %v349_v13, %v353_v14  ;;  %v101_v20 = vld [vmem:[%s14166_s1 + $0x240] sm:$0xff]  ;;  %6445 = vmatprep.mubr.bf16.mxu0 %v10565_v16  ;;  %6347 = vmatprep.subr.bf16.mxu1 %v8554_v18  ;;  %v8809_v25 = vcombine.low %v349_v13, %v353_v14 }
  0x27   :  { %v105_v21 = vld [vmem:[%s14166_s1 + $0x260] sm:$0xff]  ;;  %6348 = vmatpush1.bf16.msra.mxu1 %v8553_v24 }
  0x28   :  { %v357_v22 = vld [vmem:[%s14166_s1 + $0xa40] sm:$0xff]  ;;  %v8562_v26 = vcombine.high %v101_v20, %v105_v21  ;;  %6429 = vmatprep.subr.bf16.mxu0 %v8810_v19  ;;  %v8561_v32 = vcombine.low %v101_v20, %v105_v21 }
  0x29   :  { %v361_v23 = vld [vmem:[%s14166_s1 + $0xa60] sm:$0xff]  ;;  %6430 = vmatpush1.bf16.msra.mxu0 %v8809_v25 }
  0x2a   :  { %v8818_v27 = vcombine.high %v357_v22, %v361_v23  ;;  %v109_v28 = vld [vmem:[%s14166_s1 + $0x280] sm:$0xff]  ;;  %6349 = vmatprep.subr.bf16.mxu1 %v8562_v26  ;;  %v8817_v33 = vcombine.low %v357_v22, %v361_v23 }
  0x2b   :  { %v113_v29 = vld [vmem:[%s14166_s1 + $0x2a0] sm:$0xff]  ;;  %6350 = vmatpush1.bf16.msra.mxu1 %v8561_v32  ;;  %v10682_v32 = vrot.slane %v10544_v5, %v10515_v53 }
  0x2c   :  { %v365_v30 = vld [vmem:[%s14166_s1 + $0xa80] sm:$0xff]  ;;  %v8570_v34 = vcombine.high %v109_v28, %v113_v29  ;;  %6431 = vmatprep.subr.bf16.mxu0 %v8818_v27  ;;  %v8569_v40 = vcombine.low %v109_v28, %v113_v29  ;;  %v10672_v28 = vrot.slane %v10533_v63, %v10515_v53 }
  0x2d   :  { %v369_v31 = vld [vmem:[%s14166_s1 + $0xaa0] sm:$0xff]  ;;  %6432 = vmatpush1.bf16.msra.mxu0 %v8817_v33 }
  0x2e   :  { %v8826_v35 = vcombine.high %v365_v30, %v369_v31  ;;  %v117_v36 = vld [vmem:[%s14166_s1 + $0x2c0] sm:$0xff]  ;;  %6351 = vmatprep.subr.bf16.mxu1 %v8570_v34  ;;  %v8825_v41 = vcombine.low %v365_v30, %v369_v31 }
  0x2f   :  { %v121_v37 = vld [vmem:[%s14166_s1 + $0x2e0] sm:$0xff]  ;;  %6352 = vmatpush1.bf16.msra.mxu1 %v8569_v40 }
  0x30   :  { %v373_v38 = vld [vmem:[%s14166_s1 + $0xac0] sm:$0xff]  ;;  %v8578_v42 = vcombine.high %v117_v36, %v121_v37  ;;  %6433 = vmatprep.subr.bf16.mxu0 %v8826_v35  ;;  %v8577_v49 = vcombine.low %v117_v36, %v121_v37 }
  0x31   :  { %v377_v39 = vld [vmem:[%s14166_s1 + $0xae0] sm:$0xff]  ;;  %6434 = vmatpush1.bf16.msra.mxu0 %v8825_v41 }
  0x32   :  { %v8834_v44 = vcombine.high %v373_v38, %v377_v39  ;;  %v125_v45 = vld [vmem:[%s14166_s1 + $0x300] sm:$0xff]  ;;  %6353 = vmatprep.subr.bf16.mxu1 %v8578_v42  ;;  %v8833_v50 = vcombine.low %v373_v38, %v377_v39  ;;  %v10698_v38 = vcombine.high %v10553_v11, %v10553_v11  ;;  %v10703_v39 = vcombine.high %v10565_v16, %v10565_v16 }
  0x33   :  { %v129_v46 = vld [vmem:[%s14166_s1 + $0x320] sm:$0xff]  ;;  %6354 = vmatpush1.bf16.msra.mxu1 %v8577_v49 }
  0x34   :  { %v381_v47 = vld [vmem:[%s14166_s1 + $0xb00] sm:$0xff]  ;;  %v8586_v51 = vcombine.high %v125_v45, %v129_v46  ;;  %6435 = vmatprep.subr.bf16.mxu0 %v8834_v44  ;;  %v8585_v58 = vcombine.low %v125_v45, %v129_v46 }
  0x35   :  { %v385_v48 = vld [vmem:[%s14166_s1 + $0xb20] sm:$0xff]  ;;  %6436 = vmatpush1.bf16.msra.mxu0 %v8833_v50 }
  0x36   :  { %v8842_v52 = vcombine.high %v381_v47, %v385_v48  ;;  %v133_v54 = vld [vmem:[%s14166_s1 + $0x340] sm:$0xff]  ;;  %6355 = vmatprep.subr.bf16.mxu1 %v8586_v51  ;;  %v8841_v59 = vcombine.low %v381_v47, %v385_v48 }
  0x37   :  { %v137_v55 = vld [vmem:[%s14166_s1 + $0x360] sm:$0xff]  ;;  %6356 = vmatpush1.bf16.msra.mxu1 %v8585_v58 }
  0x38   :  { %v389_v56 = vld [vmem:[%s14166_s1 + $0xb40] sm:$0xff]  ;;  %v8594_v60 = vcombine.high %v133_v54, %v137_v55  ;;  %6437 = vmatprep.subr.bf16.mxu0 %v8842_v52  ;;  %v8593_v3 = vcombine.low %v133_v54, %v137_v55 }
  0x39   :  { %v393_v57 = vld [vmem:[%s14166_s1 + $0xb60] sm:$0xff]  ;;  %6438 = vmatpush1.bf16.msra.mxu0 %v8841_v59 }
  0x3a   :  { %v8850_v61 = vcombine.high %v389_v56, %v393_v57  ;;  %v141_v62 = vld [vmem:[%s14166_s1 + $0x380] sm:$0xff]  ;;  %6357 = vmatprep.subr.bf16.mxu1 %v8594_v60  ;;  %v8849_v4 = vcombine.low %v389_v56, %v393_v57 }
  0x3b   :  { %v145_v0 = vld [vmem:[%s14166_s1 + $0x3a0] sm:$0xff]  ;;  %6358 = vmatpush1.bf16.msra.mxu1 %v8593_v3 }
  0x3c   :  { %v397_v1 = vld [vmem:[%s14166_s1 + $0xb80] sm:$0xff]  ;;  %v8602_v6 = vcombine.high %v141_v62, %v145_v0  ;;  %6439 = vmatprep.subr.bf16.mxu0 %v8850_v61  ;;  %v8601_v13 = vcombine.low %v141_v62, %v145_v0 }
  0x3d   :  { %v401_v2 = vld [vmem:[%s14166_s1 + $0xba0] sm:$0xff]  ;;  %6440 = vmatpush1.bf16.msra.mxu0 %v8849_v4 }
  0x3e   :  { %v8858_v7 = vcombine.high %v397_v1, %v401_v2  ;;  %v149_v8 = vld [vmem:[%s14166_s1 + $0x3c0] sm:$0xff]  ;;  %6359 = vmatprep.subr.bf16.mxu1 %v8602_v6  ;;  %v8857_v14 = vcombine.low %v397_v1, %v401_v2 }
  0x3f   :  { %v153_v9 = vld [vmem:[%s14166_s1 + $0x3e0] sm:$0xff]  ;;  %6360 = vmatpush1.bf16.msra.mxu1 %v8601_v13 }
  0x40   :  { %v405_v10 = vld [vmem:[%s14166_s1 + $0xbc0] sm:$0xff]  ;;  %v8610_v15 = vcombine.high %v149_v8, %v153_v9  ;;  %6441 = vmatprep.subr.bf16.mxu0 %v8858_v7  ;;  %v8609_v22 = vcombine.low %v149_v8, %v153_v9 }
  0x41   :  { %v409_v12 = vld [vmem:[%s14166_s1 + $0xbe0] sm:$0xff]  ;;  %6442 = vmatpush1.bf16.msra.mxu0 %v8857_v14 }
  0x42   :  { %v8866_v17 = vcombine.high %v405_v10, %v409_v12  ;;  %v157_v18 = vld [vmem:[%s14166_s1 + $0x400] sm:$0xff]  ;;  %6361 = vmatprep.subr.bf16.mxu1 %v8610_v15  ;;  %v8865_v23 = vcombine.low %v405_v10, %v409_v12 }
  0x43   :  { %v161_v19 = vld [vmem:[%s14166_s1 + $0x420] sm:$0xff]  ;;  %6362 = vmatpush1.bf16.msra.mxu1 %v8609_v22 }
  0x44   :  { %v413_v20 = vld [vmem:[%s14166_s1 + $0xc00] sm:$0xff]  ;;  %v8618_v24 = vcombine.high %v157_v18, %v161_v19  ;;  %6443 = vmatprep.subr.bf16.mxu0 %v8866_v17  ;;  %v8617_v31 = vcombine.low %v157_v18, %v161_v19 }
  0x45   :  { %v417_v21 = vld [vmem:[%s14166_s1 + $0xc20] sm:$0xff]  ;;  %6444 = vmatpush1.bf16.msra.mxu0 %v8865_v23 }
  0x46   :  { %v8874_v25 = vcombine.high %v413_v20, %v417_v21  ;;  %v165_v26 = vld [vmem:[%s14166_s1 + $0x440] sm:$0xff]  ;;  %6372 = vmatprep.subr.bf16.mxu1 %v8618_v24  ;;  %v8873_v33 = vcombine.low %v413_v20, %v417_v21  ;;  %6364 = vmatmul.mubr.bf16.vlgmr.msra.gmra.mrb[0].mxu1 %v10672_v28 }
  0x47   :  { %v169_v27 = vld [vmem:[%s14166_s1 + $0x460] sm:$0xff]  ;;  %6373 = vmatpush1.bf16.msra.mxu1 %v8617_v31  ;;  %6404 = vmatprep.mubr.bf16.mxu1 %v10698_v38 }
  0x48   :  { %v421_v29 = vld [vmem:[%s14166_s1 + $0xc40] sm:$0xff]  ;;  %v8626_v34 = vcombine.high %v165_v26, %v169_v27  ;;  %6454 = vmatprep.subr.bf16.mxu0 %v8874_v25  ;;  %6446 = vmatmul.mubr.bf16.vlgmr.msra.gmra.mrb[0].mxu0 %v10682_v32  ;;  %v8625_v40 = vcombine.low %v165_v26, %v169_v27 }
  0x49   :  { %v425_v30 = vld [vmem:[%s14166_s1 + $0xc60] sm:$0xff]  ;;  %6455 = vmatpush1.bf16.msra.mxu0 %v8873_v33  ;;  %6486 = vmatprep.mubr.bf16.mxu0 %v10703_v39 }
  0x4a   :  { %v173_v63 = vld [vmem:[%s14166_s1 + $0x480] sm:$0xff]  ;;  %v8882_v37 = vcombine.high %v421_v29, %v425_v30  ;;  %6374 = vmatprep.subr.bf16.mxu1 %v8626_v34  ;;  %v8881_v41 = vcombine.low %v421_v29, %v425_v30 }
  0x4b   :  { %v177_v35 = vld [vmem:[%s14166_s1 + $0x4a0] sm:$0xff]  ;;  %6375 = vmatpush1.bf16.msra.mxu1 %v8625_v40 }
  0x4c   :  { %v429_v36 = vld [vmem:[%s14166_s1 + $0xc80] sm:$0xff]  ;;  %v8634_v42 = vcombine.high %v173_v63, %v177_v35  ;;  %6456 = vmatprep.subr.bf16.mxu0 %v8882_v37  ;;  %v8633_v49 = vcombine.low %v173_v63, %v177_v35 }
  0x4d   :  { %v433_v5 = vld [vmem:[%s14166_s1 + $0xca0] sm:$0xff]  ;;  %6457 = vmatpush1.bf16.msra.mxu0 %v8881_v41 }
  0x4e   :  { %v181_v44 = vld [vmem:[%s14166_s1 + $0x4c0] sm:$0xff]  ;;  %v8890_v47 = vcombine.high %v429_v36, %v433_v5  ;;  %6376 = vmatprep.subr.bf16.mxu1 %v8634_v42  ;;  %v8889_v50 = vcombine.low %v429_v36, %v433_v5 }
  0x4f   :  { %v185_v45 = vld [vmem:[%s14166_s1 + $0x4e0] sm:$0xff]  ;;  %6377 = vmatpush1.bf16.msra.mxu1 %v8633_v49 }
  0x50   :  { %v437_v46 = vld [vmem:[%s14166_s1 + $0xcc0] sm:$0xff]  ;;  %v8642_v51 = vcombine.high %v181_v44, %v185_v45  ;;  %6458 = vmatprep.subr.bf16.mxu0 %v8890_v47  ;;  %v8641_v58 = vcombine.low %v181_v44, %v185_v45 }
  0x51   :  { %v441_v48 = vld [vmem:[%s14166_s1 + $0xce0] sm:$0xff]  ;;  %6459 = vmatpush1.bf16.msra.mxu0 %v8889_v50 }
  0x52   :  { %v189_v52 = vld [vmem:[%s14166_s1 + $0x500] sm:$0xff]  ;;  %v8898_v56 = vcombine.high %v437_v46, %v441_v48  ;;  %6378 = vmatprep.subr.bf16.mxu1 %v8642_v51  ;;  %v8897_v59 = vcombine.low %v437_v46, %v441_v48 }
  0x53   :  { %v193_v54 = vld [vmem:[%s14166_s1 + $0x520] sm:$0xff]  ;;  %6379 = vmatpush1.bf16.msra.mxu1 %v8641_v58 }
  0x54   :  { %v445_v55 = vld [vmem:[%s14166_s1 + $0xd00] sm:$0xff]  ;;  %v8650_v60 = vcombine.high %v189_v52, %v193_v54  ;;  %6460 = vmatprep.subr.bf16.mxu0 %v8898_v56  ;;  %v8649_v3 = vcombine.low %v189_v52, %v193_v54 }
  0x55   :  { %v449_v57 = vld [vmem:[%s14166_s1 + $0xd20] sm:$0xff]  ;;  %6461 = vmatpush1.bf16.msra.mxu0 %v8897_v59 }
  0x56   :  { %v197_v61 = vld [vmem:[%s14166_s1 + $0x540] sm:$0xff]  ;;  %v8906_v1 = vcombine.high %v445_v55, %v449_v57  ;;  %6380 = vmatprep.subr.bf16.mxu1 %v8650_v60  ;;  %v8905_v4 = vcombine.low %v445_v55, %v449_v57 }
  0x57   :  { %v201_v62 = vld [vmem:[%s14166_s1 + $0x560] sm:$0xff]  ;;  %6381 = vmatpush1.bf16.msra.mxu1 %v8649_v3 }
  0x58   :  { %v453_v0 = vld [vmem:[%s14166_s1 + $0xd40] sm:$0xff]  ;;  %v8658_v6 = vcombine.high %v197_v61, %v201_v62  ;;  %6462 = vmatprep.subr.bf16.mxu0 %v8906_v1  ;;  %v8657_v13 = vcombine.low %v197_v61, %v201_v62 }
  0x59   :  { %v457_v2 = vld [vmem:[%s14166_s1 + $0xd60] sm:$0xff]  ;;  %6463 = vmatpush1.bf16.msra.mxu0 %v8905_v4 }
  0x5a   :  { %v205_v7 = vld [vmem:[%s14166_s1 + $0x580] sm:$0xff]  ;;  %v8914_v10 = vcombine.high %v453_v0, %v457_v2  ;;  %6382 = vmatprep.subr.bf16.mxu1 %v8658_v6  ;;  %v8913_v14 = vcombine.low %v453_v0, %v457_v2 }
  0x5b   :  { %v209_v8 = vld [vmem:[%s14166_s1 + $0x5a0] sm:$0xff]  ;;  %6383 = vmatpush1.bf16.msra.mxu1 %v8657_v13 }
  0x5c   :  { %v461_v9 = vld [vmem:[%s14166_s1 + $0xd80] sm:$0xff]  ;;  %v8666_v15 = vcombine.high %v205_v7, %v209_v8  ;;  %6464 = vmatprep.subr.bf16.mxu0 %v8914_v10  ;;  %v8665_v22 = vcombine.low %v205_v7, %v209_v8 }
  0x5d   :  { %v465_v12 = vld [vmem:[%s14166_s1 + $0xda0] sm:$0xff]  ;;  %6465 = vmatpush1.bf16.msra.mxu0 %v8913_v14 }
  0x5e   :  { %v213_v17 = vld [vmem:[%s14166_s1 + $0x5c0] sm:$0xff]  ;;  %v8922_v20 = vcombine.high %v461_v9, %v465_v12  ;;  %6384 = vmatprep.subr.bf16.mxu1 %v8666_v15  ;;  %v8921_v23 = vcombine.low %v461_v9, %v465_v12 }
  0x5f   :  { %v217_v18 = vld [vmem:[%s14166_s1 + $0x5e0] sm:$0xff]  ;;  %6385 = vmatpush1.bf16.msra.mxu1 %v8665_v22 }
  0x60   :  { %v469_v19 = vld [vmem:[%s14166_s1 + $0xdc0] sm:$0xff]  ;;  %v8674_v24 = vcombine.high %v213_v17, %v217_v18  ;;  %6466 = vmatprep.subr.bf16.mxu0 %v8922_v20  ;;  %v8673_v31 = vcombine.low %v213_v17, %v217_v18 }
  0x61   :  { %v473_v21 = vld [vmem:[%s14166_s1 + $0xde0] sm:$0xff]  ;;  %6467 = vmatpush1.bf16.msra.mxu0 %v8921_v23 }
  0x62   :  { %v221_v25 = vld [vmem:[%s14166_s1 + $0x600] sm:$0xff]  ;;  %v8930_v29 = vcombine.high %v469_v19, %v473_v21  ;;  %6386 = vmatprep.subr.bf16.mxu1 %v8674_v24  ;;  %v8929_v33 = vcombine.low %v469_v19, %v473_v21 }
  0x63   :  { %v225_v26 = vld [vmem:[%s14166_s1 + $0x620] sm:$0xff]  ;;  %6387 = vmatpush1.bf16.msra.mxu1 %v8673_v31  ;;  %v10867_v31 = vld [vmem:[%s14165_s0 + $0x8] sm:$0xff] }
  0x64   :  { %v477_v27 = vld [vmem:[%s14166_s1 + $0xe00] sm:$0xff]  ;;  %v8682_v34 = vcombine.high %v221_v25, %v225_v26  ;;  %6468 = vmatprep.subr.bf16.mxu0 %v8930_v29  ;;  %v8681_v40 = vcombine.low %v221_v25, %v225_v26 }
  0x65   :  { %v481_v30 = vld [vmem:[%s14166_s1 + $0xe20] sm:$0xff]  ;;  %6469 = vmatpush1.bf16.msra.mxu0 %v8929_v33 }
  0x66   :  { %v229_v63 = vld [vmem:[%s14166_s1 + $0x640] sm:$0xff]  ;;  %v8938_v37 = vcombine.high %v477_v27, %v481_v30  ;;  %6388 = vmatprep.subr.bf16.mxu1 %v8682_v34  ;;  %v8937_v41 = vcombine.low %v477_v27, %v481_v30 }
  0x67   :  { %v233_v35 = vld [vmem:[%s14166_s1 + $0x660] sm:$0xff]  ;;  %6389 = vmatpush1.bf16.msra.mxu1 %v8681_v40  ;;  %v34_v40 = vld [vmem:[%s14166_s1 + $0x28] sm:$0xff] }
  0x68   :  { %v485_v36 = vld [vmem:[%s14166_s1 + $0xe40] sm:$0xff]  ;;  %v8690_v42 = vcombine.high %v229_v63, %v233_v35  ;;  %6470 = vmatprep.subr.bf16.mxu0 %v8938_v37  ;;  %v8689_v49 = vcombine.low %v229_v63, %v233_v35  ;;  %v30_v37 = vld [vmem:[%s14166_s1 + $0x8] sm:$0xff] }
  0x69   :  { %v489_v5 = vld [vmem:[%s14166_s1 + $0xe60] sm:$0xff]  ;;  %6471 = vmatpush1.bf16.msra.mxu0 %v8937_v41  ;;  %v10883_v41 = vrot.slane %v10867_v31, %v10515_v53 }
  0x6a   :  { %v237_v44 = vld [vmem:[%s14166_s1 + $0x680] sm:$0xff]  ;;  %v8946_v47 = vcombine.high %v485_v36, %v489_v5  ;;  %6390 = vmatprep.subr.bf16.mxu1 %v8690_v42  ;;  %v8945_v50 = vcombine.low %v485_v36, %v489_v5 }
  0x6b   :  { %v241_v45 = vld [vmem:[%s14166_s1 + $0x6a0] sm:$0xff]  ;;  %6391 = vmatpush1.bf16.msra.mxu1 %v8689_v49 }
  0x6c   :  { %v493_v46 = vld [vmem:[%s14166_s1 + $0xe80] sm:$0xff]  ;;  %v8698_v51 = vcombine.high %v237_v44, %v241_v45  ;;  %6472 = vmatprep.subr.bf16.mxu0 %v8946_v47  ;;  %v8697_v58 = vcombine.low %v237_v44, %v241_v45  ;;  %v8492_v45 = vcombine.high %v30_v37, %v34_v40 }
  0x6d   :  { %v497_v48 = vld [vmem:[%s14166_s1 + $0xea0] sm:$0xff]  ;;  %6473 = vmatpush1.bf16.msra.mxu0 %v8945_v50  ;;  %v42_v50 = vld [vmem:[%s14166_s1 + $0x68] sm:$0xff] }
  0x6e   :  { %v245_v52 = vld [vmem:[%s14166_s1 + $0x6c0] sm:$0xff]  ;;  %v8954_v56 = vcombine.high %v493_v46, %v497_v48  ;;  %6392 = vmatprep.subr.bf16.mxu1 %v8698_v51  ;;  %v8953_v59 = vcombine.low %v493_v46, %v497_v48  ;;  %v38_v48 = vld [vmem:[%s14166_s1 + $0x48] sm:$0xff]  ;;  %v1161_v51 = vcombine.high %v10883_v41, %v10883_v41 }
  0x6f   :  { %v249_v54 = vld [vmem:[%s14166_s1 + $0x6e0] sm:$0xff]  ;;  %6393 = vmatpush1.bf16.msra.mxu1 %v8697_v58 }
  0x70   :  { %v501_v55 = vld [vmem:[%s14166_s1 + $0xec0] sm:$0xff]  ;;  %v8706_v60 = vcombine.high %v245_v52, %v249_v54  ;;  %6474 = vmatprep.subr.bf16.mxu0 %v8954_v56  ;;  %v8705_v3 = vcombine.low %v245_v52, %v249_v54  ;;  %v10901_v52 = vcombine.high %v10672_v28, %v10672_v28  ;;  %v8491_v54 = vcombine.low %v30_v37, %v34_v40 }
  0x71   :  { %v505_v57 = vld [vmem:[%s14166_s1 + $0xee0] sm:$0xff]  ;;  %6475 = vmatpush1.bf16.msra.mxu0 %v8953_v59 }
  0x72   :  { %v253_v61 = vld [vmem:[%s14166_s1 + $0x700] sm:$0xff]  ;;  %v8962_v1 = vcombine.high %v501_v55, %v505_v57  ;;  %6394 = vmatprep.subr.bf16.mxu1 %v8706_v60  ;;  %v8961_v4 = vcombine.low %v501_v55, %v505_v57  ;;  %v10905_v55 = vcombine.high %v10682_v32, %v10682_v32 }
  0x73   :  { %v257_v62 = vld [vmem:[%s14166_s1 + $0x720] sm:$0xff]  ;;  %6395 = vmatpush1.bf16.msra.mxu1 %v8705_v3 }
  0x74   :  { %v509_v0 = vld [vmem:[%s14166_s1 + $0xf00] sm:$0xff]  ;;  %v8714_v6 = vcombine.high %v253_v61, %v257_v62  ;;  %6476 = vmatprep.subr.bf16.mxu0 %v8962_v1  ;;  %v8713_v13 = vcombine.low %v253_v61, %v257_v62 }
  0x75   :  { %v513_v2 = vld [vmem:[%s14166_s1 + $0xf20] sm:$0xff]  ;;  %6477 = vmatpush1.bf16.msra.mxu0 %v8961_v4 }
  0x76   :  { %v261_v7 = vld [vmem:[%s14166_s1 + $0x740] sm:$0xff]  ;;  %v8970_v10 = vcombine.high %v509_v0, %v513_v2  ;;  %6396 = vmatprep.subr.bf16.mxu1 %v8714_v6  ;;  %v8969_v14 = vcombine.low %v509_v0, %v513_v2 }
  0x77   :  { %v265_v8 = vld [vmem:[%s14166_s1 + $0x760] sm:$0xff]  ;;  %6397 = vmatpush1.bf16.msra.mxu1 %v8713_v13 }
  0x78   :  { %v517_v9 = vld [vmem:[%s14166_s1 + $0xf40] sm:$0xff]  ;;  %v8722_v15 = vcombine.high %v261_v7, %v265_v8  ;;  %6478 = vmatprep.subr.bf16.mxu0 %v8970_v10  ;;  %v8721_v22 = vcombine.low %v261_v7, %v265_v8 }
  0x79   :  { %v521_v12 = vld [vmem:[%s14166_s1 + $0xf60] sm:$0xff]  ;;  %6479 = vmatpush1.bf16.msra.mxu0 %v8969_v14 }
  0x7a   :  { %v269_v17 = vld [vmem:[%s14166_s1 + $0x780] sm:$0xff]  ;;  %v8978_v20 = vcombine.high %v517_v9, %v521_v12  ;;  %6398 = vmatprep.subr.bf16.mxu1 %v8722_v15  ;;  %v8977_v24 = vcombine.low %v517_v9, %v521_v12 }
  0x7b   :  { %v273_v18 = vld [vmem:[%s14166_s1 + $0x7a0] sm:$0xff]  ;;  %6399 = vmatpush1.bf16.msra.mxu1 %v8721_v22 }
  0x7c   :  { %v525_v19 = vld [vmem:[%s14166_s1 + $0xf80] sm:$0xff]  ;;  %v8730_v25 = vcombine.high %v269_v17, %v273_v18  ;;  %6480 = vmatprep.subr.bf16.mxu0 %v8978_v20  ;;  %v8729_v33 = vcombine.low %v269_v17, %v273_v18 }
  0x7d   :  { %v529_v21 = vld [vmem:[%s14166_s1 + $0xfa0] sm:$0xff]  ;;  %6481 = vmatpush1.bf16.msra.mxu0 %v8977_v24 }
  0x7e   :  { %v277_v23 = vld [vmem:[%s14166_s1 + $0x7c0] sm:$0xff]  ;;  %v8986_v30 = vcombine.high %v525_v19, %v529_v21  ;;  %6400 = vmatprep.subr.bf16.mxu1 %v8730_v25  ;;  %v8985_v34 = vcombine.low %v525_v19, %v529_v21 }
  0x7f   :  { %v281_v26 = vld [vmem:[%s14166_s1 + $0x7e0] sm:$0xff]  ;;  %6401 = vmatpush1.bf16.msra.mxu1 %v8729_v33 }
  0x80   :  { %v533_v27 = vld [vmem:[%s14166_s1 + $0xfc0] sm:$0xff]  ;;  %v8738_v63 = vcombine.high %v277_v23, %v281_v26  ;;  %6482 = vmatprep.subr.bf16.mxu0 %v8986_v30  ;;  %v8737_v42 = vcombine.low %v277_v23, %v281_v26 }
  0x81   :  { %v537_v29 = vld [vmem:[%s14166_s1 + $0xfe0] sm:$0xff]  ;;  %6483 = vmatpush1.bf16.msra.mxu0 %v8985_v34 }
  0x82   :  { %v541_v35 = vld [vmem:[%s14166_s1 + $0x1000] sm:$0xff]  ;;  %v8994_v5 = vcombine.high %v533_v27, %v537_v29  ;;  %6402 = vmatprep.subr.bf16.mxu1 %v8738_v63  ;;  %v8993_v44 = vcombine.low %v533_v27, %v537_v29 }
  0x83   :  { %v545_v36 = vld [vmem:[%s14166_s1 + $0x1020] sm:$0xff]  ;;  %6403 = vmatpush1.bf16.msra.mxu1 %v8737_v42 }
  0x84   :  { %v549_v46 = vld [vmem:[%s14166_s1 + $0x1040] sm:$0xff]  ;;  %6484 = vmatprep.subr.bf16.mxu0 %v8994_v5  ;;  %v9002_v49 = vcombine.high %v541_v35, %v545_v36 }
  0x85   :  { %v553_v47 = vld [vmem:[%s14166_s1 + $0x1060] sm:$0xff] }
  0x86   :  { %12 = vsyncpa [#allocation3], 0  ;;  %6485 = vmatpush1.bf16.msra.mxu0 %v8993_v44  ;;  %v9001_v56 = vcombine.low %v541_v35, %v545_v36  ;;  %6659 = vmatprep.subr.bf16.mxu1 %v8492_v45  ;;  %v8500_v57 = vcombine.high %v38_v48, %v42_v50  ;;  %v9010_v58 = vcombine.high %v549_v46, %v553_v47  ;;  %v46_v59 = vld [vmem:[%s14166_s1 + $0x88] sm:$0xff]  ;;  %v557_v62 = vld [vmem:[%s14166_s1 + $0x1080] sm:$0xff] }
  0x87   :  { %6495 = vmatprep.subr.bf16.mxu0 %v9002_v49  ;;  %v50_v60 = vld [vmem:[%s14166_s1 + $0xa8] sm:$0xff]  ;;  %v10914_v61 = vrot.slane %v1161_v51, %v10515_v53  ;;  %6405 = vmatmul.mubr.bf16.vlgmr.msra.gmra.mrb[0].mxu1 %v10901_v52  ;;  %v561_v0 = vld [vmem:[%s14166_s1 + $0x10a0] sm:$0xff]  ;;  %v8499_v1 = vcombine.low %v38_v48, %v42_v50  ;;  %v9009_v2 = vcombine.low %v549_v46, %v553_v47 }
  0x88   :  { %6660 = vmatpush1.bf16.msra.mxu1 %v8491_v54  ;;  %v8508_v3 = vcombine.high %v46_v59, %v50_v60  ;;  %v9018_v4 = vcombine.high %v557_v62, %v561_v0  ;;  %v54_v6 = vld [vmem:[%s14166_s1 + $0xc8] sm:$0xff]  ;;  %v565_v8 = vld [vmem:[%s14166_s1 + $0x10c0] sm:$0xff]  ;;  %6691 = vmatprep.mubr.bf16.mxu1 %v10553_v11  ;;  %v8507_v10 = vcombine.low %v46_v59, %v50_v60 }
  0x89   :  { %6487 = vmatmul.mubr.bf16.vlgmr.msra.gmra.mrb[0].mxu0 %v10905_v55  ;;  %6661 = vmatprep.subr.bf16.mxu1 %v8500_v57  ;;  %v58_v7 = vld [vmem:[%s14166_s1 + $0xe8] sm:$0xff]  ;;  %v569_v9 = vld [vmem:[%s14166_s1 + $0x10e0] sm:$0xff]  ;;  %v9017_v12 = vcombine.low %v557_v62, %v561_v0 }
  0x8a   :  { %6496 = vmatpush1.bf16.msra.mxu0 %v9001_v56  ;;  %6527 = vmatprep.mubr.bf16.mxu0 %v10914_v61  ;;  %v8516_v13 = vcombine.high %v54_v6, %v58_v7  ;;  %v9026_v14 = vcombine.high %v565_v8, %v569_v9  ;;  %v62_v15 = vld [vmem:[%s14166_s1 + $0x108] sm:$0xff]  ;;  %v573_v18 = vld [vmem:[%s14166_s1 + $0x1100] sm:$0xff]  ;;  %v8515_v20 = vcombine.low %v54_v6, %v58_v7 }
  0x8b   :  { %6497 = vmatprep.subr.bf16.mxu0 %v9010_v58  ;;  %v66_v17 = vld [vmem:[%s14166_s1 + $0x128] sm:$0xff]  ;;  %v577_v19 = vld [vmem:[%s14166_s1 + $0x1120] sm:$0xff]  ;;  %v9025_v21 = vcombine.low %v565_v8, %v569_v9 }
  0x8c   :  { %6662 = vmatpush1.bf16.msra.mxu1 %v8499_v1  ;;  %v8524_v22 = vcombine.high %v62_v15, %v66_v17  ;;  %v9034_v23 = vcombine.high %v573_v18, %v577_v19  ;;  %v70_v24 = vld [vmem:[%s14166_s1 + $0x148] sm:$0xff]  ;;  %v581_v26 = vld [vmem:[%s14166_s1 + $0x1140] sm:$0xff]  ;;  %v8523_v29 = vcombine.low %v62_v15, %v66_v17  ;;  %v9033_v30 = vcombine.low %v573_v18, %v577_v19 }
  0x8d   :  { %6663 = vmatprep.subr.bf16.mxu1 %v8508_v3  ;;  %v74_v25 = vld [vmem:[%s14166_s1 + $0x168] sm:$0xff]  ;;  %v585_v27 = vld [vmem:[%s14166_s1 + $0x1160] sm:$0xff] }
  0x8e   :  { %6498 = vmatpush1.bf16.msra.mxu0 %v9009_v2  ;;  %v8532_v33 = vcombine.high %v70_v24, %v74_v25  ;;  %v9042_v34 = vcombine.high %v581_v26, %v585_v27  ;;  %v78_v63 = vld [vmem:[%s14166_s1 + $0x188] sm:$0xff]  ;;  %v589_v36 = vld [vmem:[%s14166_s1 + $0x1180] sm:$0xff]  ;;  %v8531_v5 = vcombine.low %v70_v24, %v74_v25  ;;  %v9041_v40 = vcombine.low %v581_v26, %v585_v27 }
  0x8f   :  { %6499 = vmatprep.subr.bf16.mxu0 %v9018_v4  ;;  %v82_v35 = vld [vmem:[%s14166_s1 + $0x1a8] sm:$0xff]  ;;  %v593_v37 = vld [vmem:[%s14166_s1 + $0x11a0] sm:$0xff] }
  0x90   :  { %6664 = vmatpush1.bf16.msra.mxu1 %v8507_v10  ;;  %v8540_v42 = vcombine.high %v78_v63, %v82_v35  ;;  %v9050_v44 = vcombine.high %v589_v36, %v593_v37  ;;  %v86_v45 = vld [vmem:[%s14166_s1 + $0x1c8] sm:$0xff]  ;;  %v597_v47 = vld [vmem:[%s14166_s1 + $0x11c0] sm:$0xff]  ;;  %v8539_v49 = vcombine.low %v78_v63, %v82_v35  ;;  %v9049_v50 = vcombine.low %v589_v36, %v593_v37 }
  0x91   :  { %6665 = vmatprep.subr.bf16.mxu1 %v8516_v13  ;;  %v90_v46 = vld [vmem:[%s14166_s1 + $0x1e8] sm:$0xff]  ;;  %v601_v48 = vld [vmem:[%s14166_s1 + $0x11e0] sm:$0xff] }
  0x92   :  { %6500 = vmatpush1.bf16.msra.mxu0 %v9017_v12  ;;  %v8548_v51 = vcombine.high %v86_v45, %v90_v46  ;;  %v9058_v54 = vcombine.high %v597_v47, %v601_v48  ;;  %v94_v56 = vld [vmem:[%s14166_s1 + $0x208] sm:$0xff]  ;;  %v605_v58 = vld [vmem:[%s14166_s1 + $0x1200] sm:$0xff]  ;;  %v8547_v60 = vcombine.low %v86_v45, %v90_v46  ;;  %v9057_v62 = vcombine.low %v597_v47, %v601_v48 }
  0x93   :  { %6501 = vmatprep.subr.bf16.mxu0 %v9026_v14  ;;  %v98_v57 = vld [vmem:[%s14166_s1 + $0x228] sm:$0xff]  ;;  %v609_v59 = vld [vmem:[%s14166_s1 + $0x1220] sm:$0xff] }
  0x94   :  { %6666 = vmatpush1.bf16.msra.mxu1 %v8515_v20  ;;  %v8556_v0 = vcombine.high %v94_v56, %v98_v57  ;;  %v9066_v1 = vcombine.high %v605_v58, %v609_v59  ;;  %v102_v2 = vld [vmem:[%s14166_s1 + $0x248] sm:$0xff]  ;;  %v613_v4 = vld [vmem:[%s14166_s1 + $0x1240] sm:$0xff]  ;;  %v8555_v7 = vcombine.low %v94_v56, %v98_v57  ;;  %v9065_v8 = vcombine.low %v605_v58, %v609_v59 }
  0x95   :  { %6667 = vmatprep.subr.bf16.mxu1 %v8524_v22  ;;  %v106_v3 = vld [vmem:[%s14166_s1 + $0x268] sm:$0xff]  ;;  %v617_v6 = vld [vmem:[%s14166_s1 + $0x1260] sm:$0xff] }
  0x96   :  { %6502 = vmatpush1.bf16.msra.mxu0 %v9025_v21  ;;  %v8564_v9 = vcombine.high %v102_v2, %v106_v3  ;;  %v9074_v10 = vcombine.high %v613_v4, %v617_v6  ;;  %v110_v12 = vld [vmem:[%s14166_s1 + $0x288] sm:$0xff]  ;;  %v621_v14 = vld [vmem:[%s14166_s1 + $0x1280] sm:$0xff]  ;;  %v8563_v17 = vcombine.low %v102_v2, %v106_v3  ;;  %v9073_v18 = vcombine.low %v613_v4, %v617_v6 }
  0x97   :  { %6503 = vmatprep.subr.bf16.mxu0 %v9034_v23  ;;  %v114_v13 = vld [vmem:[%s14166_s1 + $0x2a8] sm:$0xff]  ;;  %v625_v15 = vld [vmem:[%s14166_s1 + $0x12a0] sm:$0xff] }
  0x98   :  { %6668 = vmatpush1.bf16.msra.mxu1 %v8523_v29  ;;  %v8572_v19 = vcombine.high %v110_v12, %v114_v13  ;;  %v9082_v20 = vcombine.high %v621_v14, %v625_v15  ;;  %v118_v21 = vld [vmem:[%s14166_s1 + $0x2c8] sm:$0xff]  ;;  %v629_v23 = vld [vmem:[%s14166_s1 + $0x12c0] sm:$0xff]  ;;  %v8571_v25 = vcombine.low %v110_v12, %v114_v13  ;;  %v9081_v26 = vcombine.low %v621_v14, %v625_v15 }
  0x99   :  { %6669 = vmatprep.subr.bf16.mxu1 %v8532_v33  ;;  %v122_v22 = vld [vmem:[%s14166_s1 + $0x2e8] sm:$0xff]  ;;  %v633_v24 = vld [vmem:[%s14166_s1 + $0x12e0] sm:$0xff] }
  0x9a   :  { %6504 = vmatpush1.bf16.msra.mxu0 %v9033_v30  ;;  %v8580_v27 = vcombine.high %v118_v21, %v122_v22  ;;  %v9090_v29 = vcombine.high %v629_v23, %v633_v24  ;;  %v126_v30 = vld [vmem:[%s14166_s1 + $0x308] sm:$0xff]  ;;  %v641_v63 = vld [vmem:[%s14166_s1 + $0x1320] sm:$0xff]  ;;  %v8579_v35 = vcombine.low %v118_v21, %v122_v22  ;;  %v9089_v36 = vcombine.low %v629_v23, %v633_v24 }
  0x9b   :  { %6505 = vmatprep.subr.bf16.mxu0 %v9042_v34  ;;  %v130_v33 = vld [vmem:[%s14166_s1 + $0x328] sm:$0xff]  ;;  %v637_v34 = vld [vmem:[%s14166_s1 + $0x1300] sm:$0xff]  ;;  %v11108_v23 = vrot.slane %v10883_v41, %v10515_v53 }
  0x9c   :  { %6670 = vmatpush1.bf16.msra.mxu1 %v8531_v5  ;;  %v8588_v37 = vcombine.high %v126_v30, %v130_v33  ;;  %v9098_v5 = vcombine.high %v637_v34, %v641_v63  ;;  %v649_v45 = vld [vmem:[%s14166_s1 + $0x1360] sm:$0xff]  ;;  %v8587_v46 = vcombine.low %v126_v30, %v130_v33  ;;  %v9097_v47 = vcombine.low %v637_v34, %v641_v63 }
  0x9d   :  { %6671 = vmatprep.subr.bf16.mxu1 %v8540_v42  ;;  %v138_v42 = vld [vmem:[%s14166_s1 + $0x368] sm:$0xff]  ;;  %v657_v56 = vld [vmem:[%s14166_s1 + $0x13a0] sm:$0xff]  ;;  %v11118_v30 = vcombine.high %v10914_v61, %v10914_v61 }
  0x9e   :  { %6506 = vmatpush1.bf16.msra.mxu0 %v9041_v40  ;;  %v134_v40 = vld [vmem:[%s14166_s1 + $0x348] sm:$0xff]  ;;  %v665_v2 = vld [vmem:[%s14166_s1 + $0x13e0] sm:$0xff] }
  0x9f   :  { %6507 = vmatprep.subr.bf16.mxu0 %v9050_v44  ;;  %v645_v44 = vld [vmem:[%s14166_s1 + $0x1340] sm:$0xff]  ;;  %v8596_v48 = vcombine.high %v134_v40, %v138_v42  ;;  %v8595_v57 = vcombine.low %v134_v40, %v138_v42 }
  0xa0   :  { %6672 = vmatpush1.bf16.msra.mxu1 %v8539_v49  ;;  %v9106_v49 = vcombine.high %v645_v44, %v649_v45  ;;  %v9105_v58 = vcombine.low %v645_v44, %v649_v45  ;;  %v673_v12 = vld [vmem:[%s14166_s1 + $0x1420] sm:$0xff] }
  0xa1   :  { %6673 = vmatprep.subr.bf16.mxu1 %v8548_v51  ;;  %v146_v51 = vld [vmem:[%s14166_s1 + $0x3a8] sm:$0xff]  ;;  %v681_v21 = vld [vmem:[%s14166_s1 + $0x1460] sm:$0xff] }
  0xa2   :  { %6508 = vmatpush1.bf16.msra.mxu0 %v9049_v50  ;;  %v142_v50 = vld [vmem:[%s14166_s1 + $0x388] sm:$0xff]  ;;  %v685_v41 = vld [vmem:[%s14166_s1 + $0x1480] sm:$0xff] }
  0xa3   :  { %6509 = vmatprep.subr.bf16.mxu0 %v9058_v54  ;;  %v653_v54 = vld [vmem:[%s14166_s1 + $0x1380] sm:$0xff]  ;;  %v8604_v59 = vcombine.high %v142_v50, %v146_v51  ;;  %v8603_v3 = vcombine.low %v142_v50, %v146_v51 }
  0xa4   :  { %6674 = vmatpush1.bf16.msra.mxu1 %v8547_v60  ;;  %v9114_v60 = vcombine.high %v653_v54, %v657_v56  ;;  %v9113_v4 = vcombine.low %v653_v54, %v657_v56  ;;  %v689_v33 = vld [vmem:[%s14166_s1 + $0x14a0] sm:$0xff] }
  0xa5   :  { %6675 = vmatprep.subr.bf16.mxu1 %v8556_v0  ;;  %v154_v0 = vld [vmem:[%s14166_s1 + $0x3e8] sm:$0xff]  ;;  %v693_v40 = vld [vmem:[%s14166_s1 + $0x14c0] sm:$0xff]  ;;  %v9145_v45 = vcombine.low %v685_v41, %v689_v33 }
  0xa6   :  { %6510 = vmatpush1.bf16.msra.mxu0 %v9057_v62  ;;  %v150_v62 = vld [vmem:[%s14166_s1 + $0x3c8] sm:$0xff]  ;;  %v697_v42 = vld [vmem:[%s14166_s1 + $0x14e0] sm:$0xff] }
  0xa7   :  { %6511 = vmatprep.subr.bf16.mxu0 %v9066_v1  ;;  %v661_v1 = vld [vmem:[%s14166_s1 + $0x13c0] sm:$0xff]  ;;  %v8612_v6 = vcombine.high %v150_v62, %v154_v0  ;;  %v8611_v13 = vcombine.low %v150_v62, %v154_v0  ;;  %v9153_v56 = vcombine.low %v693_v40, %v697_v42 }
  0xa8   :  { %6676 = vmatpush1.bf16.msra.mxu1 %v8555_v7  ;;  %v9122_v7 = vcombine.high %v661_v1, %v665_v2  ;;  %v9121_v14 = vcombine.low %v661_v1, %v665_v2  ;;  %v701_v50 = vld [vmem:[%s14166_s1 + $0x1500] sm:$0xff] }
  0xa9   :  { %6677 = vmatprep.subr.bf16.mxu1 %v8564_v9  ;;  %v162_v9 = vld [vmem:[%s14166_s1 + $0x428] sm:$0xff]  ;;  %v705_v51 = vld [vmem:[%s14166_s1 + $0x1520] sm:$0xff] }
  0xaa   :  { %6512 = vmatpush1.bf16.msra.mxu0 %v9065_v8  ;;  %v158_v8 = vld [vmem:[%s14166_s1 + $0x408] sm:$0xff]  ;;  %v709_v62 = vld [vmem:[%s14166_s1 + $0x1540] sm:$0xff]  ;;  %v9161_v2 = vcombine.low %v701_v50, %v705_v51 }
  0xab   :  { %6513 = vmatprep.subr.bf16.mxu0 %v9074_v10  ;;  %v669_v10 = vld [vmem:[%s14166_s1 + $0x1400] sm:$0xff]  ;;  %v8620_v15 = vcombine.high %v158_v8, %v162_v9  ;;  %v8619_v22 = vcombine.low %v158_v8, %v162_v9 }
  0xac   :  { %6678 = vmatpush1.bf16.msra.mxu1 %v8563_v17  ;;  %v9130_v17 = vcombine.high %v669_v10, %v673_v12  ;;  %v9129_v24 = vcombine.low %v669_v10, %v673_v12  ;;  %v713_v0 = vld [vmem:[%s14166_s1 + $0x1560] sm:$0xff] }
  0xad   :  { %6679 = vmatprep.subr.bf16.mxu1 %v8572_v19  ;;  %v170_v19 = vld [vmem:[%s14166_s1 + $0x468] sm:$0xff]  ;;  %v717_v8 = vld [vmem:[%s14166_s1 + $0x1580] sm:$0xff]  ;;  %v9169_v12 = vcombine.low %v709_v62, %v713_v0 }
  0xae   :  { %6514 = vmatpush1.bf16.msra.mxu0 %v9073_v18  ;;  %v166_v18 = vld [vmem:[%s14166_s1 + $0x448] sm:$0xff]  ;;  %v721_v9 = vld [vmem:[%s14166_s1 + $0x15a0] sm:$0xff] }
  0xaf   :  { %6515 = vmatprep.subr.bf16.mxu0 %v9082_v20  ;;  %v677_v20 = vld [vmem:[%s14166_s1 + $0x1440] sm:$0xff]  ;;  %v8627_v34 = vcombine.low %v166_v18, %v170_v19 }
  0xb0   :  { %6680 = vmatpush1.bf16.msra.mxu1 %v8571_v25  ;;  %v8628_v25 = vcombine.high %v166_v18, %v170_v19  ;;  %v9137_v63 = vcombine.low %v677_v20, %v681_v21  ;;  %v725_v18 = vld [vmem:[%s14166_s1 + $0x15c0] sm:$0xff] }
  0xb1   :  { %6681 = vmatprep.subr.bf16.mxu1 %v8580_v27  ;;  %v174_v27 = vld [vmem:[%s14166_s1 + $0x488] sm:$0xff]  ;;  %v729_v19 = vld [vmem:[%s14166_s1 + $0x15e0] sm:$0xff] }
  0xb2   :  { %6516 = vmatpush1.bf16.msra.mxu0 %v9081_v26  ;;  %v9138_v26 = vcombine.high %v677_v20, %v681_v21  ;;  %v9177_v21 = vcombine.low %v717_v8, %v721_v9 }
  0xb3   :  { %6517 = vmatprep.subr.bf16.mxu0 %v9090_v29  ;;  %v178_v29 = vld [vmem:[%s14166_s1 + $0x4a8] sm:$0xff] }
  0xb4   :  { %6682 = vmatpush1.bf16.msra.mxu1 %v8579_v35  ;;  %v8636_v35 = vcombine.high %v174_v27, %v178_v29  ;;  %v8635_v44 = vcombine.low %v174_v27, %v178_v29  ;;  %v733_v27 = vld [vmem:[%s14166_s1 + $0x1600] sm:$0xff] }
  0xb5   :  { %6683 = vmatprep.subr.bf16.mxu1 %v8588_v37  ;;  %v182_v37 = vld [vmem:[%s14166_s1 + $0x4c8] sm:$0xff]  ;;  %v737_v29 = vld [vmem:[%s14166_s1 + $0x1620] sm:$0xff] }
  0xb6   :  { %6518 = vmatpush1.bf16.msra.mxu0 %v9089_v36  ;;  %v9146_v36 = vcombine.high %v685_v41, %v689_v33  ;;  %v9185_v33 = vcombine.low %v725_v18, %v729_v19 }
  0xb7   :  { %6519 = vmatprep.subr.bf16.mxu0 %v9098_v5  ;;  %v186_v5 = vld [vmem:[%s14166_s1 + $0x4e8] sm:$0xff] }
  0xb8   :  { %6684 = vmatpush1.bf16.msra.mxu1 %v8587_v46  ;;  %v8644_v46 = vcombine.high %v182_v37, %v186_v5  ;;  %v8643_v54 = vcombine.low %v182_v37, %v186_v5  ;;  %v741_v37 = vld [vmem:[%s14166_s1 + $0x1640] sm:$0xff] }
  0xb9   :  { %6685 = vmatprep.subr.bf16.mxu1 %v8596_v48  ;;  %v190_v48 = vld [vmem:[%s14166_s1 + $0x508] sm:$0xff]  ;;  %v745_v5 = vld [vmem:[%s14166_s1 + $0x1660] sm:$0xff] }
  0xba   :  { %6520 = vmatpush1.bf16.msra.mxu0 %v9097_v47  ;;  %v9154_v47 = vcombine.high %v693_v40, %v697_v42  ;;  %v9193_v42 = vcombine.low %v733_v27, %v737_v29 }
  0xbb   :  { %6521 = vmatprep.subr.bf16.mxu0 %v9106_v49  ;;  %v194_v49 = vld [vmem:[%s14166_s1 + $0x528] sm:$0xff] }
  0xbc   :  { %6686 = vmatpush1.bf16.msra.mxu1 %v8595_v57  ;;  %v8652_v57 = vcombine.high %v190_v48, %v194_v49  ;;  %v8651_v1 = vcombine.low %v190_v48, %v194_v49  ;;  %v749_v48 = vld [vmem:[%s14166_s1 + $0x1680] sm:$0xff] }
  0xbd   :  { %6687 = vmatprep.subr.bf16.mxu1 %v8604_v59  ;;  %v198_v59 = vld [vmem:[%s14166_s1 + $0x548] sm:$0xff]  ;;  %v753_v49 = vld [vmem:[%s14166_s1 + $0x16a0] sm:$0xff] }
  0xbe   :  { %6522 = vmatpush1.bf16.msra.mxu0 %v9105_v58  ;;  %v9162_v58 = vcombine.high %v701_v50, %v705_v51  ;;  %v9201_v51 = vcombine.low %v741_v37, %v745_v5 }
  0xbf   :  { %6523 = vmatprep.subr.bf16.mxu0 %v9114_v60  ;;  %v202_v60 = vld [vmem:[%s14166_s1 + $0x568] sm:$0xff] }
  0xc0   :  { %6688 = vmatpush1.bf16.msra.mxu1 %v8603_v3  ;;  %v8660_v3 = vcombine.high %v198_v59, %v202_v60  ;;  %v8659_v10 = vcombine.low %v198_v59, %v202_v60  ;;  %v757_v59 = vld [vmem:[%s14166_s1 + $0x16c0] sm:$0xff] }
  0xc1   :  { %6689 = vmatprep.subr.bf16.mxu1 %v8612_v6  ;;  %v206_v6 = vld [vmem:[%s14166_s1 + $0x588] sm:$0xff]  ;;  %v761_v60 = vld [vmem:[%s14166_s1 + $0x16e0] sm:$0xff] }
  0xc2   :  { %6524 = vmatpush1.bf16.msra.mxu0 %v9113_v4  ;;  %v9170_v4 = vcombine.high %v709_v62, %v713_v0  ;;  %v9209_v0 = vcombine.low %v749_v48, %v753_v49 }
  0xc3   :  { %6525 = vmatprep.subr.bf16.mxu0 %v9122_v7  ;;  %v210_v7 = vld [vmem:[%s14166_s1 + $0x5a8] sm:$0xff] }
  0xc4   :  { %6690 = vmatpush1.bf16.msra.mxu1 %v8611_v13  ;;  %v8668_v13 = vcombine.high %v206_v6, %v210_v7  ;;  %v8667_v20 = vcombine.low %v206_v6, %v210_v7  ;;  %v765_v6 = vld [vmem:[%s14166_s1 + $0x1700] sm:$0xff] }
  0xc5   :  { %6700 = vmatprep.subr.bf16.mxu1 %v8620_v15  ;;  %v214_v15 = vld [vmem:[%s14166_s1 + $0x5c8] sm:$0xff]  ;;  %v769_v7 = vld [vmem:[%s14166_s1 + $0x1720] sm:$0xff] }
  0xc6   :  { %6526 = vmatpush1.bf16.msra.mxu0 %v9121_v14  ;;  %v9178_v14 = vcombine.high %v717_v8, %v721_v9  ;;  %v9217_v9 = vcombine.low %v757_v59, %v761_v60 }
  0xc7   :  { %6536 = vmatprep.subr.bf16.mxu0 %v9130_v17  ;;  %6692 = vmatmul.mubr.bf16.vlgmr.msra.gmra.mrb[4].mxu1 %v10672_v28  ;;  %v218_v17 = vld [vmem:[%s14166_s1 + $0x5e8] sm:$0xff] }
  0xc8   :  { %6701 = vmatpush1.bf16.msra.mxu1 %v8619_v22  ;;  %6732 = vmatprep.mubr.bf16.mxu1 %v10698_v38  ;;  %v8676_v22 = vcombine.high %v214_v15, %v218_v17  ;;  %v8675_v41 = vcombine.low %v214_v15, %v218_v17  ;;  %v773_v15 = vld [vmem:[%s14166_s1 + $0x1740] sm:$0xff] }
  0xc9   :  { %6528 = vmatmul.mubr.bf16.vlgmr.msra.gmra.mrb[0].mxu0 %v11108_v23  ;;  %6702 = vmatprep.subr.bf16.mxu1 %v8628_v25  ;;  %v222_v25 = vld [vmem:[%s14166_s1 + $0x608] sm:$0xff]  ;;  %v777_v17 = vld [vmem:[%s14166_s1 + $0x1760] sm:$0xff] }
  0xca   :  { %6537 = vmatpush1.bf16.msra.mxu0 %v9129_v24  ;;  %6568 = vmatprep.mubr.bf16.mxu0 %v11118_v30  ;;  %v9186_v24 = vcombine.high %v725_v18, %v729_v19  ;;  %v9225_v19 = vcombine.low %v765_v6, %v769_v7 }
  0xcb   :  { %6538 = vmatprep.subr.bf16.mxu0 %v9138_v26  ;;  %v226_v26 = vld [vmem:[%s14166_s1 + $0x628] sm:$0xff] }
  0xcc   :  { %6703 = vmatpush1.bf16.msra.mxu1 %v8627_v34  ;;  %v8684_v34 = vcombine.high %v222_v25, %v226_v26  ;;  %v8683_v40 = vcombine.low %v222_v25, %v226_v26  ;;  %v781_v25 = vld [vmem:[%s14166_s1 + $0x1780] sm:$0xff] }
  0xcd   :  { %6704 = vmatprep.subr.bf16.mxu1 %v8636_v35  ;;  %v230_v35 = vld [vmem:[%s14166_s1 + $0x648] sm:$0xff]  ;;  %v785_v26 = vld [vmem:[%s14166_s1 + $0x17a0] sm:$0xff] }
  0xce   :  { %6539 = vmatpush1.bf16.msra.mxu0 %v9137_v63  ;;  %v9194_v63 = vcombine.high %v733_v27, %v737_v29  ;;  %v9233_v29 = vcombine.low %v773_v15, %v777_v17 }
  0xcf   :  { %6540 = vmatprep.subr.bf16.mxu0 %v9146_v36  ;;  %v234_v36 = vld [vmem:[%s14166_s1 + $0x668] sm:$0xff] }
  0xd0   :  { %6705 = vmatpush1.bf16.msra.mxu1 %v8635_v44  ;;  %v8692_v44 = vcombine.high %v230_v35, %v234_v36  ;;  %v8691_v50 = vcombine.low %v230_v35, %v234_v36  ;;  %v1146_v35 = vcombine.high %v10867_v31, %v10867_v31  ;;  %v789_v36 = vld [vmem:[%s14166_s1 + $0x17c0] sm:$0xff]  ;;  %v286_v31 = vld [vmem:[%s14166_s1 + $0x808] sm:$0xff] }
  0xd1   :  { %6706 = vmatprep.subr.bf16.mxu1 %v8644_v46  ;;  %v238_v46 = vld [vmem:[%s14166_s1 + $0x688] sm:$0xff] }
  0xd2   :  { %6541 = vmatpush1.bf16.msra.mxu0 %v9145_v45  ;;  %v9202_v45 = vcombine.high %v741_v37, %v745_v5  ;;  %v793_v37 = vld [vmem:[%s14166_s1 + $0x17e0] sm:$0xff] }
  0xd3   :  { %6542 = vmatprep.subr.bf16.mxu0 %v9154_v47  ;;  %v242_v47 = vld [vmem:[%s14166_s1 + $0x6a8] sm:$0xff] }
  0xd4   :  { %6707 = vmatpush1.bf16.msra.mxu1 %v8643_v54  ;;  %v8700_v54 = vcombine.high %v238_v46, %v242_v47  ;;  %v8699_v62 = vcombine.low %v238_v46, %v242_v47  ;;  %v11295_v46 = vrot.slane %v1146_v35, %v10515_v53  ;;  %v797_v47 = vld [vmem:[%s14166_s1 + $0x1800] sm:$0xff]  ;;  %v326_v35 = vld [vmem:[%s14166_s1 + $0x948] sm:$0xff] }
  0xd5   :  { %6708 = vmatprep.subr.bf16.mxu1 %v8652_v57  ;;  %v246_v57 = vld [vmem:[%s14166_s1 + $0x6c8] sm:$0xff] }
  0xd6   :  { %6543 = vmatpush1.bf16.msra.mxu0 %v9153_v56  ;;  %v9210_v56 = vcombine.high %v749_v48, %v753_v49  ;;  %v801_v48 = vld [vmem:[%s14166_s1 + $0x1820] sm:$0xff] }
  0xd7   :  { %6544 = vmatprep.subr.bf16.mxu0 %v9162_v58  ;;  %v250_v58 = vld [vmem:[%s14166_s1 + $0x6e8] sm:$0xff] }
  0xd8   :  { %6709 = vmatpush1.bf16.msra.mxu1 %v8651_v1  ;;  %v8708_v1 = vcombine.high %v246_v57, %v250_v58  ;;  %v8707_v8 = vcombine.low %v246_v57, %v250_v58  ;;  %v298_v57 = vld [vmem:[%s14166_s1 + $0x868] sm:$0xff]  ;;  %v1162_v58 = vcombine.high %v11295_v46, %v11295_v46 }
  0xd9   :  { %6710 = vmatprep.subr.bf16.mxu1 %v8660_v3  ;;  %v254_v3 = vld [vmem:[%s14166_s1 + $0x708] sm:$0xff] }
  0xda   :  { %6545 = vmatpush1.bf16.msra.mxu0 %v9161_v2  ;;  %v9218_v2 = vcombine.high %v757_v59, %v761_v60  ;;  %v805_v59 = vld [vmem:[%s14166_s1 + $0x1840] sm:$0xff] }
  0xdb   :  { %6546 = vmatprep.subr.bf16.mxu0 %v9170_v4  ;;  %v258_v4 = vld [vmem:[%s14166_s1 + $0x728] sm:$0xff]  ;;  %v809_v60 = vld [vmem:[%s14166_s1 + $0x1860] sm:$0xff] }
  0xdc   :  { %6711 = vmatpush1.bf16.msra.mxu1 %v8659_v10  ;;  %v8716_v10 = vcombine.high %v254_v3, %v258_v4  ;;  %v8715_v18 = vcombine.low %v254_v3, %v258_v4  ;;  %v9266_v3 = vcombine.high %v805_v59, %v809_v60  ;;  %v302_v4 = vld [vmem:[%s14166_s1 + $0x888] sm:$0xff] }
  0xdd   :  { %6712 = vmatprep.subr.bf16.mxu1 %v8668_v13  ;;  %v262_v13 = vld [vmem:[%s14166_s1 + $0x748] sm:$0xff] }
  0xde   :  { %6547 = vmatpush1.bf16.msra.mxu0 %v9169_v12  ;;  %v9226_v12 = vcombine.high %v765_v6, %v769_v7  ;;  %v306_v6 = vld [vmem:[%s14166_s1 + $0x8a8] sm:$0xff]  ;;  %v11328_v7 = vrot.slane %v1162_v58, %v10515_v53 }
  0xdf   :  { %6548 = vmatprep.subr.bf16.mxu0 %v9178_v14  ;;  %v266_v14 = vld [vmem:[%s14166_s1 + $0x768] sm:$0xff] }
  0xe0   :  { %6713 = vmatpush1.bf16.msra.mxu1 %v8667_v20  ;;  %v8724_v20 = vcombine.high %v262_v13, %v266_v14  ;;  %v8723_v27 = vcombine.low %v262_v13, %v266_v14  ;;  %v8764_v13 = vcombine.high %v302_v4, %v306_v6  ;;  %v346_v58 = vld [vmem:[%s14166_s1 + $0x9e8] sm:$0xff] }
  0xe1   :  { %6714 = vmatprep.subr.bf16.mxu1 %v8676_v22  ;;  %v270_v22 = vld [vmem:[%s14166_s1 + $0x788] sm:$0xff] }
  0xe2   :  { %6549 = vmatpush1.bf16.msra.mxu0 %v9177_v21  ;;  %v9234_v21 = vcombine.high %v773_v15, %v777_v17  ;;  %v310_v15 = vld [vmem:[%s14166_s1 + $0x8c8] sm:$0xff] }
  0xe3   :  { %6550 = vmatprep.subr.bf16.mxu0 %v9186_v24  ;;  %v274_v24 = vld [vmem:[%s14166_s1 + $0x7a8] sm:$0xff] }
  0xe4   :  { %6715 = vmatpush1.bf16.msra.mxu1 %v8675_v41  ;;  %v8732_v41 = vcombine.high %v270_v22, %v274_v24  ;;  %v8731_v5 = vcombine.low %v270_v22, %v274_v24  ;;  %v314_v17 = vld [vmem:[%s14166_s1 + $0x8e8] sm:$0xff] }
  0xe5   :  { %6716 = vmatprep.subr.bf16.mxu1 %v8684_v34  ;;  %v278_v34 = vld [vmem:[%s14166_s1 + $0x7c8] sm:$0xff]  ;;  %v8772_v22 = vcombine.high %v310_v15, %v314_v17 }
  0xe6   :  { %6551 = vmatpush1.bf16.msra.mxu0 %v9185_v33  ;;  %v9242_v33 = vcombine.high %v781_v25, %v785_v26 }
  0xe7   :  { %6552 = vmatprep.subr.bf16.mxu0 %v9194_v63  ;;  %v282_v63 = vld [vmem:[%s14166_s1 + $0x7e8] sm:$0xff] }
  0xe8   :  { %6717 = vmatpush1.bf16.msra.mxu1 %v8683_v40  ;;  %v9241_v40 = vcombine.low %v781_v25, %v785_v26  ;;  %v8739_v49 = vcombine.low %v278_v34, %v282_v63  ;;  %v318_v25 = vld [vmem:[%s14166_s1 + $0x908] sm:$0xff] }
  0xe9   :  { %6718 = vmatprep.subr.bf16.mxu1 %v8692_v44  ;;  %v9250_v44 = vcombine.high %v789_v36, %v793_v37  ;;  %v322_v26 = vld [vmem:[%s14166_s1 + $0x928] sm:$0xff] }
  0xea   :  { %6553 = vmatpush1.bf16.msra.mxu0 %v9193_v42  ;;  %v8740_v42 = vcombine.high %v278_v34, %v282_v63  ;;  %v8780_v34 = vcombine.high %v318_v25, %v322_v26 }
  0xeb   :  { %6554 = vmatprep.subr.bf16.mxu0 %v9202_v45  ;;  %v290_v45 = vld [vmem:[%s14166_s1 + $0x828] sm:$0xff] }
  0xec   :  { %6719 = vmatpush1.bf16.msra.mxu1 %v8691_v50  ;;  %v9249_v50 = vcombine.low %v789_v36, %v793_v37  ;;  %v330_v36 = vld [vmem:[%s14166_s1 + $0x968] sm:$0xff]  ;;  %v837_v37 = vld [vmem:[%s14166_s1 + $0x1940] sm:$0xff] }
  0xed   :  { %6720 = vmatprep.subr.bf16.mxu1 %v8700_v54  ;;  %v9258_v54 = vcombine.high %v797_v47, %v801_v48 }
  0xee   :  { %6555 = vmatpush1.bf16.msra.mxu0 %v9201_v51  ;;  %v8748_v51 = vcombine.high %v286_v31, %v290_v45 }
  0xef   :  { %6556 = vmatprep.subr.bf16.mxu0 %v9210_v56  ;;  %v294_v56 = vld [vmem:[%s14166_s1 + $0x848] sm:$0xff] }
  0xf0   :  { %6721 = vmatpush1.bf16.msra.mxu1 %v8699_v62  ;;  %v8747_v62 = vcombine.low %v286_v31, %v290_v45  ;;  %v334_v45 = vld [vmem:[%s14166_s1 + $0x988] sm:$0xff] }
  0xf1   :  { %6722 = vmatprep.subr.bf16.mxu1 %v8708_v1  ;;  %v9257_v1 = vcombine.low %v797_v47, %v801_v48  ;;  %v338_v47 = vld [vmem:[%s14166_s1 + $0x9a8] sm:$0xff]  ;;  %v845_v48 = vld [vmem:[%s14166_s1 + $0x1980] sm:$0xff] }
  0xf2   :  { %6557 = vmatpush1.bf16.msra.mxu0 %v9209_v0  ;;  %v11319_v0 = vcombine.high %v11108_v23, %v11108_v23 }
  0xf3   :  { %6558 = vmatprep.subr.bf16.mxu0 %v9218_v2  ;;  %v8756_v2 = vcombine.high %v294_v56, %v298_v57 }
  0xf4   :  { %6723 = vmatpush1.bf16.msra.mxu1 %v8707_v8  ;;  %v813_v8 = vld [vmem:[%s14166_s1 + $0x1880] sm:$0xff] }
  0xf5   :  { %6724 = vmatprep.subr.bf16.mxu1 %v8716_v10  ;;  %v8755_v10 = vcombine.low %v294_v56, %v298_v57  ;;  %v342_v57 = vld [vmem:[%s14166_s1 + $0x9c8] sm:$0xff] }
  0xf6   :  { %6559 = vmatpush1.bf16.msra.mxu0 %v9217_v9  ;;  %v817_v9 = vld [vmem:[%s14166_s1 + $0x18a0] sm:$0xff] }
  0xf7   :  { %6560 = vmatprep.subr.bf16.mxu0 %v9226_v12  ;;  %v9265_v12 = vcombine.low %v805_v59, %v809_v60  ;;  %v9274_v14 = vcombine.high %v813_v8, %v817_v9  ;;  %v853_v59 = vld [vmem:[%s14166_s1 + $0x19c0] sm:$0xff] }
  0xf8   :  { %6725 = vmatpush1.bf16.msra.mxu1 %v8715_v18  ;;  %v821_v18 = vld [vmem:[%s14166_s1 + $0x18c0] sm:$0xff] }
  0xf9   :  { %6726 = vmatprep.subr.bf16.mxu1 %v8724_v20  ;;  %v8763_v20 = vcombine.low %v302_v4, %v306_v6  ;;  %v857_v60 = vld [vmem:[%s14166_s1 + $0x19e0] sm:$0xff]  ;;  %v350_v4 = vld [vmem:[%s14166_s1 + $0xa08] sm:$0xff] }
  0xfa   :  { %6561 = vmatpush1.bf16.msra.mxu0 %v9225_v19  ;;  %v825_v19 = vld [vmem:[%s14166_s1 + $0x18e0] sm:$0xff]  ;;  %v354_v6 = vld [vmem:[%s14166_s1 + $0xa28] sm:$0xff] }
  0xfb   :  { %6562 = vmatprep.subr.bf16.mxu0 %v9234_v21  ;;  %v9273_v21 = vcombine.low %v813_v8, %v817_v9  ;;  %v9282_v24 = vcombine.high %v821_v18, %v825_v19  ;;  %v861_v8 = vld [vmem:[%s14166_s1 + $0x1a00] sm:$0xff] }
  0xfc   :  { %6727 = vmatpush1.bf16.msra.mxu1 %v8723_v27  ;;  %v829_v27 = vld [vmem:[%s14166_s1 + $0x1900] sm:$0xff] }
  0xfd   :  { %6728 = vmatprep.subr.bf16.mxu1 %v8732_v41  ;;  %v8771_v41 = vcombine.low %v310_v15, %v314_v17  ;;  %v865_v9 = vld [vmem:[%s14166_s1 + $0x1a20] sm:$0xff]  ;;  %v358_v15 = vld [vmem:[%s14166_s1 + $0xa48] sm:$0xff] }
  0xfe   :  { %6563 = vmatpush1.bf16.msra.mxu0 %v9233_v29  ;;  %v833_v29 = vld [vmem:[%s14166_s1 + $0x1920] sm:$0xff]  ;;  %v362_v17 = vld [vmem:[%s14166_s1 + $0xa68] sm:$0xff] }
  0xff   :  { %6564 = vmatprep.subr.bf16.mxu0 %v9242_v33  ;;  %v9281_v33 = vcombine.low %v821_v18, %v825_v19  ;;  %v9290_v63 = vcombine.high %v829_v27, %v833_v29  ;;  %v869_v18 = vld [vmem:[%s14166_s1 + $0x1a40] sm:$0xff] }
 0x100   :  { %6729 = vmatpush1.bf16.msra.mxu1 %v8731_v5  ;;  %v841_v5 = vld [vmem:[%s14166_s1 + $0x1960] sm:$0xff] }
 0x101   :  { %6730 = vmatprep.subr.bf16.mxu1 %v8740_v42  ;;  %v9289_v42 = vcombine.low %v829_v27, %v833_v29  ;;  %v9298_v31 = vcombine.high %v837_v37, %v841_v5  ;;  %v873_v19 = vld [vmem:[%s14166_s1 + $0x1a60] sm:$0xff] }
 0x102   :  { %6565 = vmatpush1.bf16.msra.mxu0 %v9241_v40  ;;  %v8779_v40 = vcombine.low %v318_v25, %v322_v26  ;;  %v366_v25 = vld [vmem:[%s14166_s1 + $0xa88] sm:$0xff]  ;;  %v877_v27 = vld [vmem:[%s14166_s1 + $0x1a80] sm:$0xff] }
 0x103   :  { %6566 = vmatprep.subr.bf16.mxu0 %v9250_v44  ;;  %v8788_v44 = vcombine.high %v326_v35, %v330_v36  ;;  %v370_v26 = vld [vmem:[%s14166_s1 + $0xaa8] sm:$0xff]  ;;  %v881_v29 = vld [vmem:[%s14166_s1 + $0x1aa0] sm:$0xff] }
 0x104   :  { %6731 = vmatpush1.bf16.msra.mxu1 %v8739_v49  ;;  %v849_v49 = vld [vmem:[%s14166_s1 + $0x19a0] sm:$0xff] }
 0x105   :  { %6741 = vmatprep.subr.bf16.mxu1 %v8748_v51  ;;  %v9297_v51 = vcombine.low %v837_v37, %v841_v5  ;;  %v9306_v56 = vcombine.high %v845_v48, %v849_v49  ;;  %v885_v37 = vld [vmem:[%s14166_s1 + $0x1ac0] sm:$0xff] }
 0x106   :  { %6567 = vmatpush1.bf16.msra.mxu0 %v9249_v50  ;;  %v8787_v50 = vcombine.low %v326_v35, %v330_v36  ;;  %v374_v35 = vld [vmem:[%s14166_s1 + $0xac8] sm:$0xff]  ;;  %v889_v5 = vld [vmem:[%s14166_s1 + $0x1ae0] sm:$0xff] }
 0x107   :  { %6577 = vmatprep.subr.bf16.mxu0 %v9258_v54  ;;  %6733 = vmatmul.mubr.bf16.vlgmr.msra.gmra.mrb[4].mxu1 %v10901_v52  ;;  %v8796_v54 = vcombine.high %v334_v45, %v338_v47  ;;  %v378_v36 = vld [vmem:[%s14166_s1 + $0xae8] sm:$0xff] }
 0x108   :  { %6742 = vmatpush1.bf16.msra.mxu1 %v8747_v62  ;;  %6773 = vmatprep.mubr.bf16.mxu1 %v10565_v16  ;;  %v8795_v62 = vcombine.low %v334_v45, %v338_v47  ;;  %v382_v45 = vld [vmem:[%s14166_s1 + $0xb08] sm:$0xff] }
 0x109   :  { %6569 = vmatmul.mubr.bf16.vlgmr.msra.gmra.mrb[0].mxu0 %v11319_v0  ;;  %6743 = vmatprep.subr.bf16.mxu1 %v8756_v2  ;;  %v8804_v2 = vcombine.high %v342_v57, %v346_v58  ;;  %v386_v47 = vld [vmem:[%s14166_s1 + $0xb28] sm:$0xff] }
 0x10a   :  { %6578 = vmatpush1.bf16.msra.mxu0 %v9257_v1  ;;  %6609 = vmatprep.mubr.bf16.mxu0 %v11328_v7  ;;  %v9305_v1 = vcombine.low %v845_v48, %v849_v49  ;;  %v893_v48 = vld [vmem:[%s14166_s1 + $0x1b00] sm:$0xff] }
 0x10b   :  { %6579 = vmatprep.subr.bf16.mxu0 %v9266_v3  ;;  %v9314_v3 = vcombine.high %v853_v59, %v857_v60  ;;  %v897_v49 = vld [vmem:[%s14166_s1 + $0x1b20] sm:$0xff] }
 0x10c   :  { %6744 = vmatpush1.bf16.msra.mxu1 %v8755_v10  ;;  %v8803_v10 = vcombine.low %v342_v57, %v346_v58  ;;  %v390_v57 = vld [vmem:[%s14166_s1 + $0xb48] sm:$0xff] }
 0x10d   :  { %6745 = vmatprep.subr.bf16.mxu1 %v8764_v13  ;;  %v8812_v13 = vcombine.high %v350_v4, %v354_v6  ;;  %v394_v58 = vld [vmem:[%s14166_s1 + $0xb68] sm:$0xff] }
 0x10e   :  { %6580 = vmatpush1.bf16.msra.mxu0 %v9265_v12  ;;  %v9313_v12 = vcombine.low %v853_v59, %v857_v60  ;;  %v901_v59 = vld [vmem:[%s14166_s1 + $0x1b40] sm:$0xff] }
 0x10f   :  { %6581 = vmatprep.subr.bf16.mxu0 %v9274_v14  ;;  %v9322_v14 = vcombine.high %v861_v8, %v865_v9  ;;  %v905_v60 = vld [vmem:[%s14166_s1 + $0x1b60] sm:$0xff] }
 0x110   :  { %6746 = vmatpush1.bf16.msra.mxu1 %v8763_v20  ;;  %v8811_v20 = vcombine.low %v350_v4, %v354_v6  ;;  %v398_v4 = vld [vmem:[%s14166_s1 + $0xb88] sm:$0xff] }
 0x111   :  { %6747 = vmatprep.subr.bf16.mxu1 %v8772_v22  ;;  %v8820_v22 = vcombine.high %v358_v15, %v362_v17  ;;  %v402_v6 = vld [vmem:[%s14166_s1 + $0xba8] sm:$0xff] }
 0x112   :  { %6582 = vmatpush1.bf16.msra.mxu0 %v9273_v21  ;;  %v9321_v21 = vcombine.low %v861_v8, %v865_v9  ;;  %v909_v8 = vld [vmem:[%s14166_s1 + $0x1b80] sm:$0xff] }
 0x113   :  { %6583 = vmatprep.subr.bf16.mxu0 %v9282_v24  ;;  %v9330_v24 = vcombine.high %v869_v18, %v873_v19  ;;  %v913_v9 = vld [vmem:[%s14166_s1 + $0x1ba0] sm:$0xff] }
 0x114   :  { %6748 = vmatpush1.bf16.msra.mxu1 %v8771_v41  ;;  %v8819_v41 = vcombine.low %v358_v15, %v362_v17  ;;  %v406_v15 = vld [vmem:[%s14166_s1 + $0xbc8] sm:$0xff] }
 0x115   :  { %6749 = vmatprep.subr.bf16.mxu1 %v8780_v34  ;;  %v8828_v34 = vcombine.high %v366_v25, %v370_v26  ;;  %v410_v17 = vld [vmem:[%s14166_s1 + $0xbe8] sm:$0xff] }
 0x116   :  { %6584 = vmatpush1.bf16.msra.mxu0 %v9281_v33  ;;  %v9329_v33 = vcombine.low %v869_v18, %v873_v19  ;;  %v917_v18 = vld [vmem:[%s14166_s1 + $0x1bc0] sm:$0xff] }
 0x117   :  { %6585 = vmatprep.subr.bf16.mxu0 %v9290_v63  ;;  %v9338_v63 = vcombine.high %v877_v27, %v881_v29  ;;  %v921_v19 = vld [vmem:[%s14166_s1 + $0x1be0] sm:$0xff] }
 0x118   :  { %6750 = vmatpush1.bf16.msra.mxu1 %v8779_v40  ;;  %v8827_v40 = vcombine.low %v366_v25, %v370_v26  ;;  %v414_v25 = vld [vmem:[%s14166_s1 + $0xc08] sm:$0xff] }
 0x119   :  { %6751 = vmatprep.subr.bf16.mxu1 %v8788_v44  ;;  %v8836_v44 = vcombine.high %v374_v35, %v378_v36  ;;  %v418_v26 = vld [vmem:[%s14166_s1 + $0xc28] sm:$0xff] }
 0x11a   :  { %6586 = vmatpush1.bf16.msra.mxu0 %v9289_v42  ;;  %v9337_v42 = vcombine.low %v877_v27, %v881_v29  ;;  %v925_v27 = vld [vmem:[%s14166_s1 + $0x1c00] sm:$0xff] }
 0x11b   :  { %6587 = vmatprep.subr.bf16.mxu0 %v9298_v31  ;;  %v9346_v31 = vcombine.high %v885_v37, %v889_v5  ;;  %v929_v29 = vld [vmem:[%s14166_s1 + $0x1c20] sm:$0xff] }
 0x11c   :  { %6752 = vmatpush1.bf16.msra.mxu1 %v8787_v50  ;;  %v8835_v50 = vcombine.low %v374_v35, %v378_v36  ;;  %v422_v35 = vld [vmem:[%s14166_s1 + $0xc48] sm:$0xff] }
 0x11d   :  { %6753 = vmatprep.subr.bf16.mxu1 %v8796_v54  ;;  %v8844_v54 = vcombine.high %v382_v45, %v386_v47  ;;  %v426_v36 = vld [vmem:[%s14166_s1 + $0xc68] sm:$0xff] }
 0x11e   :  { %6588 = vmatpush1.bf16.msra.mxu0 %v9297_v51  ;;  %v9345_v51 = vcombine.low %v885_v37, %v889_v5  ;;  %v933_v37 = vld [vmem:[%s14166_s1 + $0x1c40] sm:$0xff] }
 0x11f   :  { %6589 = vmatprep.subr.bf16.mxu0 %v9306_v56  ;;  %v9354_v56 = vcombine.high %v893_v48, %v897_v49  ;;  %v937_v5 = vld [vmem:[%s14166_s1 + $0x1c60] sm:$0xff] }
 0x120   :  { %6754 = vmatpush1.bf16.msra.mxu1 %v8795_v62  ;;  %v8843_v62 = vcombine.low %v382_v45, %v386_v47  ;;  %v9394_v45 = vcombine.high %v933_v37, %v937_v5  ;;  %v430_v47 = vld [vmem:[%s14166_s1 + $0xc88] sm:$0xff] }
 0x121   :  { %6755 = vmatprep.subr.bf16.mxu1 %v8804_v2  ;;  %v8852_v2 = vcombine.high %v390_v57, %v394_v58 }
 0x122   :  { %6590 = vmatpush1.bf16.msra.mxu0 %v9305_v1  ;;  %v9353_v1 = vcombine.low %v893_v48, %v897_v49  ;;  %v434_v48 = vld [vmem:[%s14166_s1 + $0xca8] sm:$0xff]  ;;  %v11532_v49 = vcombine.high %v11328_v7, %v11328_v7 }
 0x123   :  { %6591 = vmatprep.subr.bf16.mxu0 %v9314_v3  ;;  %v9362_v3 = vcombine.high %v901_v59, %v905_v60 }
 0x124   :  { %6756 = vmatpush1.bf16.msra.mxu1 %v8803_v10  ;;  %v8851_v10 = vcombine.low %v390_v57, %v394_v58  ;;  %v438_v57 = vld [vmem:[%s14166_s1 + $0xcc8] sm:$0xff] }
 0x125   :  { %6757 = vmatprep.subr.bf16.mxu1 %v8812_v13  ;;  %v8860_v13 = vcombine.high %v398_v4, %v402_v6  ;;  %v442_v58 = vld [vmem:[%s14166_s1 + $0xce8] sm:$0xff] }
 0x126   :  { %6592 = vmatpush1.bf16.msra.mxu0 %v9313_v12  ;;  %v9361_v12 = vcombine.low %v901_v59, %v905_v60  ;;  %v949_v59 = vld [vmem:[%s14166_s1 + $0x1cc0] sm:$0xff] }
 0x127   :  { %6593 = vmatprep.subr.bf16.mxu0 %v9322_v14  ;;  %v9370_v14 = vcombine.high %v909_v8, %v913_v9  ;;  %v953_v60 = vld [vmem:[%s14166_s1 + $0x1ce0] sm:$0xff] }
 0x128   :  { %6758 = vmatpush1.bf16.msra.mxu1 %v8811_v20  ;;  %v8859_v20 = vcombine.low %v398_v4, %v402_v6  ;;  %v446_v4 = vld [vmem:[%s14166_s1 + $0xd08] sm:$0xff] }
 0x129   :  { %6759 = vmatprep.subr.bf16.mxu1 %v8820_v22  ;;  %v8868_v22 = vcombine.high %v406_v15, %v410_v17  ;;  %v450_v6 = vld [vmem:[%s14166_s1 + $0xd28] sm:$0xff] }
 0x12a   :  { %6594 = vmatpush1.bf16.msra.mxu0 %v9321_v21  ;;  %v9369_v21 = vcombine.low %v909_v8, %v913_v9  ;;  %v957_v8 = vld [vmem:[%s14166_s1 + $0x1d00] sm:$0xff] }
 0x12b   :  { %6595 = vmatprep.subr.bf16.mxu0 %v9330_v24  ;;  %v9378_v24 = vcombine.high %v917_v18, %v921_v19  ;;  %v961_v9 = vld [vmem:[%s14166_s1 + $0x1d20] sm:$0xff] }
 0x12c   :  { %6760 = vmatpush1.bf16.msra.mxu1 %v8819_v41  ;;  %v8867_v41 = vcombine.low %v406_v15, %v410_v17  ;;  %v454_v15 = vld [vmem:[%s14166_s1 + $0xd48] sm:$0xff] }
 0x12d   :  { %6761 = vmatprep.subr.bf16.mxu1 %v8828_v34  ;;  %v8876_v34 = vcombine.high %v414_v25, %v418_v26  ;;  %v458_v17 = vld [vmem:[%s14166_s1 + $0xd68] sm:$0xff] }
 0x12e   :  { %6596 = vmatpush1.bf16.msra.mxu0 %v9329_v33  ;;  %v9377_v33 = vcombine.low %v917_v18, %v921_v19  ;;  %v965_v18 = vld [vmem:[%s14166_s1 + $0x1d40] sm:$0xff] }
 0x12f   :  { %6597 = vmatprep.subr.bf16.mxu0 %v9338_v63  ;;  %v9386_v63 = vcombine.high %v925_v27, %v929_v29  ;;  %v969_v19 = vld [vmem:[%s14166_s1 + $0x1d60] sm:$0xff] }
 0x130   :  { %6762 = vmatpush1.bf16.msra.mxu1 %v8827_v40  ;;  %v8875_v40 = vcombine.low %v414_v25, %v418_v26  ;;  %v462_v25 = vld [vmem:[%s14166_s1 + $0xd88] sm:$0xff] }
 0x131   :  { %6763 = vmatprep.subr.bf16.mxu1 %v8836_v44  ;;  %v9385_v44 = vcombine.low %v925_v27, %v929_v29  ;;  %v466_v26 = vld [vmem:[%s14166_s1 + $0xda8] sm:$0xff]  ;;  %v973_v27 = vld [vmem:[%s14166_s1 + $0x1d80] sm:$0xff] }
 0x132   :  { %6598 = vmatpush1.bf16.msra.mxu0 %v9337_v42  ;;  %v11522_v42 = vrot.slane %v11295_v46, %v10515_v53  ;;  %v941_v53 = vld [vmem:[%s14166_s1 + $0x1c80] sm:$0xff] }
 0x133   :  { %6599 = vmatprep.subr.bf16.mxu0 %v9346_v31  ;;  %v8884_v31 = vcombine.high %v422_v35, %v426_v36  ;;  %v945_v46 = vld [vmem:[%s14166_s1 + $0x1ca0] sm:$0xff] }
 0x134   :  { %6764 = vmatpush1.bf16.msra.mxu1 %v8835_v50  ;;  %v8883_v50 = vcombine.low %v422_v35, %v426_v36  ;;  %v977_v29 = vld [vmem:[%s14166_s1 + $0x1da0] sm:$0xff]  ;;  %v470_v36 = vld [vmem:[%s14166_s1 + $0xdc8] sm:$0xff] }
 0x135   :  { %6765 = vmatprep.subr.bf16.mxu1 %v8844_v54  ;;  %v8892_v54 = vcombine.high %v430_v47, %v434_v48  ;;  %v9434_v35 = vcombine.high %v973_v27, %v977_v29 }
 0x136   :  { %6600 = vmatpush1.bf16.msra.mxu0 %v9345_v51  ;;  %v9393_v51 = vcombine.low %v933_v37, %v937_v5  ;;  %v474_v37 = vld [vmem:[%s14166_s1 + $0xde8] sm:$0xff] }
 0x137   :  { %6601 = vmatprep.subr.bf16.mxu0 %v9354_v56  ;;  %v9402_v56 = vcombine.high %v941_v53, %v945_v46 }
 0x138   :  { %6766 = vmatpush1.bf16.msra.mxu1 %v8843_v62  ;;  %v8891_v62 = vcombine.low %v430_v47, %v434_v48  ;;  %v9433_v48 = vcombine.low %v973_v27, %v977_v29 }
 0x139   :  { %6767 = vmatprep.subr.bf16.mxu1 %v8852_v2  ;;  %v8900_v2 = vcombine.high %v438_v57, %v442_v58 }
 0x13a   :  { %6602 = vmatpush1.bf16.msra.mxu0 %v9353_v1  ;;  %v9401_v1 = vcombine.low %v941_v53, %v945_v46  ;;  %v8932_v53 = vcombine.high %v470_v36, %v474_v37 }
 0x13b   :  { %6603 = vmatprep.subr.bf16.mxu0 %v9362_v3  ;;  %v9410_v3 = vcombine.high %v949_v59, %v953_v60 }
 0x13c   :  { %6768 = vmatpush1.bf16.msra.mxu1 %v8851_v10  ;;  %v8899_v10 = vcombine.low %v438_v57, %v442_v58  ;;  %v8931_v57 = vcombine.low %v470_v36, %v474_v37 }
 0x13d   :  { %6769 = vmatprep.subr.bf16.mxu1 %v8860_v13  ;;  %v8908_v13 = vcombine.high %v446_v4, %v450_v6 }
 0x13e   :  { %6604 = vmatpush1.bf16.msra.mxu0 %v9361_v12  ;;  %v9409_v12 = vcombine.low %v949_v59, %v953_v60 }
 0x13f   :  { %6605 = vmatprep.subr.bf16.mxu0 %v9370_v14  ;;  %v9418_v14 = vcombine.high %v957_v8, %v961_v9 }
 0x140   :  { %6770 = vmatpush1.bf16.msra.mxu1 %v8859_v20  ;;  %v8907_v20 = vcombine.low %v446_v4, %v450_v6 }
 0x141   :  { %6771 = vmatprep.subr.bf16.mxu1 %v8868_v22  ;;  %v8916_v22 = vcombine.high %v454_v15, %v458_v17 }
 0x142   :  { %6606 = vmatpush1.bf16.msra.mxu0 %v9369_v21  ;;  %v9417_v21 = vcombine.low %v957_v8, %v961_v9 }
 0x143   :  { %6607 = vmatprep.subr.bf16.mxu0 %v9378_v24  ;;  %v9426_v24 = vcombine.high %v965_v18, %v969_v19 }
 0x144   :  { %6772 = vmatpush1.bf16.msra.mxu1 %v8867_v41  ;;  %v8915_v41 = vcombine.low %v454_v15, %v458_v17 }
 0x145   :  { %6782 = vmatprep.subr.bf16.mxu1 %v8876_v34  ;;  %v8924_v34 = vcombine.high %v462_v25, %v466_v26 }
 0x146   :  { %6608 = vmatpush1.bf16.msra.mxu0 %v9377_v33  ;;  %v9425_v33 = vcombine.low %v965_v18, %v969_v19 }
 0x147   :  { %6618 = vmatprep.subr.bf16.mxu0 %v9386_v63  ;;  %6774 = vmatmul.mubr.bf16.vlgmr.msra.gmra.mrb[4].mxu1 %v10682_v32 }
 0x148   :  { %6783 = vmatpush1.bf16.msra.mxu1 %v8875_v40  ;;  %6814 = vmatprep.mubr.bf16.mxu1 %v10703_v39  ;;  %v981_v40 = vld [vmem:[%s14166_s1 + $0x1dc0] sm:$0xff] }
 0x149   :  { %6610 = vmatmul.mubr.bf16.vlgmr.msra.gmra.mrb[0].mxu0 %v11522_v42  ;;  %6784 = vmatprep.subr.bf16.mxu1 %v8884_v31 }
 0x14a   :  { %6619 = vmatpush1.bf16.msra.mxu0 %v9385_v44  ;;  %6650 = vmatprep.mubr.bf16.mxu0 %v11532_v49  ;;  %v985_v44 = vld [vmem:[%s14166_s1 + $0x1de0] sm:$0xff] }
 0x14b   :  { %6620 = vmatprep.subr.bf16.mxu0 %v9394_v45  ;;  %v8923_v45 = vcombine.low %v462_v25, %v466_v26  ;;  %v9442_v46 = vcombine.high %v981_v40, %v985_v44  ;;  %v9441_v58 = vcombine.low %v981_v40, %v985_v44 }
 0x14c   :  { %6785 = vmatpush1.bf16.msra.mxu1 %v8883_v50  ;;  %v478_v50 = vld [vmem:[%s14166_s1 + $0xe08] sm:$0xff] }
 0x14d   :  { %6786 = vmatprep.subr.bf16.mxu1 %v8892_v54  ;;  %v989_v54 = vld [vmem:[%s14166_s1 + $0x1e00] sm:$0xff] }
 0x14e   :  { %6621 = vmatpush1.bf16.msra.mxu0 %v9393_v51  ;;  %v482_v51 = vld [vmem:[%s14166_s1 + $0xe28] sm:$0xff] }
 0x14f   :  { %6622 = vmatprep.subr.bf16.mxu0 %v9402_v56  ;;  %v993_v56 = vld [vmem:[%s14166_s1 + $0x1e20] sm:$0xff]  ;;  %v8940_v59 = vcombine.high %v478_v50, %v482_v51  ;;  %v8939_v4 = vcombine.low %v478_v50, %v482_v51 }
 0x150   :  { %6787 = vmatpush1.bf16.msra.mxu1 %v8891_v62  ;;  %v9450_v60 = vcombine.high %v989_v54, %v993_v56  ;;  %v486_v62 = vld [vmem:[%s14166_s1 + $0xe48] sm:$0xff]  ;;  %v9449_v6 = vcombine.low %v989_v54, %v993_v56 }
 0x151   :  { %6788 = vmatprep.subr.bf16.mxu1 %v8900_v2  ;;  %v997_v2 = vld [vmem:[%s14166_s1 + $0x1e40] sm:$0xff]  ;;  %v526_v54 = vld [vmem:[%s14166_s1 + $0xf88] sm:$0xff] }
 0x152   :  { %6623 = vmatpush1.bf16.msra.mxu0 %v9401_v1  ;;  %v490_v1 = vld [vmem:[%s14166_s1 + $0xe68] sm:$0xff] }
 0x153   :  { %6624 = vmatprep.subr.bf16.mxu0 %v9410_v3  ;;  %v1001_v3 = vld [vmem:[%s14166_s1 + $0x1e60] sm:$0xff]  ;;  %v8948_v8 = vcombine.high %v486_v62, %v490_v1  ;;  %v8947_v15 = vcombine.low %v486_v62, %v490_v1  ;;  %v530_v56 = vld [vmem:[%s14166_s1 + $0xfa8] sm:$0xff] }
 0x154   :  { %6789 = vmatpush1.bf16.msra.mxu1 %v8899_v10  ;;  %v9458_v9 = vcombine.high %v997_v2, %v1001_v3  ;;  %v494_v10 = vld [vmem:[%s14166_s1 + $0xe88] sm:$0xff]  ;;  %v9457_v17 = vcombine.low %v997_v2, %v1001_v3  ;;  %v8988_v62 = vcombine.high %v526_v54, %v530_v56 }
 0x155   :  { %6790 = vmatprep.subr.bf16.mxu1 %v8908_v13  ;;  %v1005_v13 = vld [vmem:[%s14166_s1 + $0x1e80] sm:$0xff]  ;;  %v534_v2 = vld [vmem:[%s14166_s1 + $0xfc8] sm:$0xff] }
 0x156   :  { %6625 = vmatpush1.bf16.msra.mxu0 %v9409_v12  ;;  %v498_v12 = vld [vmem:[%s14166_s1 + $0xea8] sm:$0xff] }
 0x157   :  { %6626 = vmatprep.subr.bf16.mxu0 %v9418_v14  ;;  %v1009_v14 = vld [vmem:[%s14166_s1 + $0x1ea0] sm:$0xff]  ;;  %v8956_v18 = vcombine.high %v494_v10, %v498_v12  ;;  %v8955_v25 = vcombine.low %v494_v10, %v498_v12  ;;  %v538_v3 = vld [vmem:[%s14166_s1 + $0xfe8] sm:$0xff] }
 0x158   :  { %6791 = vmatpush1.bf16.msra.mxu1 %v8907_v20  ;;  %v9466_v19 = vcombine.high %v1005_v13, %v1009_v14  ;;  %v502_v20 = vld [vmem:[%s14166_s1 + $0xec8] sm:$0xff]  ;;  %v9465_v26 = vcombine.low %v1005_v13, %v1009_v14  ;;  %v8996_v10 = vcombine.high %v534_v2, %v538_v3 }
 0x159   :  { %6792 = vmatprep.subr.bf16.mxu1 %v8916_v22  ;;  %v1013_v22 = vld [vmem:[%s14166_s1 + $0x1ec0] sm:$0xff]  ;;  %v542_v13 = vld [vmem:[%s14166_s1 + $0x1008] sm:$0xff] }
 0x15a   :  { %6627 = vmatpush1.bf16.msra.mxu0 %v9417_v21  ;;  %v11592_v63 = vpop.f32.mrb[0].mxu1  ;;  %v506_v21 = vld [vmem:[%s14166_s1 + $0xee8] sm:$0xff] }
 0x15b   :  { %6628 = vmatprep.subr.bf16.mxu0 %v9426_v24  ;;  %v11600_v5 = vpop.f32.mrb[1].mxu1  ;;  %v1017_v24 = vld [vmem:[%s14166_s1 + $0x1ee0] sm:$0xff]  ;;  %v8964_v27 = vcombine.high %v502_v20, %v506_v21  ;;  %v8963_v36 = vcombine.low %v502_v20, %v506_v21  ;;  %v546_v14 = vld [vmem:[%s14166_s1 + $0x1028] sm:$0xff] }
 0x15c   :  { %v6410_v31 = vpop.f32.mrb[2].mxu1  ;;  %6793 = vmatpush1.bf16.msra.mxu1 %v8915_v41  ;;  %v9474_v29 = vcombine.high %v1013_v22, %v1017_v24  ;;  %v510_v41 = vld [vmem:[%s14166_s1 + $0xf08] sm:$0xff]  ;;  %v9473_v37 = vcombine.low %v1013_v22, %v1017_v24  ;;  %v9004_v20 = vcombine.high %v542_v13, %v546_v14 }
 0x15d   :  { %v6411_v47 = vpop.f32.mrb[3].mxu1  ;;  %6794 = vmatprep.subr.bf16.mxu1 %v8924_v34  ;;  %v1021_v34 = vld [vmem:[%s14166_s1 + $0x1f00] sm:$0xff]  ;;  %v518_v31 = vld [vmem:[%s14166_s1 + $0xf48] sm:$0xff] }
 0x15e   :  { %6629 = vmatpush1.bf16.msra.mxu0 %v9425_v33  ;;  %v514_v33 = vld [vmem:[%s14166_s1 + $0xf28] sm:$0xff]  ;;  %v1029_v47 = vld [vmem:[%s14166_s1 + $0x1f40] sm:$0xff] }
 0x15f   :  { %6630 = vmatprep.subr.bf16.mxu0 %v9434_v35  ;;  %v1025_v35 = vld [vmem:[%s14166_s1 + $0x1f20] sm:$0xff]  ;;  %v8972_v40 = vcombine.high %v510_v41, %v514_v33  ;;  %v550_v22 = vld [vmem:[%s14166_s1 + $0x1048] sm:$0xff] }
 0x160   :  { %6795 = vmatpush1.bf16.msra.mxu1 %v8923_v45  ;;  %v9482_v44 = vcombine.high %v1021_v34, %v1025_v35  ;;  %v522_v45 = vld [vmem:[%s14166_s1 + $0xf68] sm:$0xff] }
 0x161   :  { %6796 = vmatprep.subr.bf16.mxu1 %v8932_v53  ;;  %v8971_v53 = vcombine.low %v510_v41, %v514_v33  ;;  %v8980_v50 = vcombine.high %v518_v31, %v522_v45  ;;  %v554_v24 = vld [vmem:[%s14166_s1 + $0x1068] sm:$0xff] }
 0x162   :  { %6631 = vmatpush1.bf16.msra.mxu0 %v9433_v48  ;;  %v1033_v48 = vld [vmem:[%s14166_s1 + $0x1f60] sm:$0xff]  ;;  %v9012_v33 = vcombine.high %v550_v22, %v554_v24 }
 0x163   :  { %6632 = vmatprep.subr.bf16.mxu0 %v9442_v46  ;;  %v9481_v46 = vcombine.low %v1021_v34, %v1025_v35  ;;  %v9490_v51 = vcombine.high %v1029_v47, %v1033_v48  ;;  %v558_v35 = vld [vmem:[%s14166_s1 + $0x1088] sm:$0xff] }
 0x164   :  { %6797 = vmatpush1.bf16.msra.mxu1 %v8931_v57  ;;  %v1037_v57 = vld [vmem:[%s14166_s1 + $0x1f80] sm:$0xff] }
 0x165   :  { %6798 = vmatprep.subr.bf16.mxu1 %v8940_v59  ;;  %v8979_v59 = vcombine.low %v518_v31, %v522_v45 }
 0x166   :  { %6633 = vmatpush1.bf16.msra.mxu0 %v9441_v58  ;;  %v1041_v58 = vld [vmem:[%s14166_s1 + $0x1fa0] sm:$0xff] }
 0x167   :  { %6634 = vmatprep.subr.bf16.mxu0 %v9450_v60  ;;  %v9489_v60 = vcombine.low %v1029_v47, %v1033_v48  ;;  %v9498_v1 = vcombine.high %v1037_v57, %v1041_v58  ;;  %v566_v48 = vld [vmem:[%s14166_s1 + $0x10c8] sm:$0xff] }
 0x168   :  { %6799 = vmatpush1.bf16.msra.mxu1 %v8939_v4  ;;  %v1045_v4 = vld [vmem:[%s14166_s1 + $0x1fc0] sm:$0xff] }
 0x169   :  { %6800 = vmatprep.subr.bf16.mxu1 %v8948_v8  ;;  %v8987_v8 = vcombine.low %v526_v54, %v530_v56 }
 0x16a   :  { %6635 = vmatpush1.bf16.msra.mxu0 %v9449_v6  ;;  %v1049_v6 = vld [vmem:[%s14166_s1 + $0x1fe0] sm:$0xff] }
 0x16b   :  { %6636 = vmatprep.subr.bf16.mxu0 %v9458_v9  ;;  %v9497_v9 = vcombine.low %v1037_v57, %v1041_v58  ;;  %v9506_v12 = vcombine.high %v1045_v4, %v1049_v6  ;;  %v574_v58 = vld [vmem:[%s14166_s1 + $0x1108] sm:$0xff] }
 0x16c   :  { %6801 = vmatpush1.bf16.msra.mxu1 %v8947_v15  ;;  %v31_v15 = vld [vmem:[%s14166_s1 + $0x10] sm:$0xff] }
 0x16d   :  { %6802 = vmatprep.subr.bf16.mxu1 %v8956_v18  ;;  %v8995_v18 = vcombine.low %v534_v2, %v538_v3 }
 0x16e   :  { %6637 = vmatpush1.bf16.msra.mxu0 %v9457_v17  ;;  %v35_v17 = vld [vmem:[%s14166_s1 + $0x30] sm:$0xff] }
 0x16f   :  { %6638 = vmatprep.subr.bf16.mxu0 %v9466_v19  ;;  %v9505_v19 = vcombine.low %v1045_v4, %v1049_v6  ;;  %v8494_v21 = vcombine.high %v31_v15, %v35_v17  ;;  %v8493_v41 = vcombine.low %v31_v15, %v35_v17  ;;  %v582_v6 = vld [vmem:[%s14166_s1 + $0x1148] sm:$0xff] }
 0x170   :  { %6803 = vmatpush1.bf16.msra.mxu1 %v8955_v25  ;;  %v39_v25 = vld [vmem:[%s14166_s1 + $0x50] sm:$0xff]  ;;  %v590_v17 = vld [vmem:[%s14166_s1 + $0x1188] sm:$0xff] }
 0x171   :  { %6804 = vmatprep.subr.bf16.mxu1 %v8964_v27  ;;  %v11730_v27 = vcombine.high %v11522_v42, %v11522_v42 }
 0x172   :  { %6639 = vmatpush1.bf16.msra.mxu0 %v9465_v26  ;;  %v43_v26 = vld [vmem:[%s14166_s1 + $0x70] sm:$0xff] }
 0x173   :  { %6640 = vmatprep.subr.bf16.mxu0 %v9474_v29  ;;  %v9003_v29 = vcombine.low %v542_v13, %v546_v14  ;;  %v8502_v34 = vcombine.high %v39_v25, %v43_v26  ;;  %v8501_v31 = vcombine.low %v39_v25, %v43_v26  ;;  %v598_v26 = vld [vmem:[%s14166_s1 + $0x11c8] sm:$0xff] }
 0x174   :  { %6805 = vmatpush1.bf16.msra.mxu1 %v8963_v36  ;;  %v562_v36 = vld [vmem:[%s14166_s1 + $0x10a8] sm:$0xff] }
 0x175   :  { %6806 = vmatprep.subr.bf16.mxu1 %v8972_v40  ;;  %v51_v40 = vld [vmem:[%s14166_s1 + $0xb0] sm:$0xff]  ;;  %v9020_v45 = vcombine.high %v558_v35, %v562_v36 }
 0x176   :  { %6641 = vmatpush1.bf16.msra.mxu0 %v9473_v37  ;;  %v47_v37 = vld [vmem:[%s14166_s1 + $0x90] sm:$0xff] }
 0x177   :  { %6642 = vmatprep.subr.bf16.mxu0 %v9482_v44  ;;  %v9011_v44 = vcombine.low %v550_v22, %v554_v24  ;;  %v8510_v47 = vcombine.high %v47_v37, %v51_v40  ;;  %v8509_v54 = vcombine.low %v47_v37, %v51_v40  ;;  %v606_v40 = vld [vmem:[%s14166_s1 + $0x1208] sm:$0xff] }
 0x178   :  { %6807 = vmatpush1.bf16.msra.mxu1 %v8971_v53  ;;  %v570_v53 = vld [vmem:[%s14166_s1 + $0x10e8] sm:$0xff] }
 0x179   :  { %6808 = vmatprep.subr.bf16.mxu1 %v8980_v50  ;;  %v59_v50 = vld [vmem:[%s14166_s1 + $0xf0] sm:$0xff]  ;;  %v9028_v56 = vcombine.high %v566_v48, %v570_v53 }
 0x17a   :  { %6643 = vmatpush1.bf16.msra.mxu0 %v9481_v46  ;;  %v55_v46 = vld [vmem:[%s14166_s1 + $0xd0] sm:$0xff] }
 0x17b   :  { %6644 = vmatprep.subr.bf16.mxu0 %v9490_v51  ;;  %v9019_v51 = vcombine.low %v558_v35, %v562_v36  ;;  %v8518_v57 = vcombine.high %v55_v46, %v59_v50  ;;  %v8517_v2 = vcombine.low %v55_v46, %v59_v50  ;;  %v614_v50 = vld [vmem:[%s14166_s1 + $0x1248] sm:$0xff] }
 0x17c   :  { %6809 = vmatpush1.bf16.msra.mxu1 %v8979_v59  ;;  %v578_v59 = vld [vmem:[%s14166_s1 + $0x1128] sm:$0xff] }
 0x17d   :  { %6810 = vmatprep.subr.bf16.mxu1 %v8988_v62  ;;  %v67_v62 = vld [vmem:[%s14166_s1 + $0x130] sm:$0xff]  ;;  %v9036_v3 = vcombine.high %v574_v58, %v578_v59 }
 0x17e   :  { %6645 = vmatpush1.bf16.msra.mxu0 %v9489_v60  ;;  %v63_v60 = vld [vmem:[%s14166_s1 + $0x110] sm:$0xff] }
 0x17f   :  { %6646 = vmatprep.subr.bf16.mxu0 %v9498_v1  ;;  %v9027_v1 = vcombine.low %v566_v48, %v570_v53  ;;  %v8526_v4 = vcombine.high %v63_v60, %v67_v62  ;;  %v8525_v13 = vcombine.low %v63_v60, %v67_v62  ;;  %v622_v62 = vld [vmem:[%s14166_s1 + $0x1288] sm:$0xff] }
 0x180   :  { %6811 = vmatpush1.bf16.msra.mxu1 %v8987_v8  ;;  %v586_v8 = vld [vmem:[%s14166_s1 + $0x1168] sm:$0xff] }
 0x181   :  { %6812 = vmatprep.subr.bf16.mxu1 %v8996_v10  ;;  %v75_v10 = vld [vmem:[%s14166_s1 + $0x170] sm:$0xff]  ;;  %v9044_v14 = vcombine.high %v582_v6, %v586_v8 }
 0x182   :  { %6647 = vmatpush1.bf16.msra.mxu0 %v9497_v9  ;;  %v71_v9 = vld [vmem:[%s14166_s1 + $0x150] sm:$0xff] }
 0x183   :  { %6648 = vmatprep.subr.bf16.mxu0 %v9506_v12  ;;  %v9035_v12 = vcombine.low %v574_v58, %v578_v59  ;;  %v8534_v15 = vcombine.high %v71_v9, %v75_v10  ;;  %v8533_v22 = vcombine.low %v71_v9, %v75_v10  ;;  %v630_v10 = vld [vmem:[%s14166_s1 + $0x12c8] sm:$0xff] }
 0x184   :  { %6813 = vmatpush1.bf16.msra.mxu1 %v8995_v18  ;;  %v594_v18 = vld [vmem:[%s14166_s1 + $0x11a8] sm:$0xff] }
 0x185   :  { %6823 = vmatprep.subr.bf16.mxu1 %v9004_v20  ;;  %v83_v20 = vld [vmem:[%s14166_s1 + $0x1b0] sm:$0xff]  ;;  %v9052_v24 = vcombine.high %v590_v17, %v594_v18 }
 0x186   :  { %6649 = vmatpush1.bf16.msra.mxu0 %v9505_v19  ;;  %v79_v19 = vld [vmem:[%s14166_s1 + $0x190] sm:$0xff] }
 0x187   :  { %6987 = vmatprep.subr.bf16.mxu0 %v8494_v21  ;;  %6815 = vmatmul.mubr.bf16.vlgmr.msra.gmra.mrb[4].mxu1 %v10905_v55  ;;  %v9043_v21 = vcombine.low %v582_v6, %v586_v8  ;;  %v8542_v25 = vcombine.high %v79_v19, %v83_v20  ;;  %v8541_v35 = vcombine.low %v79_v19, %v83_v20  ;;  %v638_v20 = vld [vmem:[%s14166_s1 + $0x1308] sm:$0xff] }
 0x188   :  { %6824 = vmatpush1.bf16.msra.mxu1 %v9003_v29  ;;  %6855 = vmatprep.mubr.bf16.mxu1 %v10914_v61  ;;  %v602_v29 = vld [vmem:[%s14166_s1 + $0x11e8] sm:$0xff] }
 0x189   :  { %6651 = vmatmul.mubr.bf16.vlgmr.msra.gmra.mrb[0].mxu0 %v11730_v27  ;;  %6825 = vmatprep.subr.bf16.mxu1 %v9012_v33  ;;  %v91_v33 = vld [vmem:[%s14166_s1 + $0x1f0] sm:$0xff]  ;;  %v9060_v36 = vcombine.high %v598_v26, %v602_v29 }
 0x18a   :  { %6988 = vmatpush1.bf16.msra.mxu0 %v8493_v41  ;;  %7019 = vmatprep.mubr.bf16.mxu0 %v10553_v11  ;;  %v87_v41 = vld [vmem:[%s14166_s1 + $0x1d0] sm:$0xff] }
 0x18b   :  { %6989 = vmatprep.subr.bf16.mxu0 %v8502_v34  ;;  %v9051_v34 = vcombine.low %v590_v17, %v594_v18  ;;  %v8550_v37 = vcombine.high %v87_v41, %v91_v33  ;;  %v8549_v48 = vcombine.low %v87_v41, %v91_v33  ;;  %v646_v33 = vld [vmem:[%s14166_s1 + $0x1348] sm:$0xff] }
 0x18c   :  { %6826 = vmatpush1.bf16.msra.mxu1 %v9011_v44  ;;  %v610_v44 = vld [vmem:[%s14166_s1 + $0x1228] sm:$0xff] }
 0x18d   :  { %6827 = vmatprep.subr.bf16.mxu1 %v9020_v45  ;;  %v99_v45 = vld [vmem:[%s14166_s1 + $0x230] sm:$0xff]  ;;  %v9068_v53 = vcombine.high %v606_v40, %v610_v44 }
 0x18e   :  { %6990 = vmatpush1.bf16.msra.mxu0 %v8501_v31  ;;  %v95_v31 = vld [vmem:[%s14166_s1 + $0x210] sm:$0xff] }
 0x18f   :  { %6991 = vmatprep.subr.bf16.mxu0 %v8510_v47  ;;  %v9059_v47 = vcombine.low %v598_v26, %v602_v29  ;;  %v8558_v46 = vcombine.high %v95_v31, %v99_v45  ;;  %v8557_v58 = vcombine.low %v95_v31, %v99_v45  ;;  %v654_v45 = vld [vmem:[%s14166_s1 + $0x1388] sm:$0xff] }
 0x190   :  { %6828 = vmatpush1.bf16.msra.mxu1 %v9019_v51  ;;  %v618_v51 = vld [vmem:[%s14166_s1 + $0x1268] sm:$0xff] }
 0x191   :  { %6829 = vmatprep.subr.bf16.mxu1 %v9028_v56  ;;  %v107_v56 = vld [vmem:[%s14166_s1 + $0x270] sm:$0xff]  ;;  %v9076_v59 = vcombine.high %v614_v50, %v618_v51 }
 0x192   :  { %6992 = vmatpush1.bf16.msra.mxu0 %v8509_v54  ;;  %v103_v54 = vld [vmem:[%s14166_s1 + $0x250] sm:$0xff] }
 0x193   :  { %6993 = vmatprep.subr.bf16.mxu0 %v8518_v57  ;;  %v9067_v57 = vcombine.low %v606_v40, %v610_v44  ;;  %v8566_v60 = vcombine.high %v103_v54, %v107_v56  ;;  %v8565_v6 = vcombine.low %v103_v54, %v107_v56  ;;  %v662_v56 = vld [vmem:[%s14166_s1 + $0x13c8] sm:$0xff] }
 0x194   :  { %6830 = vmatpush1.bf16.msra.mxu1 %v9027_v1  ;;  %v626_v1 = vld [vmem:[%s14166_s1 + $0x12a8] sm:$0xff] }
 0x195   :  { %6831 = vmatprep.subr.bf16.mxu1 %v9036_v3  ;;  %v115_v3 = vld [vmem:[%s14166_s1 + $0x2b0] sm:$0xff]  ;;  %v9084_v8 = vcombine.high %v622_v62, %v626_v1 }
 0x196   :  { %6994 = vmatpush1.bf16.msra.mxu0 %v8517_v2  ;;  %v111_v2 = vld [vmem:[%s14166_s1 + $0x290] sm:$0xff] }
 0x197   :  { %6995 = vmatprep.subr.bf16.mxu0 %v8526_v4  ;;  %v9075_v4 = vcombine.low %v614_v50, %v618_v51  ;;  %v8574_v9 = vcombine.high %v111_v2, %v115_v3  ;;  %v8573_v17 = vcombine.low %v111_v2, %v115_v3  ;;  %v670_v3 = vld [vmem:[%s14166_s1 + $0x1408] sm:$0xff] }
 0x198   :  { %6832 = vmatpush1.bf16.msra.mxu1 %v9035_v12  ;;  %v634_v12 = vld [vmem:[%s14166_s1 + $0x12e8] sm:$0xff] }
 0x199   :  { %6833 = vmatprep.subr.bf16.mxu1 %v9044_v14  ;;  %v123_v14 = vld [vmem:[%s14166_s1 + $0x2f0] sm:$0xff]  ;;  %v9092_v18 = vcombine.high %v630_v10, %v634_v12 }
 0x19a   :  { %6996 = vmatpush1.bf16.msra.mxu0 %v8525_v13  ;;  %v119_v13 = vld [vmem:[%s14166_s1 + $0x2d0] sm:$0xff] }
 0x19b   :  { %6997 = vmatprep.subr.bf16.mxu0 %v8534_v15  ;;  %v9083_v15 = vcombine.low %v622_v62, %v626_v1  ;;  %v8582_v19 = vcombine.high %v119_v13, %v123_v14  ;;  %v8581_v26 = vcombine.low %v119_v13, %v123_v14  ;;  %v678_v14 = vld [vmem:[%s14166_s1 + $0x1448] sm:$0xff] }
 0x19c   :  { %6834 = vmatpush1.bf16.msra.mxu1 %v9043_v21  ;;  %v642_v21 = vld [vmem:[%s14166_s1 + $0x1328] sm:$0xff] }
 0x19d   :  { %6835 = vmatprep.subr.bf16.mxu1 %v9052_v24  ;;  %v131_v24 = vld [vmem:[%s14166_s1 + $0x330] sm:$0xff]  ;;  %v9100_v29 = vcombine.high %v638_v20, %v642_v21 }
 0x19e   :  { %6998 = vmatpush1.bf16.msra.mxu0 %v8533_v22  ;;  %v127_v22 = vld [vmem:[%s14166_s1 + $0x310] sm:$0xff] }
 0x19f   :  { %6999 = vmatprep.subr.bf16.mxu0 %v8542_v25  ;;  %v9091_v25 = vcombine.low %v630_v10, %v634_v12  ;;  %v8590_v41 = vcombine.high %v127_v22, %v131_v24  ;;  %v8589_v40 = vcombine.low %v127_v22, %v131_v24  ;;  %v686_v24 = vld [vmem:[%s14166_s1 + $0x1488] sm:$0xff] }
 0x1a0   :  { %6836 = vmatpush1.bf16.msra.mxu1 %v9051_v34  ;;  %v650_v34 = vld [vmem:[%s14166_s1 + $0x1368] sm:$0xff] }
 0x1a1   :  { %6837 = vmatprep.subr.bf16.mxu1 %v9060_v36  ;;  %v139_v36 = vld [vmem:[%s14166_s1 + $0x370] sm:$0xff]  ;;  %v9108_v44 = vcombine.high %v646_v33, %v650_v34 }
 0x1a2   :  { %7000 = vmatpush1.bf16.msra.mxu0 %v8541_v35  ;;  %v135_v35 = vld [vmem:[%s14166_s1 + $0x350] sm:$0xff] }
 0x1a3   :  { %7001 = vmatprep.subr.bf16.mxu0 %v8550_v37  ;;  %v9099_v37 = vcombine.low %v638_v20, %v642_v21  ;;  %v8598_v31 = vcombine.high %v135_v35, %v139_v36  ;;  %v8597_v50 = vcombine.low %v135_v35, %v139_v36  ;;  %v694_v36 = vld [vmem:[%s14166_s1 + $0x14c8] sm:$0xff] }
 0x1a4   :  { %6838 = vmatpush1.bf16.msra.mxu1 %v9059_v47  ;;  %v658_v47 = vld [vmem:[%s14166_s1 + $0x13a8] sm:$0xff] }
 0x1a5   :  { %6839 = vmatprep.subr.bf16.mxu1 %v9068_v53  ;;  %v147_v53 = vld [vmem:[%s14166_s1 + $0x3b0] sm:$0xff]  ;;  %v9116_v51 = vcombine.high %v654_v45, %v658_v47 }
 0x1a6   :  { %7002 = vmatpush1.bf16.msra.mxu0 %v8549_v48  ;;  %v143_v48 = vld [vmem:[%s14166_s1 + $0x390] sm:$0xff] }
 0x1a7   :  { %7003 = vmatprep.subr.bf16.mxu0 %v8558_v46  ;;  %v9107_v46 = vcombine.low %v646_v33, %v650_v34  ;;  %v8606_v54 = vcombine.high %v143_v48, %v147_v53  ;;  %v8605_v62 = vcombine.low %v143_v48, %v147_v53  ;;  %v702_v53 = vld [vmem:[%s14166_s1 + $0x1508] sm:$0xff] }
 0x1a8   :  { %6840 = vmatpush1.bf16.msra.mxu1 %v9067_v57  ;;  %v666_v57 = vld [vmem:[%s14166_s1 + $0x13e8] sm:$0xff] }
 0x1a9   :  { %6841 = vmatprep.subr.bf16.mxu1 %v9076_v59  ;;  %v155_v59 = vld [vmem:[%s14166_s1 + $0x3f0] sm:$0xff]  ;;  %v9124_v1 = vcombine.high %v662_v56, %v666_v57 }
 0x1aa   :  { %7004 = vmatpush1.bf16.msra.mxu0 %v8557_v58  ;;  %v151_v58 = vld [vmem:[%s14166_s1 + $0x3d0] sm:$0xff] }
 0x1ab   :  { %7005 = vmatprep.subr.bf16.mxu0 %v8566_v60  ;;  %v9115_v60 = vcombine.low %v654_v45, %v658_v47  ;;  %v8614_v2 = vcombine.high %v151_v58, %v155_v59  ;;  %v8613_v10 = vcombine.low %v151_v58, %v155_v59  ;;  %v710_v59 = vld [vmem:[%s14166_s1 + $0x1548] sm:$0xff] }
 0x1ac   :  { %6842 = vmatpush1.bf16.msra.mxu1 %v9075_v4  ;;  %v674_v4 = vld [vmem:[%s14166_s1 + $0x1428] sm:$0xff] }
 0x1ad   :  { %6843 = vmatprep.subr.bf16.mxu1 %v9084_v8  ;;  %v163_v8 = vld [vmem:[%s14166_s1 + $0x430] sm:$0xff]  ;;  %v9132_v12 = vcombine.high %v670_v3, %v674_v4 }
 0x1ae   :  { %7006 = vmatpush1.bf16.msra.mxu0 %v8565_v6  ;;  %v159_v6 = vld [vmem:[%s14166_s1 + $0x410] sm:$0xff] }
 0x1af   :  { %7007 = vmatprep.subr.bf16.mxu0 %v8574_v9  ;;  %v9123_v9 = vcombine.low %v662_v56, %v666_v57  ;;  %v8622_v13 = vcombine.high %v159_v6, %v163_v8  ;;  %v8621_v20 = vcombine.low %v159_v6, %v163_v8  ;;  %v718_v8 = vld [vmem:[%s14166_s1 + $0x1588] sm:$0xff] }
 0x1b0   :  { %6844 = vmatpush1.bf16.msra.mxu1 %v9083_v15  ;;  %v682_v15 = vld [vmem:[%s14166_s1 + $0x1468] sm:$0xff] }
 0x1b1   :  { %6845 = vmatprep.subr.bf16.mxu1 %v9092_v18  ;;  %v171_v18 = vld [vmem:[%s14166_s1 + $0x470] sm:$0xff]  ;;  %v9140_v21 = vcombine.high %v678_v14, %v682_v15 }
 0x1b2   :  { %7008 = vmatpush1.bf16.msra.mxu0 %v8573_v17  ;;  %v167_v17 = vld [vmem:[%s14166_s1 + $0x450] sm:$0xff] }
 0x1b3   :  { %7009 = vmatprep.subr.bf16.mxu0 %v8582_v19  ;;  %v9131_v19 = vcombine.low %v670_v3, %v674_v4  ;;  %v8630_v22 = vcombine.high %v167_v17, %v171_v18  ;;  %v8629_v33 = vcombine.low %v167_v17, %v171_v18  ;;  %v726_v18 = vld [vmem:[%s14166_s1 + $0x15c8] sm:$0xff] }
 0x1b4   :  { %6846 = vmatpush1.bf16.msra.mxu1 %v9091_v25  ;;  %v690_v25 = vld [vmem:[%s14166_s1 + $0x14a8] sm:$0xff] }
 0x1b5   :  { %6847 = vmatprep.subr.bf16.mxu1 %v9100_v29  ;;  %v179_v29 = vld [vmem:[%s14166_s1 + $0x4b0] sm:$0xff]  ;;  %v9148_v34 = vcombine.high %v686_v24, %v690_v25 }
 0x1b6   :  { %7010 = vmatpush1.bf16.msra.mxu0 %v8581_v26  ;;  %v175_v26 = vld [vmem:[%s14166_s1 + $0x490] sm:$0xff] }
 0x1b7   :  { %7011 = vmatprep.subr.bf16.mxu0 %v8590_v41  ;;  %v9139_v41 = vcombine.low %v678_v14, %v682_v15  ;;  %v8638_v35 = vcombine.high %v175_v26, %v179_v29  ;;  %v8637_v45 = vcombine.low %v175_v26, %v179_v29  ;;  %v734_v29 = vld [vmem:[%s14166_s1 + $0x1608] sm:$0xff] }
 0x1b8   :  { %6848 = vmatpush1.bf16.msra.mxu1 %v9099_v37  ;;  %v698_v37 = vld [vmem:[%s14166_s1 + $0x14e8] sm:$0xff] }
 0x1b9   :  { %6849 = vmatprep.subr.bf16.mxu1 %v9108_v44  ;;  %v187_v44 = vld [vmem:[%s14166_s1 + $0x4f0] sm:$0xff]  ;;  %v9156_v47 = vcombine.high %v694_v36, %v698_v37 }
 0x1ba   :  { %7012 = vmatpush1.bf16.msra.mxu0 %v8589_v40  ;;  %v183_v40 = vld [vmem:[%s14166_s1 + $0x4d0] sm:$0xff] }
 0x1bb   :  { %7013 = vmatprep.subr.bf16.mxu0 %v8598_v31  ;;  %v9147_v31 = vcombine.low %v686_v24, %v690_v25  ;;  %v8646_v48 = vcombine.high %v183_v40, %v187_v44  ;;  %v8645_v56 = vcombine.low %v183_v40, %v187_v44  ;;  %v742_v44 = vld [vmem:[%s14166_s1 + $0x1648] sm:$0xff] }
 0x1bc   :  { %6850 = vmatpush1.bf16.msra.mxu1 %v9107_v46  ;;  %v706_v46 = vld [vmem:[%s14166_s1 + $0x1528] sm:$0xff] }
 0x1bd   :  { %6851 = vmatprep.subr.bf16.mxu1 %v9116_v51  ;;  %v195_v51 = vld [vmem:[%s14166_s1 + $0x530] sm:$0xff]  ;;  %v9164_v57 = vcombine.high %v702_v53, %v706_v46 }
 0x1be   :  { %7014 = vmatpush1.bf16.msra.mxu0 %v8597_v50  ;;  %v191_v50 = vld [vmem:[%s14166_s1 + $0x510] sm:$0xff] }
 0x1bf   :  { %7015 = vmatprep.subr.bf16.mxu0 %v8606_v54  ;;  %v9155_v54 = vcombine.low %v694_v36, %v698_v37  ;;  %v8654_v58 = vcombine.high %v191_v50, %v195_v51  ;;  %v8653_v3 = vcombine.low %v191_v50, %v195_v51  ;;  %v750_v51 = vld [vmem:[%s14166_s1 + $0x1688] sm:$0xff] }
 0x1c0   :  { %6852 = vmatpush1.bf16.msra.mxu1 %v9115_v60  ;;  %v714_v60 = vld [vmem:[%s14166_s1 + $0x1568] sm:$0xff] }
 0x1c1   :  { %6853 = vmatprep.subr.bf16.mxu1 %v9124_v1  ;;  %v203_v1 = vld [vmem:[%s14166_s1 + $0x570] sm:$0xff]  ;;  %v9172_v4 = vcombine.high %v710_v59, %v714_v60 }
 0x1c2   :  { %7016 = vmatpush1.bf16.msra.mxu0 %v8605_v62  ;;  %v199_v62 = vld [vmem:[%s14166_s1 + $0x550] sm:$0xff] }
 0x1c3   :  { %7017 = vmatprep.subr.bf16.mxu0 %v8614_v2  ;;  %v9163_v2 = vcombine.low %v702_v53, %v706_v46  ;;  %v8662_v6 = vcombine.high %v199_v62, %v203_v1  ;;  %v8661_v14 = vcombine.low %v199_v62, %v203_v1  ;;  %v758_v1 = vld [vmem:[%s14166_s1 + $0x16c8] sm:$0xff] }
 0x1c4   :  { %6854 = vmatpush1.bf16.msra.mxu1 %v9123_v9  ;;  %v722_v9 = vld [vmem:[%s14166_s1 + $0x15a8] sm:$0xff] }
 0x1c5   :  { %6864 = vmatprep.subr.bf16.mxu1 %v9132_v12  ;;  %v211_v12 = vld [vmem:[%s14166_s1 + $0x5b0] sm:$0xff]  ;;  %v9180_v15 = vcombine.high %v718_v8, %v722_v9 }
 0x1c6   :  { %7018 = vmatpush1.bf16.msra.mxu0 %v8613_v10  ;;  %v207_v10 = vld [vmem:[%s14166_s1 + $0x590] sm:$0xff] }
 0x1c7   :  { %7028 = vmatprep.subr.bf16.mxu0 %v8622_v13  ;;  %6856 = vmatmul.mubr.bf16.vlgmr.msra.gmra.mrb[4].mxu1 %v11108_v23  ;;  %v9171_v13 = vcombine.low %v710_v59, %v714_v60  ;;  %v8670_v17 = vcombine.high %v207_v10, %v211_v12  ;;  %v8669_v24 = vcombine.low %v207_v10, %v211_v12  ;;  %v766_v12 = vld [vmem:[%s14166_s1 + $0x1708] sm:$0xff] }
 0x1c8   :  { %6865 = vmatpush1.bf16.msra.mxu1 %v9131_v19  ;;  %6896 = vmatprep.mubr.bf16.mxu1 %v11118_v30  ;;  %v730_v19 = vld [vmem:[%s14166_s1 + $0x15e8] sm:$0xff] }
 0x1c9   :  { %7020 = vmatmul.mubr.bf16.vlgmr.msra.gmra.mrb[4].mxu0 %v10672_v28  ;;  %6866 = vmatprep.subr.bf16.mxu1 %v9140_v21  ;;  %v219_v21 = vld [vmem:[%s14166_s1 + $0x5f0] sm:$0xff]  ;;  %v9188_v25 = vcombine.high %v726_v18, %v730_v19 }
 0x1ca   :  { %7029 = vmatpush1.bf16.msra.mxu0 %v8621_v20  ;;  %7060 = vmatprep.mubr.bf16.mxu0 %v10698_v38  ;;  %v215_v20 = vld [vmem:[%s14166_s1 + $0x5d0] sm:$0xff] }
 0x1cb   :  { %7030 = vmatprep.subr.bf16.mxu0 %v8630_v22  ;;  %v9179_v22 = vcombine.low %v718_v8, %v722_v9  ;;  %v8678_v26 = vcombine.high %v215_v20, %v219_v21  ;;  %v8677_v36 = vcombine.low %v215_v20, %v219_v21  ;;  %v774_v21 = vld [vmem:[%s14166_s1 + $0x1748] sm:$0xff] }
 0x1cc   :  { %6867 = vmatpush1.bf16.msra.mxu1 %v9139_v41  ;;  %v738_v41 = vld [vmem:[%s14166_s1 + $0x1628] sm:$0xff] }
 0x1cd   :  { %6868 = vmatprep.subr.bf16.mxu1 %v9148_v34  ;;  %v227_v34 = vld [vmem:[%s14166_s1 + $0x630] sm:$0xff]  ;;  %v9196_v37 = vcombine.high %v734_v29, %v738_v41 }
 0x1ce   :  { %7031 = vmatpush1.bf16.msra.mxu0 %v8629_v33  ;;  %v223_v33 = vld [vmem:[%s14166_s1 + $0x610] sm:$0xff] }
 0x1cf   :  { %7032 = vmatprep.subr.bf16.mxu0 %v8638_v35  ;;  %v9187_v35 = vcombine.low %v726_v18, %v730_v19  ;;  %v8686_v40 = vcombine.high %v223_v33, %v227_v34  ;;  %v8685_v53 = vcombine.low %v223_v33, %v227_v34  ;;  %v782_v34 = vld [vmem:[%s14166_s1 + $0x1788] sm:$0xff] }
 0x1d0   :  { %6869 = vmatpush1.bf16.msra.mxu1 %v9147_v31  ;;  %v746_v31 = vld [vmem:[%s14166_s1 + $0x1668] sm:$0xff] }
 0x1d1   :  { %6870 = vmatprep.subr.bf16.mxu1 %v9156_v47  ;;  %v235_v47 = vld [vmem:[%s14166_s1 + $0x670] sm:$0xff]  ;;  %v9204_v46 = vcombine.high %v742_v44, %v746_v31 }
 0x1d2   :  { %7033 = vmatpush1.bf16.msra.mxu0 %v8637_v45  ;;  %v231_v45 = vld [vmem:[%s14166_s1 + $0x650] sm:$0xff] }
 0x1d3   :  { %7034 = vmatprep.subr.bf16.mxu0 %v8646_v48  ;;  %v9195_v48 = vcombine.low %v734_v29, %v738_v41  ;;  %v8694_v50 = vcombine.high %v231_v45, %v235_v47  ;;  %v8693_v59 = vcombine.low %v231_v45, %v235_v47  ;;  %v790_v47 = vld [vmem:[%s14166_s1 + $0x17c8] sm:$0xff] }
 0x1d4   :  { %6871 = vmatpush1.bf16.msra.mxu1 %v9155_v54  ;;  %v754_v54 = vld [vmem:[%s14166_s1 + $0x16a8] sm:$0xff] }
 0x1d5   :  { %6872 = vmatprep.subr.bf16.mxu1 %v9164_v57  ;;  %v243_v57 = vld [vmem:[%s14166_s1 + $0x6b0] sm:$0xff]  ;;  %v9212_v60 = vcombine.high %v750_v51, %v754_v54 }
 0x1d6   :  { %7035 = vmatpush1.bf16.msra.mxu0 %v8645_v56  ;;  %v239_v56 = vld [vmem:[%s14166_s1 + $0x690] sm:$0xff] }
 0x1d7   :  { %7036 = vmatprep.subr.bf16.mxu0 %v8654_v58  ;;  %v9203_v58 = vcombine.low %v742_v44, %v746_v31  ;;  %v8702_v62 = vcombine.high %v239_v56, %v243_v57  ;;  %v8701_v8 = vcombine.low %v239_v56, %v243_v57  ;;  %v798_v57 = vld [vmem:[%s14166_s1 + $0x1808] sm:$0xff] }
 0x1d8   :  { %6873 = vmatpush1.bf16.msra.mxu1 %v9163_v2  ;;  %v762_v2 = vld [vmem:[%s14166_s1 + $0x16e8] sm:$0xff] }
 0x1d9   :  { %6874 = vmatprep.subr.bf16.mxu1 %v9172_v4  ;;  %v251_v4 = vld [vmem:[%s14166_s1 + $0x6f0] sm:$0xff]  ;;  %v9220_v9 = vcombine.high %v758_v1, %v762_v2 }
 0x1da   :  { %7037 = vmatpush1.bf16.msra.mxu0 %v8653_v3  ;;  %v247_v3 = vld [vmem:[%s14166_s1 + $0x6d0] sm:$0xff] }
 0x1db   :  { %7038 = vmatprep.subr.bf16.mxu0 %v8662_v6  ;;  %v9211_v6 = vcombine.low %v750_v51, %v754_v54  ;;  %v8710_v10 = vcombine.high %v247_v3, %v251_v4  ;;  %v8709_v18 = vcombine.low %v247_v3, %v251_v4  ;;  %v806_v4 = vld [vmem:[%s14166_s1 + $0x1848] sm:$0xff] }
 0x1dc   :  { %6875 = vmatpush1.bf16.msra.mxu1 %v9171_v13  ;;  %v770_v13 = vld [vmem:[%s14166_s1 + $0x1728] sm:$0xff] }
 0x1dd   :  { %6876 = vmatprep.subr.bf16.mxu1 %v9180_v15  ;;  %v259_v15 = vld [vmem:[%s14166_s1 + $0x730] sm:$0xff]  ;;  %v9228_v19 = vcombine.high %v766_v12, %v770_v13 }
 0x1de   :  { %7039 = vmatpush1.bf16.msra.mxu0 %v8661_v14  ;;  %v255_v14 = vld [vmem:[%s14166_s1 + $0x710] sm:$0xff] }
 0x1df   :  { %7040 = vmatprep.subr.bf16.mxu0 %v8670_v17  ;;  %v9219_v17 = vcombine.low %v758_v1, %v762_v2  ;;  %v8718_v20 = vcombine.high %v255_v14, %v259_v15  ;;  %v8717_v29 = vcombine.low %v255_v14, %v259_v15  ;;  %v814_v15 = vld [vmem:[%s14166_s1 + $0x1888] sm:$0xff] }
 0x1e0   :  { %6877 = vmatpush1.bf16.msra.mxu1 %v9179_v22  ;;  %v778_v22 = vld [vmem:[%s14166_s1 + $0x1768] sm:$0xff] }
 0x1e1   :  { %6878 = vmatprep.subr.bf16.mxu1 %v9188_v25  ;;  %v267_v25 = vld [vmem:[%s14166_s1 + $0x770] sm:$0xff]  ;;  %v9236_v41 = vcombine.high %v774_v21, %v778_v22 }
 0x1e2   :  { %7041 = vmatpush1.bf16.msra.mxu0 %v8669_v24  ;;  %v263_v24 = vld [vmem:[%s14166_s1 + $0x750] sm:$0xff] }
 0x1e3   :  { %7042 = vmatprep.subr.bf16.mxu0 %v8678_v26  ;;  %v9227_v26 = vcombine.low %v766_v12, %v770_v13  ;;  %v8726_v33 = vcombine.high %v263_v24, %v267_v25  ;;  %v8725_v44 = vcombine.low %v263_v24, %v267_v25  ;;  %v822_v25 = vld [vmem:[%s14166_s1 + $0x18c8] sm:$0xff] }
 0x1e4   :  { %6879 = vmatpush1.bf16.msra.mxu1 %v9187_v35  ;;  %v786_v35 = vld [vmem:[%s14166_s1 + $0x17a8] sm:$0xff] }
 0x1e5   :  { %6880 = vmatprep.subr.bf16.mxu1 %v9196_v37  ;;  %v275_v37 = vld [vmem:[%s14166_s1 + $0x7b0] sm:$0xff]  ;;  %v9244_v31 = vcombine.high %v782_v34, %v786_v35 }
 0x1e6   :  { %7043 = vmatpush1.bf16.msra.mxu0 %v8677_v36  ;;  %v271_v36 = vld [vmem:[%s14166_s1 + $0x790] sm:$0xff] }
 0x1e7   :  { %7044 = vmatprep.subr.bf16.mxu0 %v8686_v40  ;;  %v9235_v40 = vcombine.low %v774_v21, %v778_v22  ;;  %v8734_v45 = vcombine.high %v271_v36, %v275_v37  ;;  %v8733_v51 = vcombine.low %v271_v36, %v275_v37  ;;  %v830_v37 = vld [vmem:[%s14166_s1 + $0x1908] sm:$0xff] }
 0x1e8   :  { %6881 = vmatpush1.bf16.msra.mxu1 %v9195_v48  ;;  %v794_v48 = vld [vmem:[%s14166_s1 + $0x17e8] sm:$0xff] }
 0x1e9   :  { %6882 = vmatprep.subr.bf16.mxu1 %v9204_v46  ;;  %v283_v46 = vld [vmem:[%s14166_s1 + $0x7f0] sm:$0xff]  ;;  %v9252_v54 = vcombine.high %v790_v47, %v794_v48 }
 0x1ea   :  { %7045 = vmatpush1.bf16.msra.mxu0 %v8685_v53  ;;  %v279_v53 = vld [vmem:[%s14166_s1 + $0x7d0] sm:$0xff] }
 0x1eb   :  { %7046 = vmatprep.subr.bf16.mxu0 %v8694_v50  ;;  %v9243_v50 = vcombine.low %v782_v34, %v786_v35  ;;  %v8742_v56 = vcombine.high %v279_v53, %v283_v46  ;;  %v8741_v1 = vcombine.low %v279_v53, %v283_v46  ;;  %v838_v46 = vld [vmem:[%s14166_s1 + $0x1948] sm:$0xff] }
 0x1ec   :  { %6883 = vmatpush1.bf16.msra.mxu1 %v9203_v58  ;;  %v802_v58 = vld [vmem:[%s14166_s1 + $0x1828] sm:$0xff] }
 0x1ed   :  { %6884 = vmatprep.subr.bf16.mxu1 %v9212_v60  ;;  %v291_v60 = vld [vmem:[%s14166_s1 + $0x830] sm:$0xff]  ;;  %v9260_v2 = vcombine.high %v798_v57, %v802_v58 }
 0x1ee   :  { %7047 = vmatpush1.bf16.msra.mxu0 %v8693_v59  ;;  %v287_v59 = vld [vmem:[%s14166_s1 + $0x810] sm:$0xff] }
 0x1ef   :  { %7048 = vmatprep.subr.bf16.mxu0 %v8702_v62  ;;  %v9251_v62 = vcombine.low %v790_v47, %v794_v48  ;;  %v8750_v3 = vcombine.high %v287_v59, %v291_v60  ;;  %v8749_v12 = vcombine.low %v287_v59, %v291_v60  ;;  %v846_v60 = vld [vmem:[%s14166_s1 + $0x1988] sm:$0xff] }
 0x1f0   :  { %6885 = vmatpush1.bf16.msra.mxu1 %v9211_v6  ;;  %v810_v6 = vld [vmem:[%s14166_s1 + $0x1868] sm:$0xff] }
 0x1f1   :  { %6886 = vmatprep.subr.bf16.mxu1 %v9220_v9  ;;  %v299_v9 = vld [vmem:[%s14166_s1 + $0x870] sm:$0xff]  ;;  %v9268_v13 = vcombine.high %v806_v4, %v810_v6 }
 0x1f2   :  { %7049 = vmatpush1.bf16.msra.mxu0 %v8701_v8  ;;  %v295_v8 = vld [vmem:[%s14166_s1 + $0x850] sm:$0xff] }
 0x1f3   :  { %7050 = vmatprep.subr.bf16.mxu0 %v8710_v10  ;;  %v9259_v10 = vcombine.low %v798_v57, %v802_v58  ;;  %v8758_v14 = vcombine.high %v295_v8, %v299_v9  ;;  %v8757_v21 = vcombine.low %v295_v8, %v299_v9  ;;  %v854_v9 = vld [vmem:[%s14166_s1 + $0x19c8] sm:$0xff] }
 0x1f4   :  { %6887 = vmatpush1.bf16.msra.mxu1 %v9219_v17  ;;  %v818_v17 = vld [vmem:[%s14166_s1 + $0x18a8] sm:$0xff] }
 0x1f5   :  { %6888 = vmatprep.subr.bf16.mxu1 %v9228_v19  ;;  %v307_v19 = vld [vmem:[%s14166_s1 + $0x8b0] sm:$0xff]  ;;  %v9276_v22 = vcombine.high %v814_v15, %v818_v17 }
 0x1f6   :  { %7051 = vmatpush1.bf16.msra.mxu0 %v8709_v18  ;;  %v303_v18 = vld [vmem:[%s14166_s1 + $0x890] sm:$0xff] }
 0x1f7   :  { %7052 = vmatprep.subr.bf16.mxu0 %v8718_v20  ;;  %v9267_v20 = vcombine.low %v806_v4, %v810_v6  ;;  %v8766_v24 = vcombine.high %v303_v18, %v307_v19  ;;  %v8765_v34 = vcombine.low %v303_v18, %v307_v19  ;;  %v862_v19 = vld [vmem:[%s14166_s1 + $0x1a08] sm:$0xff] }
 0x1f8   :  { %6889 = vmatpush1.bf16.msra.mxu1 %v9227_v26  ;;  %v826_v26 = vld [vmem:[%s14166_s1 + $0x18e8] sm:$0xff] }
 0x1f9   :  { %6890 = vmatprep.subr.bf16.mxu1 %v9236_v41  ;;  %v315_v41 = vld [vmem:[%s14166_s1 + $0x8f0] sm:$0xff]  ;;  %v9284_v35 = vcombine.high %v822_v25, %v826_v26 }
 0x1fa   :  { %7053 = vmatpush1.bf16.msra.mxu0 %v8717_v29  ;;  %v311_v29 = vld [vmem:[%s14166_s1 + $0x8d0] sm:$0xff] }
 0x1fb   :  { %7054 = vmatprep.subr.bf16.mxu0 %v8726_v33  ;;  %v9275_v33 = vcombine.low %v814_v15, %v818_v17  ;;  %v8774_v36 = vcombine.high %v311_v29, %v315_v41  ;;  %v8773_v47 = vcombine.low %v311_v29, %v315_v41  ;;  %v870_v41 = vld [vmem:[%s14166_s1 + $0x1a48] sm:$0xff] }
 0x1fc   :  { %6891 = vmatpush1.bf16.msra.mxu1 %v9235_v40  ;;  %v834_v40 = vld [vmem:[%s14166_s1 + $0x1928] sm:$0xff] }
 0x1fd   :  { %6892 = vmatprep.subr.bf16.mxu1 %v9244_v31  ;;  %v323_v31 = vld [vmem:[%s14166_s1 + $0x930] sm:$0xff]  ;;  %v9292_v48 = vcombine.high %v830_v37, %v834_v40 }
 0x1fe   :  { %7055 = vmatpush1.bf16.msra.mxu0 %v8725_v44  ;;  %v319_v44 = vld [vmem:[%s14166_s1 + $0x910] sm:$0xff] }
 0x1ff   :  { %7056 = vmatprep.subr.bf16.mxu0 %v8734_v45  ;;  %v9283_v45 = vcombine.low %v822_v25, %v826_v26  ;;  %v8782_v53 = vcombine.high %v319_v44, %v323_v31  ;;  %v8781_v57 = vcombine.low %v319_v44, %v323_v31  ;;  %v878_v31 = vld [vmem:[%s14166_s1 + $0x1a88] sm:$0xff] }
 0x200   :  { %6893 = vmatpush1.bf16.msra.mxu1 %v9243_v50  ;;  %v842_v50 = vld [vmem:[%s14166_s1 + $0x1968] sm:$0xff] }
 0x201   :  { %6894 = vmatprep.subr.bf16.mxu1 %v9252_v54  ;;  %v331_v54 = vld [vmem:[%s14166_s1 + $0x970] sm:$0xff]  ;;  %v9300_v58 = vcombine.high %v838_v46, %v842_v50 }
 0x202   :  { %7057 = vmatpush1.bf16.msra.mxu0 %v8733_v51  ;;  %v327_v51 = vld [vmem:[%s14166_s1 + $0x950] sm:$0xff] }
 0x203   :  { %7058 = vmatprep.subr.bf16.mxu0 %v8742_v56  ;;  %v9291_v56 = vcombine.low %v830_v37, %v834_v40  ;;  %v8790_v59 = vcombine.high %v327_v51, %v331_v54  ;;  %v8789_v4 = vcombine.low %v327_v51, %v331_v54  ;;  %v886_v54 = vld [vmem:[%s14166_s1 + $0x1ac8] sm:$0xff] }
 0x204   :  { %6895 = vmatpush1.bf16.msra.mxu1 %v9251_v62  ;;  %v850_v62 = vld [vmem:[%s14166_s1 + $0x19a8] sm:$0xff] }
 0x205   :  { %6905 = vmatprep.subr.bf16.mxu1 %v9260_v2  ;;  %v339_v2 = vld [vmem:[%s14166_s1 + $0x9b0] sm:$0xff]  ;;  %v9308_v6 = vcombine.high %v846_v60, %v850_v62 }
 0x206   :  { %7059 = vmatpush1.bf16.msra.mxu0 %v8741_v1  ;;  %v335_v1 = vld [vmem:[%s14166_s1 + $0x990] sm:$0xff] }
 0x207   :  { %7069 = vmatprep.subr.bf16.mxu0 %v8750_v3  ;;  %6897 = vmatmul.mubr.bf16.vlgmr.msra.gmra.mrb[4].mxu1 %v11319_v0  ;;  %v9299_v3 = vcombine.low %v838_v46, %v842_v50  ;;  %v8798_v8 = vcombine.high %v335_v1, %v339_v2  ;;  %v8797_v15 = vcombine.low %v335_v1, %v339_v2  ;;  %v894_v2 = vld [vmem:[%s14166_s1 + $0x1b08] sm:$0xff] }
 0x208   :  { %6906 = vmatpush1.bf16.msra.mxu1 %v9259_v10  ;;  %6937 = vmatprep.mubr.bf16.mxu1 %v11328_v7  ;;  %v858_v10 = vld [vmem:[%s14166_s1 + $0x19e8] sm:$0xff] }
 0x209   :  { %7061 = vmatmul.mubr.bf16.vlgmr.msra.gmra.mrb[4].mxu0 %v10901_v52  ;;  %6907 = vmatprep.subr.bf16.mxu1 %v9268_v13  ;;  %v347_v13 = vld [vmem:[%s14166_s1 + $0x9f0] sm:$0xff]  ;;  %v9316_v17 = vcombine.high %v854_v9, %v858_v10 }
 0x20a   :  { %7070 = vmatpush1.bf16.msra.mxu0 %v8749_v12  ;;  %7101 = vmatprep.mubr.bf16.mxu0 %v10565_v16  ;;  %v343_v12 = vld [vmem:[%s14166_s1 + $0x9d0] sm:$0xff] }
 0x20b   :  { %7071 = vmatprep.subr.bf16.mxu0 %v8758_v14  ;;  %v9307_v14 = vcombine.low %v846_v60, %v850_v62  ;;  %v8806_v18 = vcombine.high %v343_v12, %v347_v13  ;;  %v8805_v25 = vcombine.low %v343_v12, %v347_v13  ;;  %v902_v13 = vld [vmem:[%s14166_s1 + $0x1b48] sm:$0xff] }
 0x20c   :  { %6908 = vmatpush1.bf16.msra.mxu1 %v9267_v20  ;;  %v866_v20 = vld [vmem:[%s14166_s1 + $0x1a28] sm:$0xff] }
 0x20d   :  { %6909 = vmatprep.subr.bf16.mxu1 %v9276_v22  ;;  %v355_v22 = vld [vmem:[%s14166_s1 + $0xa30] sm:$0xff]  ;;  %v9324_v26 = vcombine.high %v862_v19, %v866_v20 }
 0x20e   :  { %7072 = vmatpush1.bf16.msra.mxu0 %v8757_v21  ;;  %v351_v21 = vld [vmem:[%s14166_s1 + $0xa10] sm:$0xff] }
 0x20f   :  { %7073 = vmatprep.subr.bf16.mxu0 %v8766_v24  ;;  %v9315_v24 = vcombine.low %v854_v9, %v858_v10  ;;  %v8814_v29 = vcombine.high %v351_v21, %v355_v22  ;;  %v8813_v37 = vcombine.low %v351_v21, %v355_v22  ;;  %v910_v22 = vld [vmem:[%s14166_s1 + $0x1b88] sm:$0xff] }
 0x210   :  { %6910 = vmatpush1.bf16.msra.mxu1 %v9275_v33  ;;  %v874_v33 = vld [vmem:[%s14166_s1 + $0x1a68] sm:$0xff] }
 0x211   :  { %6911 = vmatprep.subr.bf16.mxu1 %v9284_v35  ;;  %v363_v35 = vld [vmem:[%s14166_s1 + $0xa70] sm:$0xff]  ;;  %v9332_v40 = vcombine.high %v870_v41, %v874_v33 }
 0x212   :  { %7074 = vmatpush1.bf16.msra.mxu0 %v8765_v34  ;;  %v359_v34 = vld [vmem:[%s14166_s1 + $0xa50] sm:$0xff] }
 0x213   :  { %7075 = vmatprep.subr.bf16.mxu0 %v8774_v36  ;;  %v9323_v36 = vcombine.low %v862_v19, %v866_v20  ;;  %v8822_v44 = vcombine.high %v359_v34, %v363_v35  ;;  %v8821_v46 = vcombine.low %v359_v34, %v363_v35  ;;  %v918_v35 = vld [vmem:[%s14166_s1 + $0x1bc8] sm:$0xff] }
 0x214   :  { %6912 = vmatpush1.bf16.msra.mxu1 %v9283_v45  ;;  %v882_v45 = vld [vmem:[%s14166_s1 + $0x1aa8] sm:$0xff] }
 0x215   :  { %6913 = vmatprep.subr.bf16.mxu1 %v9292_v48  ;;  %v371_v48 = vld [vmem:[%s14166_s1 + $0xab0] sm:$0xff]  ;;  %v9340_v50 = vcombine.high %v878_v31, %v882_v45 }
 0x216   :  { %7076 = vmatpush1.bf16.msra.mxu0 %v8773_v47  ;;  %v367_v47 = vld [vmem:[%s14166_s1 + $0xa90] sm:$0xff] }
 0x217   :  { %7077 = vmatprep.subr.bf16.mxu0 %v8782_v53  ;;  %v9331_v53 = vcombine.low %v870_v41, %v874_v33  ;;  %v8830_v51 = vcombine.high %v367_v47, %v371_v48  ;;  %v8829_v60 = vcombine.low %v367_v47, %v371_v48  ;;  %v926_v48 = vld [vmem:[%s14166_s1 + $0x1c08] sm:$0xff] }
 0x218   :  { %6914 = vmatpush1.bf16.msra.mxu1 %v9291_v56  ;;  %v890_v56 = vld [vmem:[%s14166_s1 + $0x1ae8] sm:$0xff] }
 0x219   :  { %6915 = vmatprep.subr.bf16.mxu1 %v9300_v58  ;;  %v379_v58 = vld [vmem:[%s14166_s1 + $0xaf0] sm:$0xff]  ;;  %v9348_v62 = vcombine.high %v886_v54, %v890_v56 }
 0x21a   :  { %7078 = vmatpush1.bf16.msra.mxu0 %v8781_v57  ;;  %v375_v57 = vld [vmem:[%s14166_s1 + $0xad0] sm:$0xff] }
 0x21b   :  { %7079 = vmatprep.subr.bf16.mxu0 %v8790_v59  ;;  %v9339_v59 = vcombine.low %v878_v31, %v882_v45  ;;  %v8838_v1 = vcombine.high %v375_v57, %v379_v58  ;;  %v8837_v9 = vcombine.low %v375_v57, %v379_v58  ;;  %v934_v58 = vld [vmem:[%s14166_s1 + $0x1c48] sm:$0xff] }
 0x21c   :  { %6916 = vmatpush1.bf16.msra.mxu1 %v9299_v3  ;;  %v898_v3 = vld [vmem:[%s14166_s1 + $0x1b28] sm:$0xff] }
 0x21d   :  { %6917 = vmatprep.subr.bf16.mxu1 %v9308_v6  ;;  %v387_v6 = vld [vmem:[%s14166_s1 + $0xb30] sm:$0xff]  ;;  %v9356_v10 = vcombine.high %v894_v2, %v898_v3 }
 0x21e   :  { %7080 = vmatpush1.bf16.msra.mxu0 %v8789_v4  ;;  %v383_v4 = vld [vmem:[%s14166_s1 + $0xb10] sm:$0xff] }
 0x21f   :  { %7081 = vmatprep.subr.bf16.mxu0 %v8798_v8  ;;  %v9347_v8 = vcombine.low %v886_v54, %v890_v56  ;;  %v8846_v12 = vcombine.high %v383_v4, %v387_v6  ;;  %v8845_v19 = vcombine.low %v383_v4, %v387_v6  ;;  %v942_v6 = vld [vmem:[%s14166_s1 + $0x1c88] sm:$0xff] }
 0x220   :  { %6918 = vmatpush1.bf16.msra.mxu1 %v9307_v14  ;;  %v906_v14 = vld [vmem:[%s14166_s1 + $0x1b68] sm:$0xff] }
 0x221   :  { %6919 = vmatprep.subr.bf16.mxu1 %v9316_v17  ;;  %v395_v17 = vld [vmem:[%s14166_s1 + $0xb70] sm:$0xff]  ;;  %v9364_v20 = vcombine.high %v902_v13, %v906_v14 }
 0x222   :  { %7082 = vmatpush1.bf16.msra.mxu0 %v8797_v15  ;;  %v391_v15 = vld [vmem:[%s14166_s1 + $0xb50] sm:$0xff] }
 0x223   :  { %7083 = vmatprep.subr.bf16.mxu0 %v8806_v18  ;;  %v9355_v18 = vcombine.low %v894_v2, %v898_v3  ;;  %v8854_v21 = vcombine.high %v391_v15, %v395_v17  ;;  %v8853_v41 = vcombine.low %v391_v15, %v395_v17  ;;  %v950_v17 = vld [vmem:[%s14166_s1 + $0x1cc8] sm:$0xff] }
 0x224   :  { %6920 = vmatpush1.bf16.msra.mxu1 %v9315_v24  ;;  %v914_v24 = vld [vmem:[%s14166_s1 + $0x1ba8] sm:$0xff] }
 0x225   :  { %6921 = vmatprep.subr.bf16.mxu1 %v9324_v26  ;;  %v403_v26 = vld [vmem:[%s14166_s1 + $0xbb0] sm:$0xff]  ;;  %v9372_v33 = vcombine.high %v910_v22, %v914_v24 }
 0x226   :  { %7084 = vmatpush1.bf16.msra.mxu0 %v8805_v25  ;;  %v399_v25 = vld [vmem:[%s14166_s1 + $0xb90] sm:$0xff] }
 0x227   :  { %7085 = vmatprep.subr.bf16.mxu0 %v8814_v29  ;;  %v9363_v29 = vcombine.low %v902_v13, %v906_v14  ;;  %v8862_v34 = vcombine.high %v399_v25, %v403_v26  ;;  %v8861_v31 = vcombine.low %v399_v25, %v403_v26  ;;  %v958_v26 = vld [vmem:[%s14166_s1 + $0x1d08] sm:$0xff] }
 0x228   :  { %6922 = vmatpush1.bf16.msra.mxu1 %v9323_v36  ;;  %v922_v36 = vld [vmem:[%s14166_s1 + $0x1be8] sm:$0xff] }
 0x229   :  { %6923 = vmatprep.subr.bf16.mxu1 %v9332_v40  ;;  %v411_v40 = vld [vmem:[%s14166_s1 + $0xbf0] sm:$0xff]  ;;  %v9380_v45 = vcombine.high %v918_v35, %v922_v36 }
 0x22a   :  { %7086 = vmatpush1.bf16.msra.mxu0 %v8813_v37  ;;  %v407_v37 = vld [vmem:[%s14166_s1 + $0xbd0] sm:$0xff] }
 0x22b   :  { %7087 = vmatprep.subr.bf16.mxu0 %v8822_v44  ;;  %v9371_v44 = vcombine.low %v910_v22, %v914_v24  ;;  %v8870_v47 = vcombine.high %v407_v37, %v411_v40  ;;  %v8869_v54 = vcombine.low %v407_v37, %v411_v40  ;;  %v1057_v37 = vsub.s32 0, %v10500_v43 }
 0x22c   :  { %6924 = vmatpush1.bf16.msra.mxu1 %v9331_v53  ;;  %v930_v53 = vld [vmem:[%s14166_s1 + $0x1c28] sm:$0xff] }
 0x22d   :  { %6925 = vmatprep.subr.bf16.mxu1 %v9340_v50  ;;  %v419_v50 = vld [vmem:[%s14166_s1 + $0xc30] sm:$0xff]  ;;  %v9388_v56 = vcombine.high %v926_v48, %v930_v53 }
 0x22e   :  { %7088 = vmatpush1.bf16.msra.mxu0 %v8821_v46  ;;  %v415_v46 = vld [vmem:[%s14166_s1 + $0xc10] sm:$0xff] }
 0x22f   :  { %7089 = vmatprep.subr.bf16.mxu0 %v8830_v51  ;;  %v9379_v51 = vcombine.low %v918_v35, %v922_v36  ;;  %v8878_v57 = vcombine.high %v415_v46, %v419_v50  ;;  %v8877_v2 = vcombine.low %v415_v46, %v419_v50 }
 0x230   :  { %6926 = vmatpush1.bf16.msra.mxu1 %v9339_v59  ;;  %v938_v59 = vld [vmem:[%s14166_s1 + $0x1c68] sm:$0xff] }
 0x231   :  { %6927 = vmatprep.subr.bf16.mxu1 %v9348_v62  ;;  %v427_v62 = vld [vmem:[%s14166_s1 + $0xc70] sm:$0xff]  ;;  %v9396_v3 = vcombine.high %v934_v58, %v938_v59 }
 0x232   :  { %7090 = vmatpush1.bf16.msra.mxu0 %v8829_v60  ;;  %v423_v60 = vld [vmem:[%s14166_s1 + $0xc50] sm:$0xff] }
 0x233   :  { %7091 = vmatprep.subr.bf16.mxu0 %v8838_v1  ;;  %v9387_v1 = vcombine.low %v926_v48, %v930_v53  ;;  %v8886_v4 = vcombine.high %v423_v60, %v427_v62  ;;  %v8885_v13 = vcombine.low %v423_v60, %v427_v62  ;;  %v455_v48 = vld [vmem:[%s14166_s1 + $0xd50] sm:$0xff] }
 0x234   :  { %6928 = vmatpush1.bf16.msra.mxu1 %v9347_v8  ;;  %v946_v8 = vld [vmem:[%s14166_s1 + $0x1ca8] sm:$0xff]  ;;  %v459_v53 = vld [vmem:[%s14166_s1 + $0xd70] sm:$0xff] }
 0x235   :  { %6929 = vmatprep.subr.bf16.mxu1 %v9356_v10  ;;  %v435_v10 = vld [vmem:[%s14166_s1 + $0xcb0] sm:$0xff]  ;;  %v9404_v14 = vcombine.high %v942_v6, %v946_v8 }
 0x236   :  { %7092 = vmatpush1.bf16.msra.mxu0 %v8837_v9  ;;  %v431_v9 = vld [vmem:[%s14166_s1 + $0xc90] sm:$0xff] }
 0x237   :  { %7093 = vmatprep.subr.bf16.mxu0 %v8846_v12  ;;  %v9395_v12 = vcombine.low %v934_v58, %v938_v59  ;;  %v8894_v15 = vcombine.high %v431_v9, %v435_v10  ;;  %v8893_v22 = vcombine.low %v431_v9, %v435_v10  ;;  %v978_v58 = vld [vmem:[%s14166_s1 + $0x1da8] sm:$0xff]  ;;  %v463_v60 = vld [vmem:[%s14166_s1 + $0xd90] sm:$0xff] }
 0x238   :  { %6930 = vmatpush1.bf16.msra.mxu1 %v9355_v18  ;;  %v954_v18 = vld [vmem:[%s14166_s1 + $0x1ce8] sm:$0xff]  ;;  %v467_v62 = vld [vmem:[%s14166_s1 + $0xdb0] sm:$0xff] }
 0x239   :  { %6931 = vmatprep.subr.bf16.mxu1 %v9364_v20  ;;  %v443_v20 = vld [vmem:[%s14166_s1 + $0xcf0] sm:$0xff]  ;;  %v9412_v24 = vcombine.high %v950_v17, %v954_v18  ;;  %v986_v9 = vld [vmem:[%s14166_s1 + $0x1de8] sm:$0xff] }
 0x23a   :  { %7094 = vmatpush1.bf16.msra.mxu0 %v8845_v19  ;;  %v439_v19 = vld [vmem:[%s14166_s1 + $0xcd0] sm:$0xff] }
 0x23b   :  { %7095 = vmatprep.subr.bf16.mxu0 %v8854_v21  ;;  %v9403_v21 = vcombine.low %v942_v6, %v946_v8  ;;  %v8902_v25 = vcombine.high %v439_v19, %v443_v20  ;;  %v8901_v35 = vcombine.low %v439_v19, %v443_v20  ;;  %v8926_v6 = vcombine.high %v463_v60, %v467_v62  ;;  %v982_v8 = vld [vmem:[%s14166_s1 + $0x1dc8] sm:$0xff] }
 0x23c   :  { %6932 = vmatpush1.bf16.msra.mxu1 %v9363_v29  ;;  %v962_v29 = vld [vmem:[%s14166_s1 + $0x1d28] sm:$0xff]  ;;  %v9444_v20 = vcombine.high %v982_v8, %v986_v9 }
 0x23d   :  { %6933 = vmatprep.subr.bf16.mxu1 %v9372_v33  ;;  %v451_v33 = vld [vmem:[%s14166_s1 + $0xd30] sm:$0xff]  ;;  %v9420_v36 = vcombine.high %v958_v26, %v962_v29  ;;  %v9419_v46 = vcombine.low %v958_v26, %v962_v29 }
 0x23e   :  { %7096 = vmatpush1.bf16.msra.mxu0 %v8853_v41  ;;  %v447_v41 = vld [vmem:[%s14166_s1 + $0xd10] sm:$0xff] }
 0x23f   :  { %7097 = vmatprep.subr.bf16.mxu0 %v8862_v34  ;;  %v9411_v34 = vcombine.low %v950_v17, %v954_v18  ;;  %v8910_v40 = vcombine.high %v447_v41, %v451_v33  ;;  %v8909_v50 = vcombine.low %v447_v41, %v451_v33  ;;  %v479_v26 = vld [vmem:[%s14166_s1 + $0xe10] sm:$0xff]  ;;  %v9443_v41 = vcombine.low %v982_v8, %v986_v9 }
 0x240   :  { %6934 = vmatpush1.bf16.msra.mxu1 %v9371_v44  ;;  %v966_v44 = vld [vmem:[%s14166_s1 + $0x1d48] sm:$0xff]  ;;  %v483_v29 = vld [vmem:[%s14166_s1 + $0xe30] sm:$0xff] }
 0x241   :  { %6935 = vmatprep.subr.bf16.mxu1 %v9380_v45  ;;  %v1053_v45 = vld [vmem:[%s14167_s2] sm:$0xff] }
 0x242   :  { %7098 = vmatpush1.bf16.msra.mxu0 %v8861_v31  ;;  %v970_v31 = vld [vmem:[%s14166_s1 + $0x1d68] sm:$0xff] }
 0x243   :  { %7099 = vmatprep.subr.bf16.mxu0 %v8870_v47  ;;  %v1061_v47 = vsub.s32 1, %v10500_v43 }
 0x244   :  { %6936 = vmatpush1.bf16.msra.mxu1 %v9379_v51  ;;  %v9428_v51 = vcombine.high %v966_v44, %v970_v31 }
 0x245   :  { %6946 = vmatprep.subr.bf16.mxu1 %v9388_v56  ;;  %v8918_v56 = vcombine.high %v455_v48, %v459_v53  ;;  %v1062_v59 = vrot.slane %v1053_v45, %v1061_v47 }
 0x246   :  { %7100 = vmatpush1.bf16.msra.mxu0 %v8869_v54  ;;  %v1058_v54 = vrot.slane %v1053_v45, %v1057_v37 }
 0x247   :  { %7110 = vmatprep.subr.bf16.mxu0 %v8878_v57  ;;  %6938 = vmatmul.mubr.bf16.vlgmr.msra.gmra.mrb[4].mxu1 %v11522_v42  ;;  %v974_v57 = vld [vmem:[%s14166_s1 + $0x1d88] sm:$0xff]  ;;  %v9918_v10 = vadd.f32 %v11600_v5, %v1062_v59  ;;  %v8925_v5 = vcombine.low %v463_v60, %v467_v62 }
 0x248   :  { %6947 = vmatpush1.bf16.msra.mxu1 %v9387_v1  ;;  %6978 = vmatprep.mubr.bf16.mxu1 %v11532_v49  ;;  %v9427_v1 = vcombine.low %v966_v44, %v970_v31  ;;  %v9435_v17 = vcombine.low %v974_v57, %v978_v58  ;;  %v487_v44 = vld [vmem:[%s14166_s1 + $0xe50] sm:$0xff]  ;;  %v1014_v62 = vld [vmem:[%s14166_s1 + $0x1ec8] sm:$0xff] }
 0x249   :  { %7102 = vmatmul.mubr.bf16.vlgmr.msra.gmra.mrb[4].mxu0 %v10682_v32  ;;  %6948 = vmatprep.subr.bf16.mxu1 %v9396_v3  ;;  %v9436_v3 = vcombine.high %v974_v57, %v978_v58  ;;  %v491_v31 = vld [vmem:[%s14166_s1 + $0xe70] sm:$0xff] }
 0x24a   :  { %7111 = vmatpush1.bf16.msra.mxu0 %v8877_v2  ;;  %7142 = vmatprep.mubr.bf16.mxu0 %v10703_v39  ;;  %v8917_v2 = vcombine.low %v455_v48, %v459_v53  ;;  %v8941_v48 = vcombine.low %v479_v26, %v483_v29  ;;  %v8949_v58 = vcombine.low %v487_v44, %v491_v31 }
 0x24b   :  { %7112 = vmatprep.subr.bf16.mxu0 %v8886_v4  ;;  %v9916_v4 = vadd.f32 %v11592_v63, %v1058_v54  ;;  %v475_v63 = vld [vmem:[%s14166_s1 + $0xdf0] sm:$0xff] }
 0x24c   :  { %6949 = vmatpush1.bf16.msra.mxu1 %v9395_v12  ;;  %v495_v54 = vld [vmem:[%s14166_s1 + $0xe90] sm:$0xff] }
 0x24d   :  { %6950 = vmatprep.subr.bf16.mxu1 %v9404_v14 }
 0x24e   :  { %7113 = vmatpush1.bf16.msra.mxu0 %v8885_v13  ;;  %v471_v13 = vld [vmem:[%s14166_s1 + $0xdd0] sm:$0xff] }
 0x24f   :  { %7114 = vmatprep.subr.bf16.mxu0 %v8894_v15  ;;  %v8933_v33 = vcombine.low %v471_v13, %v475_v63 }
 0x250   :  { %6951 = vmatpush1.bf16.msra.mxu1 %v9403_v21 }
 0x251   :  { %6952 = vmatprep.subr.bf16.mxu1 %v9412_v24  ;;  %v990_v24 = vld [vmem:[%s14166_s1 + $0x1e08] sm:$0xff] }
 0x252   :  { %7115 = vmatpush1.bf16.msra.mxu0 %v8893_v22  ;;  %v8934_v22 = vcombine.high %v471_v13, %v475_v63  ;;  %v511_v13 = vld [vmem:[%s14166_s1 + $0xf10] sm:$0xff] }
 0x253   :  { %7116 = vmatprep.subr.bf16.mxu0 %v8902_v25  ;;  %v994_v25 = vld [vmem:[%s14166_s1 + $0x1e28] sm:$0xff]  ;;  %v515_v63 = vld [vmem:[%s14166_s1 + $0xf30] sm:$0xff] }
 0x254   :  { %6953 = vmatpush1.bf16.msra.mxu1 %v9411_v34  ;;  %v9452_v34 = vcombine.high %v990_v24, %v994_v25  ;;  %v9451_v45 = vcombine.low %v990_v24, %v994_v25  ;;  %v523_v24 = vld [vmem:[%s14166_s1 + $0xf70] sm:$0xff] }
 0x255   :  { %6954 = vmatprep.subr.bf16.mxu1 %v9420_v36  ;;  %v998_v36 = vld [vmem:[%s14166_s1 + $0x1e48] sm:$0xff] }
 0x256   :  { %7117 = vmatpush1.bf16.msra.mxu0 %v8901_v35  ;;  %v8942_v35 = vcombine.high %v479_v26, %v483_v29  ;;  %v8973_v26 = vcombine.low %v511_v13, %v515_v63 }
 0x257   :  { %7118 = vmatprep.subr.bf16.mxu0 %v8910_v40  ;;  %v1002_v40 = vld [vmem:[%s14166_s1 + $0x1e68] sm:$0xff] }
 0x258   :  { %6955 = vmatpush1.bf16.msra.mxu1 %v9419_v46  ;;  %v9460_v53 = vcombine.high %v998_v36, %v1002_v40  ;;  %v8950_v46 = vcombine.high %v487_v44, %v491_v31  ;;  %v9459_v57 = vcombine.low %v998_v36, %v1002_v40  ;;  %v531_v36 = vld [vmem:[%s14166_s1 + $0xfb0] sm:$0xff] }
 0x259   :  { %6956 = vmatprep.subr.bf16.mxu1 %v9428_v51  ;;  %v1010_v51 = vld [vmem:[%s14166_s1 + $0x1ea8] sm:$0xff] }
 0x25a   :  { %7119 = vmatpush1.bf16.msra.mxu0 %v8909_v50  ;;  %v1006_v50 = vld [vmem:[%s14166_s1 + $0x1e88] sm:$0xff] }
 0x25b   :  { %7120 = vmatprep.subr.bf16.mxu0 %v8918_v56  ;;  %v499_v56 = vld [vmem:[%s14166_s1 + $0xeb0] sm:$0xff]  ;;  %v9468_v59 = vcombine.high %v1006_v50, %v1010_v51 }
 0x25c   :  { %v6652_v12 = vpop.f32.mrb[0].mxu0  ;;  %6957 = vmatpush1.bf16.msra.mxu1 %v9427_v1  ;;  %v8958_v60 = vcombine.high %v495_v54, %v499_v56  ;;  %v1018_v1 = vld [vmem:[%s14166_s1 + $0x1ee8] sm:$0xff] }
 0x25d   :  { %v12407_v14 = vadd.f32 %v9916_v4, %v6652_v12  ;;  %v6654_v15 = vpop.f32.mrb[1].mxu0  ;;  %6958 = vmatprep.subr.bf16.mxu1 %v9436_v3  ;;  %v507_v3 = vld [vmem:[%s14166_s1 + $0xef0] sm:$0xff]  ;;  %v9467_v4 = vcombine.low %v1006_v50, %v1010_v51  ;;  %v9476_v8 = vcombine.high %v1014_v62, %v1018_v1  ;;  %v1026_v12 = vld [vmem:[%s14166_s1 + $0x1f28] sm:$0xff] }
 0x25e   :  { %v12409_v18 = vadd.f32 %v9918_v10, %v6654_v15  ;;  %v6656_v19 = vpop.f32.mrb[2].mxu0  ;;  %7121 = vmatpush1.bf16.msra.mxu0 %v8917_v2  ;;  %v503_v2 = vld [vmem:[%s14166_s1 + $0xed0] sm:$0xff]  ;;  %v1022_v10 = vld [vmem:[%s14166_s1 + $0x1f08] sm:$0xff]  ;;  %v9475_v15 = vcombine.low %v1014_v62, %v1018_v1 }
 0x25f   :  { %v6657_v21 = vpop.f32.mrb[3].mxu0  ;;  %7122 = vmatprep.subr.bf16.mxu0 %v8926_v6  ;;  %v8957_v6 = vcombine.low %v495_v54, %v499_v56  ;;  %v8966_v9 = vcombine.high %v503_v2, %v507_v3  ;;  %v9484_v19 = vcombine.high %v1022_v10, %v1026_v12  ;;  %v9483_v25 = vcombine.low %v1022_v10, %v1026_v12  ;;  %v539_v50 = vld [vmem:[%s14166_s1 + $0xff0] sm:$0xff] }
 0x260   :  { %6959 = vmatpush1.bf16.msra.mxu1 %v9435_v17  ;;  %v8965_v17 = vcombine.low %v503_v2, %v507_v3  ;;  %v1034_v21 = vld [vmem:[%s14166_s1 + $0x1f68] sm:$0xff]  ;;  %v547_v62 = vld [vmem:[%s14166_s1 + $0x1030] sm:$0xff] }
 0x261   :  { %6960 = vmatprep.subr.bf16.mxu1 %v9444_v20  ;;  %v1030_v20 = vld [vmem:[%s14166_s1 + $0x1f48] sm:$0xff]  ;;  %v555_v10 = vld [vmem:[%s14166_s1 + $0x1070] sm:$0xff] }
 0x262   :  { %7123 = vmatpush1.bf16.msra.mxu0 %v8925_v5  ;;  %v8974_v5 = vcombine.high %v511_v13, %v515_v63  ;;  %v9492_v29 = vcombine.high %v1030_v20, %v1034_v21  ;;  %v9491_v40 = vcombine.low %v1030_v20, %v1034_v21  ;;  %v563_v20 = vld [vmem:[%s14166_s1 + $0x10b0] sm:$0xff] }
 0x263   :  { %7124 = vmatprep.subr.bf16.mxu0 %v8934_v22  ;;  %v519_v22 = vld [vmem:[%s14166_s1 + $0xf50] sm:$0xff] }
 0x264   :  { %6961 = vmatpush1.bf16.msra.mxu1 %v9443_v41  ;;  %v8982_v41 = vcombine.high %v519_v22, %v523_v24  ;;  %v8981_v44 = vcombine.low %v519_v22, %v523_v24 }
 0x265   :  { %6962 = vmatprep.subr.bf16.mxu1 %v9452_v34  ;;  %v1042_v34 = vld [vmem:[%s14166_s1 + $0x1fa8] sm:$0xff] }
 0x266   :  { %7125 = vmatpush1.bf16.msra.mxu0 %v8933_v33  ;;  %v1038_v33 = vld [vmem:[%s14166_s1 + $0x1f88] sm:$0xff] }
 0x267   :  { %7126 = vmatprep.subr.bf16.mxu0 %v8942_v35  ;;  %v527_v35 = vld [vmem:[%s14166_s1 + $0xf90] sm:$0xff]  ;;  %v9500_v31 = vcombine.high %v1038_v33, %v1042_v34  ;;  %v9499_v51 = vcombine.low %v1038_v33, %v1042_v34 }
 0x268   :  { %6963 = vmatpush1.bf16.msra.mxu1 %v9451_v45  ;;  %v8990_v45 = vcombine.high %v527_v35, %v531_v36  ;;  %v8989_v54 = vcombine.low %v527_v35, %v531_v36  ;;  %v571_v33 = vld [vmem:[%s14166_s1 + $0x10f0] sm:$0xff] }
 0x269   :  { %6964 = vmatprep.subr.bf16.mxu1 %v9460_v53  ;;  %v1050_v53 = vld [vmem:[%s14166_s1 + $0x1fe8] sm:$0xff] }
 0x26a   :  { %7127 = vmatpush1.bf16.msra.mxu0 %v8941_v48  ;;  %v1046_v48 = vld [vmem:[%s14166_s1 + $0x1fc8] sm:$0xff] }
 0x26b   :  { %7128 = vmatprep.subr.bf16.mxu0 %v8950_v46  ;;  %v535_v46 = vld [vmem:[%s14166_s1 + $0xfd0] sm:$0xff]  ;;  %v9508_v56 = vcombine.high %v1046_v48, %v1050_v53  ;;  %v9507_v1 = vcombine.low %v1046_v48, %v1050_v53 }
 0x26c   :  { %6965 = vmatpush1.bf16.msra.mxu1 %v9459_v57  ;;  %v8998_v57 = vcombine.high %v535_v46, %v539_v50  ;;  %v8997_v2 = vcombine.low %v535_v46, %v539_v50 }
 0x26d   :  { %6966 = vmatprep.subr.bf16.mxu1 %v9468_v59  ;;  %v36_v59 = vld [vmem:[%s14166_s1 + $0x38] sm:$0xff] }
 0x26e   :  { %7129 = vmatpush1.bf16.msra.mxu0 %v8949_v58  ;;  %v32_v58 = vld [vmem:[%s14166_s1 + $0x18] sm:$0xff] }
 0x26f   :  { %7130 = vmatprep.subr.bf16.mxu0 %v8958_v60  ;;  %v543_v60 = vld [vmem:[%s14166_s1 + $0x1010] sm:$0xff]  ;;  %v8496_v3 = vcombine.high %v32_v58, %v36_v59  ;;  %v8495_v12 = vcombine.low %v32_v58, %v36_v59 }
 0x270   :  { %6967 = vmatpush1.bf16.msra.mxu1 %v9467_v4  ;;  %v9006_v4 = vcombine.high %v543_v60, %v547_v62  ;;  %v9005_v13 = vcombine.low %v543_v60, %v547_v62 }
 0x271   :  { %6968 = vmatprep.subr.bf16.mxu1 %v9476_v8  ;;  %v44_v8 = vld [vmem:[%s14166_s1 + $0x78] sm:$0xff] }
 0x272   :  { %7131 = vmatpush1.bf16.msra.mxu0 %v8957_v6  ;;  %v40_v6 = vld [vmem:[%s14166_s1 + $0x58] sm:$0xff] }
 0x273   :  { %7132 = vmatprep.subr.bf16.mxu0 %v8966_v9  ;;  %v551_v9 = vld [vmem:[%s14166_s1 + $0x1050] sm:$0xff]  ;;  %v8504_v63 = vcombine.high %v40_v6, %v44_v8  ;;  %v8503_v21 = vcombine.low %v40_v6, %v44_v8 }
 0x274   :  { %6969 = vmatpush1.bf16.msra.mxu1 %v9475_v15  ;;  %v9014_v15 = vcombine.high %v551_v9, %v555_v10  ;;  %v9013_v22 = vcombine.low %v551_v9, %v555_v10 }
 0x275   :  { %6970 = vmatprep.subr.bf16.mxu1 %v9484_v19  ;;  %v52_v19 = vld [vmem:[%s14166_s1 + $0xb8] sm:$0xff] }
 0x276   :  { %7133 = vmatpush1.bf16.msra.mxu0 %v8965_v17  ;;  %v48_v17 = vld [vmem:[%s14166_s1 + $0x98] sm:$0xff] }
 0x277   :  { %7134 = vmatprep.subr.bf16.mxu0 %v8974_v5  ;;  %v559_v5 = vld [vmem:[%s14166_s1 + $0x1090] sm:$0xff]  ;;  %v8512_v24 = vcombine.high %v48_v17, %v52_v19  ;;  %v8511_v34 = vcombine.low %v48_v17, %v52_v19 }
 0x278   :  { %6971 = vmatpush1.bf16.msra.mxu1 %v9483_v25  ;;  %v9022_v25 = vcombine.high %v559_v5, %v563_v20  ;;  %v9021_v35 = vcombine.low %v559_v5, %v563_v20 }
 0x279   :  { %6972 = vmatprep.subr.bf16.mxu1 %v9492_v29  ;;  %v60_v29 = vld [vmem:[%s14166_s1 + $0xf8] sm:$0xff] }
 0x27a   :  { %7135 = vmatpush1.bf16.msra.mxu0 %v8973_v26  ;;  %v56_v26 = vld [vmem:[%s14166_s1 + $0xd8] sm:$0xff] }
 0x27b   :  { %7136 = vmatprep.subr.bf16.mxu0 %v8982_v41  ;;  %v567_v41 = vld [vmem:[%s14166_s1 + $0x10d0] sm:$0xff]  ;;  %v8520_v36 = vcombine.high %v56_v26, %v60_v29  ;;  %v8519_v48 = vcombine.low %v56_v26, %v60_v29 }
 0x27c   :  { %6973 = vmatpush1.bf16.msra.mxu1 %v9491_v40  ;;  %v9030_v40 = vcombine.high %v567_v41, %v571_v33  ;;  %v9029_v53 = vcombine.low %v567_v41, %v571_v33 }
 0x27d   :  { %6974 = vmatprep.subr.bf16.mxu1 %v9500_v31  ;;  %v68_v31 = vld [vmem:[%s14166_s1 + $0x138] sm:$0xff] }
 0x27e   :  { %7137 = vmatpush1.bf16.msra.mxu0 %v8981_v44  ;;  %v64_v44 = vld [vmem:[%s14166_s1 + $0x118] sm:$0xff] }
 0x27f   :  { %7138 = vmatprep.subr.bf16.mxu0 %v8990_v45  ;;  %v579_v45 = vld [vmem:[%s14166_s1 + $0x1130] sm:$0xff]  ;;  %v8528_v46 = vcombine.high %v64_v44, %v68_v31  ;;  %v8527_v58 = vcombine.low %v64_v44, %v68_v31 }
 0x280   :  { %6975 = vmatpush1.bf16.msra.mxu1 %v9499_v51  ;;  %v72_v51 = vld [vmem:[%s14166_s1 + $0x158] sm:$0xff] }
 0x281   :  { %6976 = vmatprep.subr.bf16.mxu1 %v9508_v56  ;;  %v583_v56 = vld [vmem:[%s14166_s1 + $0x1150] sm:$0xff] }
 0x282   :  { %7139 = vmatpush1.bf16.msra.mxu0 %v8989_v54  ;;  %v76_v54 = vld [vmem:[%s14166_s1 + $0x178] sm:$0xff] }
 0x283   :  { %7140 = vmatprep.subr.bf16.mxu0 %v8998_v57  ;;  %v587_v57 = vld [vmem:[%s14166_s1 + $0x1170] sm:$0xff]  ;;  %v8536_v60 = vcombine.high %v72_v51, %v76_v54  ;;  %v8535_v6 = vcombine.low %v72_v51, %v76_v54 }
 0x284   :  { %6977 = vmatpush1.bf16.msra.mxu1 %v9507_v1  ;;  %v9046_v62 = vcombine.high %v583_v56, %v587_v57  ;;  %v80_v1 = vld [vmem:[%s14166_s1 + $0x198] sm:$0xff]  ;;  %v9045_v8 = vcombine.low %v583_v56, %v587_v57 }
 0x285   :  { %7315 = vmatprep.subr.bf16.mxu1 %v8496_v3  ;;  %v591_v3 = vld [vmem:[%s14166_s1 + $0x1190] sm:$0xff] }
 0x286   :  { %7141 = vmatpush1.bf16.msra.mxu0 %v8997_v2  ;;  %v84_v2 = vld [vmem:[%s14166_s1 + $0x1b8] sm:$0xff] }
 0x287   :  { %7151 = vmatprep.subr.bf16.mxu0 %v9006_v4  ;;  %6979 = vmatmul.mubr.bf16.vlgmr.msra.gmra.mrb[4].mxu1 %v11730_v27  ;;  %v595_v4 = vld [vmem:[%s14166_s1 + $0x11b0] sm:$0xff]  ;;  %v8544_v9 = vcombine.high %v80_v1, %v84_v2  ;;  %v8543_v17 = vcombine.low %v80_v1, %v84_v2 }
 0x288   :  { %7316 = vmatpush1.bf16.msra.mxu1 %v8495_v12  ;;  %7347 = vmatprep.mubr.bf16.mxu1 %v10553_v11  ;;  %v575_v11 = vld [vmem:[%s14166_s1 + $0x1110] sm:$0xff]  ;;  %v9054_v10 = vcombine.high %v591_v3, %v595_v4  ;;  %v88_v12 = vld [vmem:[%s14166_s1 + $0x1d8] sm:$0xff]  ;;  %v9053_v19 = vcombine.low %v591_v3, %v595_v4 }
 0x289   :  { %7143 = vmatmul.mubr.bf16.vlgmr.msra.gmra.mrb[4].mxu0 %v10905_v55  ;;  %7317 = vmatprep.subr.bf16.mxu1 %v8504_v63  ;;  %v9038_v50 = vcombine.high %v575_v11, %v579_v45  ;;  %v9037_v59 = vcombine.low %v575_v11, %v579_v45  ;;  %v599_v63 = vld [vmem:[%s14166_s1 + $0x11d0] sm:$0xff] }
 0x28a   :  { %7152 = vmatpush1.bf16.msra.mxu0 %v9005_v13  ;;  %7183 = vmatprep.mubr.bf16.mxu0 %v10914_v61  ;;  %v92_v13 = vld [vmem:[%s14166_s1 + $0x1f8] sm:$0xff] }
 0x28b   :  { %7153 = vmatprep.subr.bf16.mxu0 %v9014_v15  ;;  %v603_v15 = vld [vmem:[%s14166_s1 + $0x11f0] sm:$0xff]  ;;  %v8552_v5 = vcombine.high %v88_v12, %v92_v13  ;;  %v8551_v26 = vcombine.low %v88_v12, %v92_v13 }
 0x28c   :  { %7318 = vmatpush1.bf16.msra.mxu1 %v8503_v21  ;;  %v9062_v20 = vcombine.high %v599_v63, %v603_v15  ;;  %v96_v21 = vld [vmem:[%s14166_s1 + $0x218] sm:$0xff]  ;;  %v9061_v29 = vcombine.low %v599_v63, %v603_v15 }
 0x28d   :  { %7319 = vmatprep.subr.bf16.mxu1 %v8512_v24  ;;  %v607_v24 = vld [vmem:[%s14166_s1 + $0x1210] sm:$0xff] }
 0x28e   :  { %7154 = vmatpush1.bf16.msra.mxu0 %v9013_v22  ;;  %v100_v22 = vld [vmem:[%s14166_s1 + $0x238] sm:$0xff] }
 0x28f   :  { %7155 = vmatprep.subr.bf16.mxu0 %v9022_v25  ;;  %v611_v25 = vld [vmem:[%s14166_s1 + $0x1230] sm:$0xff]  ;;  %v8560_v41 = vcombine.high %v96_v21, %v100_v22  ;;  %v8559_v44 = vcombine.low %v96_v21, %v100_v22 }
 0x290   :  { %7320 = vmatpush1.bf16.msra.mxu1 %v8511_v34  ;;  %v9070_v33 = vcombine.high %v607_v24, %v611_v25  ;;  %v104_v34 = vld [vmem:[%s14166_s1 + $0x258] sm:$0xff]  ;;  %v9069_v31 = vcombine.low %v607_v24, %v611_v25 }
 0x291   :  { %7321 = vmatprep.subr.bf16.mxu1 %v8520_v36  ;;  %v615_v36 = vld [vmem:[%s14166_s1 + $0x1250] sm:$0xff] }
 0x292   :  { %7156 = vmatpush1.bf16.msra.mxu0 %v9021_v35  ;;  %v108_v35 = vld [vmem:[%s14166_s1 + $0x278] sm:$0xff] }
 0x293   :  { %7157 = vmatprep.subr.bf16.mxu0 %v9030_v40  ;;  %v619_v40 = vld [vmem:[%s14166_s1 + $0x1270] sm:$0xff]  ;;  %v8568_v11 = vcombine.high %v104_v34, %v108_v35  ;;  %v8567_v51 = vcombine.low %v104_v34, %v108_v35 }
 0x294   :  { %7322 = vmatpush1.bf16.msra.mxu1 %v8519_v48  ;;  %v9078_v45 = vcombine.high %v615_v36, %v619_v40  ;;  %v112_v48 = vld [vmem:[%s14166_s1 + $0x298] sm:$0xff]  ;;  %v9077_v54 = vcombine.low %v615_v36, %v619_v40 }
 0x295   :  { %7323 = vmatprep.subr.bf16.mxu1 %v8528_v46  ;;  %v623_v46 = vld [vmem:[%s14166_s1 + $0x1290] sm:$0xff] }
 0x296   :  { %7158 = vmatpush1.bf16.msra.mxu0 %v9029_v53  ;;  %v116_v53 = vld [vmem:[%s14166_s1 + $0x2b8] sm:$0xff] }
 0x297   :  { %7159 = vmatprep.subr.bf16.mxu0 %v9038_v50  ;;  %v627_v50 = vld [vmem:[%s14166_s1 + $0x12b0] sm:$0xff]  ;;  %v8576_v56 = vcombine.high %v112_v48, %v116_v53  ;;  %v8575_v1 = vcombine.low %v112_v48, %v116_v53 }
 0x298   :  { %7324 = vmatpush1.bf16.msra.mxu1 %v8527_v58  ;;  %v9086_v57 = vcombine.high %v623_v46, %v627_v50  ;;  %v120_v58 = vld [vmem:[%s14166_s1 + $0x2d8] sm:$0xff]  ;;  %v9085_v2 = vcombine.low %v623_v46, %v627_v50 }
 0x299   :  { %7325 = vmatprep.subr.bf16.mxu1 %v8536_v60  ;;  %v631_v60 = vld [vmem:[%s14166_s1 + $0x12d0] sm:$0xff] }
 0x29a   :  { %7160 = vmatpush1.bf16.msra.mxu0 %v9037_v59  ;;  %v124_v59 = vld [vmem:[%s14166_s1 + $0x2f8] sm:$0xff] }
 0x29b   :  { %7161 = vmatprep.subr.bf16.mxu0 %v9046_v62  ;;  %v635_v62 = vld [vmem:[%s14166_s1 + $0x12f0] sm:$0xff]  ;;  %v8584_v3 = vcombine.high %v120_v58, %v124_v59  ;;  %v8583_v12 = vcombine.low %v120_v58, %v124_v59 }
 0x29c   :  { %7326 = vmatpush1.bf16.msra.mxu1 %v8535_v6  ;;  %v9094_v4 = vcombine.high %v631_v60, %v635_v62  ;;  %v128_v6 = vld [vmem:[%s14166_s1 + $0x318] sm:$0xff]  ;;  %v9093_v13 = vcombine.low %v631_v60, %v635_v62 }
 0x29d   :  { %7327 = vmatprep.subr.bf16.mxu1 %v8544_v9  ;;  %v639_v9 = vld [vmem:[%s14166_s1 + $0x1310] sm:$0xff] }
 0x29e   :  { %7162 = vmatpush1.bf16.msra.mxu0 %v9045_v8  ;;  %v132_v8 = vld [vmem:[%s14166_s1 + $0x338] sm:$0xff] }
 0x29f   :  { %7163 = vmatprep.subr.bf16.mxu0 %v9054_v10  ;;  %v643_v10 = vld [vmem:[%s14166_s1 + $0x1330] sm:$0xff]  ;;  %v8592_v63 = vcombine.high %v128_v6, %v132_v8  ;;  %v8591_v21 = vcombine.low %v128_v6, %v132_v8 }
 0x2a0   :  { %7328 = vmatpush1.bf16.msra.mxu1 %v8543_v17  ;;  %v9102_v15 = vcombine.high %v639_v9, %v643_v10  ;;  %v136_v17 = vld [vmem:[%s14166_s1 + $0x358] sm:$0xff]  ;;  %v9101_v22 = vcombine.low %v639_v9, %v643_v10 }
 0x2a1   :  { %7329 = vmatprep.subr.bf16.mxu1 %v8552_v5  ;;  %v647_v5 = vld [vmem:[%s14166_s1 + $0x1350] sm:$0xff] }
 0x2a2   :  { %7164 = vmatpush1.bf16.msra.mxu0 %v9053_v19  ;;  %v140_v19 = vld [vmem:[%s14166_s1 + $0x378] sm:$0xff] }
 0x2a3   :  { %7165 = vmatprep.subr.bf16.mxu0 %v9062_v20  ;;  %v651_v20 = vld [vmem:[%s14166_s1 + $0x1370] sm:$0xff]  ;;  %v8600_v24 = vcombine.high %v136_v17, %v140_v19  ;;  %v8599_v34 = vcombine.low %v136_v17, %v140_v19 }
 0x2a4   :  { %7330 = vmatpush1.bf16.msra.mxu1 %v8551_v26  ;;  %v9110_v25 = vcombine.high %v647_v5, %v651_v20  ;;  %v144_v26 = vld [vmem:[%s14166_s1 + $0x398] sm:$0xff]  ;;  %v9109_v35 = vcombine.low %v647_v5, %v651_v20 }
 0x2a5   :  { %7331 = vmatprep.subr.bf16.mxu1 %v8560_v41  ;;  %v655_v41 = vld [vmem:[%s14166_s1 + $0x1390] sm:$0xff] }
 0x2a6   :  { %7166 = vmatpush1.bf16.msra.mxu0 %v9061_v29  ;;  %v148_v29 = vld [vmem:[%s14166_s1 + $0x3b8] sm:$0xff] }
 0x2a7   :  { %7167 = vmatprep.subr.bf16.mxu0 %v9070_v33  ;;  %v659_v33 = vld [vmem:[%s14166_s1 + $0x13b0] sm:$0xff]  ;;  %v8608_v36 = vcombine.high %v144_v26, %v148_v29  ;;  %v8607_v48 = vcombine.low %v144_v26, %v148_v29 }
 0x2a8   :  { %7332 = vmatpush1.bf16.msra.mxu1 %v8559_v44  ;;  %v9118_v40 = vcombine.high %v655_v41, %v659_v33  ;;  %v152_v44 = vld [vmem:[%s14166_s1 + $0x3d8] sm:$0xff]  ;;  %v9117_v53 = vcombine.low %v655_v41, %v659_v33 }
 0x2a9   :  { %7333 = vmatprep.subr.bf16.mxu1 %v8568_v11  ;;  %v663_v11 = vld [vmem:[%s14166_s1 + $0x13d0] sm:$0xff]  ;;  %v192_v33 = vld [vmem:[%s14166_s1 + $0x518] sm:$0xff] }
 0x2aa   :  { %7168 = vmatpush1.bf16.msra.mxu0 %v9069_v31  ;;  %v156_v31 = vld [vmem:[%s14166_s1 + $0x3f8] sm:$0xff] }
 0x2ab   :  { %7169 = vmatprep.subr.bf16.mxu0 %v9078_v45  ;;  %v667_v45 = vld [vmem:[%s14166_s1 + $0x13f0] sm:$0xff]  ;;  %v8616_v46 = vcombine.high %v152_v44, %v156_v31  ;;  %v8615_v58 = vcombine.low %v152_v44, %v156_v31 }
 0x2ac   :  { %7334 = vmatpush1.bf16.msra.mxu1 %v8567_v51  ;;  %v9126_v50 = vcombine.high %v663_v11, %v667_v45  ;;  %v160_v51 = vld [vmem:[%s14166_s1 + $0x418] sm:$0xff]  ;;  %v9125_v59 = vcombine.low %v663_v11, %v667_v45 }
 0x2ad   :  { %7335 = vmatprep.subr.bf16.mxu1 %v8576_v56  ;;  %v671_v56 = vld [vmem:[%s14166_s1 + $0x1410] sm:$0xff]  ;;  %v200_v11 = vld [vmem:[%s14166_s1 + $0x558] sm:$0xff] }
 0x2ae   :  { %7170 = vmatpush1.bf16.msra.mxu0 %v9077_v54  ;;  %v164_v54 = vld [vmem:[%s14166_s1 + $0x438] sm:$0xff] }
 0x2af   :  { %7171 = vmatprep.subr.bf16.mxu0 %v9086_v57  ;;  %v675_v57 = vld [vmem:[%s14166_s1 + $0x1430] sm:$0xff]  ;;  %v8624_v60 = vcombine.high %v160_v51, %v164_v54  ;;  %v8623_v6 = vcombine.low %v160_v51, %v164_v54  ;;  %v204_v45 = vld [vmem:[%s14166_s1 + $0x578] sm:$0xff] }
 0x2b0   :  { %7336 = vmatpush1.bf16.msra.mxu1 %v8575_v1  ;;  %v9134_v62 = vcombine.high %v671_v56, %v675_v57  ;;  %v168_v1 = vld [vmem:[%s14166_s1 + $0x458] sm:$0xff]  ;;  %v9133_v8 = vcombine.low %v671_v56, %v675_v57  ;;  %v8664_v51 = vcombine.high %v200_v11, %v204_v45 }
 0x2b1   :  { %7337 = vmatprep.subr.bf16.mxu1 %v8584_v3  ;;  %v679_v3 = vld [vmem:[%s14166_s1 + $0x1450] sm:$0xff]  ;;  %v208_v56 = vld [vmem:[%s14166_s1 + $0x598] sm:$0xff] }
 0x2b2   :  { %7172 = vmatpush1.bf16.msra.mxu0 %v9085_v2  ;;  %v172_v2 = vld [vmem:[%s14166_s1 + $0x478] sm:$0xff] }
 0x2b3   :  { %7173 = vmatprep.subr.bf16.mxu0 %v9094_v4  ;;  %v683_v4 = vld [vmem:[%s14166_s1 + $0x1470] sm:$0xff]  ;;  %v8632_v9 = vcombine.high %v168_v1, %v172_v2  ;;  %v8631_v17 = vcombine.low %v168_v1, %v172_v2  ;;  %v212_v57 = vld [vmem:[%s14166_s1 + $0x5b8] sm:$0xff] }
 0x2b4   :  { %7338 = vmatpush1.bf16.msra.mxu1 %v8583_v12  ;;  %v9142_v10 = vcombine.high %v679_v3, %v683_v4  ;;  %v176_v12 = vld [vmem:[%s14166_s1 + $0x498] sm:$0xff]  ;;  %v9141_v19 = vcombine.low %v679_v3, %v683_v4  ;;  %v8672_v1 = vcombine.high %v208_v56, %v212_v57 }
 0x2b5   :  { %7339 = vmatprep.subr.bf16.mxu1 %v8592_v63  ;;  %v687_v63 = vld [vmem:[%s14166_s1 + $0x1490] sm:$0xff]  ;;  %v216_v3 = vld [vmem:[%s14166_s1 + $0x5d8] sm:$0xff] }
 0x2b6   :  { %7174 = vmatpush1.bf16.msra.mxu0 %v9093_v13  ;;  %v180_v13 = vld [vmem:[%s14166_s1 + $0x4b8] sm:$0xff] }
 0x2b7   :  { %7175 = vmatprep.subr.bf16.mxu0 %v9102_v15  ;;  %v691_v15 = vld [vmem:[%s14166_s1 + $0x14b0] sm:$0xff]  ;;  %v8640_v5 = vcombine.high %v176_v12, %v180_v13  ;;  %v220_v4 = vld [vmem:[%s14166_s1 + $0x5f8] sm:$0xff] }
 0x2b8   :  { %7340 = vmatpush1.bf16.msra.mxu1 %v8591_v21  ;;  %v9150_v20 = vcombine.high %v687_v63, %v691_v15  ;;  %v188_v21 = vld [vmem:[%s14166_s1 + $0x4f8] sm:$0xff]  ;;  %v9149_v26 = vcombine.low %v687_v63, %v691_v15 }
 0x2b9   :  { %7341 = vmatprep.subr.bf16.mxu1 %v8600_v24  ;;  %v699_v24 = vld [vmem:[%s14166_s1 + $0x14f0] sm:$0xff]  ;;  %v224_v63 = vld [vmem:[%s14166_s1 + $0x618] sm:$0xff] }
 0x2ba   :  { %7176 = vmatpush1.bf16.msra.mxu0 %v9101_v22  ;;  %v695_v22 = vld [vmem:[%s14166_s1 + $0x14d0] sm:$0xff]  ;;  %v228_v15 = vld [vmem:[%s14166_s1 + $0x638] sm:$0xff] }
 0x2bb   :  { %7177 = vmatprep.subr.bf16.mxu0 %v9110_v25  ;;  %v8639_v25 = vcombine.low %v176_v12, %v180_v13  ;;  %v9158_v41 = vcombine.high %v695_v22, %v699_v24  ;;  %v8680_v12 = vcombine.high %v216_v3, %v220_v4 }
 0x2bc   :  { %7342 = vmatpush1.bf16.msra.mxu1 %v8599_v34  ;;  %v196_v34 = vld [vmem:[%s14166_s1 + $0x538] sm:$0xff] }
 0x2bd   :  { %7343 = vmatprep.subr.bf16.mxu1 %v8608_v36  ;;  %v8656_v44 = vcombine.high %v192_v33, %v196_v34 }
 0x2be   :  { %7178 = vmatpush1.bf16.msra.mxu0 %v9109_v35  ;;  %v707_v35 = vld [vmem:[%s14166_s1 + $0x1530] sm:$0xff] }
 0x2bf   :  { %7179 = vmatprep.subr.bf16.mxu0 %v9118_v40  ;;  %v9157_v40 = vcombine.low %v695_v22, %v699_v24  ;;  %v232_v22 = vld [vmem:[%s14166_s1 + $0x658] sm:$0xff] }
 0x2c0   :  { %7344 = vmatpush1.bf16.msra.mxu1 %v8607_v48  ;;  %v711_v48 = vld [vmem:[%s14166_s1 + $0x1550] sm:$0xff]  ;;  %v236_v24 = vld [vmem:[%s14166_s1 + $0x678] sm:$0xff] }
 0x2c1   :  { %7345 = vmatprep.subr.bf16.mxu1 %v8616_v46  ;;  %v8655_v46 = vcombine.low %v192_v33, %v196_v34  ;;  %v8696_v33 = vcombine.high %v232_v22, %v236_v24 }
 0x2c2   :  { %7180 = vmatpush1.bf16.msra.mxu0 %v9117_v53  ;;  %v715_v53 = vld [vmem:[%s14166_s1 + $0x1570] sm:$0xff] }
 0x2c3   :  { %7181 = vmatprep.subr.bf16.mxu0 %v9126_v50  ;;  %v9174_v54 = vcombine.high %v711_v48, %v715_v53 }
 0x2c4   :  { %7346 = vmatpush1.bf16.msra.mxu1 %v8615_v58  ;;  %v719_v58 = vld [vmem:[%s14166_s1 + $0x1590] sm:$0xff] }
 0x2c5   :  { %7356 = vmatprep.subr.bf16.mxu1 %v8624_v60  ;;  %v8663_v60 = vcombine.low %v200_v11, %v204_v45 }
 0x2c6   :  { %7182 = vmatpush1.bf16.msra.mxu0 %v9125_v59  ;;  %v723_v59 = vld [vmem:[%s14166_s1 + $0x15b0] sm:$0xff] }
 0x2c7   :  { %7192 = vmatprep.subr.bf16.mxu0 %v9134_v62  ;;  %7348 = vmatmul.mubr.bf16.vlgmr.msra.gmra.mrb[8].mxu1 %v10672_v28  ;;  %v184_v28 = vld [vmem:[%s14166_s1 + $0x4d8] sm:$0xff]  ;;  %v9173_v62 = vcombine.low %v711_v48, %v715_v53  ;;  %v9182_v2 = vcombine.high %v719_v58, %v723_v59 }
 0x2c8   :  { %7357 = vmatpush1.bf16.msra.mxu1 %v8623_v6  ;;  %7388 = vmatprep.mubr.bf16.mxu1 %v10698_v38  ;;  %v8648_v29 = vcombine.high %v184_v28, %v188_v21  ;;  %v703_v38 = vld [vmem:[%s14166_s1 + $0x1510] sm:$0xff]  ;;  %v8647_v36 = vcombine.low %v184_v28, %v188_v21  ;;  %v8688_v28 = vcombine.high %v224_v63, %v228_v15  ;;  %v248_v48 = vld [vmem:[%s14166_s1 + $0x6d8] sm:$0xff] }
 0x2c9   :  { %7184 = vmatmul.mubr.bf16.vlgmr.msra.gmra.mrb[4].mxu0 %v11108_v23  ;;  %7358 = vmatprep.subr.bf16.mxu1 %v8632_v9  ;;  %v9166_v31 = vcombine.high %v703_v38, %v707_v35  ;;  %v9165_v50 = vcombine.low %v703_v38, %v707_v35  ;;  %v727_v6 = vld [vmem:[%s14166_s1 + $0x15d0] sm:$0xff]  ;;  %v8671_v9 = vcombine.low %v208_v56, %v212_v57  ;;  %v240_v38 = vld [vmem:[%s14166_s1 + $0x698] sm:$0xff] }
 0x2ca   :  { %7193 = vmatpush1.bf16.msra.mxu0 %v9133_v8  ;;  %7224 = vmatprep.mubr.bf16.mxu0 %v11118_v30  ;;  %v731_v8 = vld [vmem:[%s14166_s1 + $0x15f0] sm:$0xff]  ;;  %v244_v35 = vld [vmem:[%s14166_s1 + $0x6b8] sm:$0xff] }
 0x2cb   :  { %7194 = vmatprep.subr.bf16.mxu0 %v9142_v10  ;;  %v9181_v10 = vcombine.low %v719_v58, %v723_v59  ;;  %v9190_v13 = vcombine.high %v727_v6, %v731_v8  ;;  %v8704_v11 = vcombine.high %v240_v38, %v244_v35  ;;  %v252_v53 = vld [vmem:[%s14166_s1 + $0x6f8] sm:$0xff] }
 0x2cc   :  { %7359 = vmatpush1.bf16.msra.mxu1 %v8631_v17  ;;  %v735_v17 = vld [vmem:[%s14166_s1 + $0x1610] sm:$0xff]  ;;  %v8712_v56 = vcombine.high %v248_v48, %v252_v53  ;;  %v256_v58 = vld [vmem:[%s14166_s1 + $0x718] sm:$0xff] }
 0x2cd   :  { %7360 = vmatprep.subr.bf16.mxu1 %v8640_v5  ;;  %v8679_v5 = vcombine.low %v216_v3, %v220_v4  ;;  %v260_v59 = vld [vmem:[%s14166_s1 + $0x738] sm:$0xff] }
 0x2ce   :  { %7195 = vmatpush1.bf16.msra.mxu0 %v9141_v19  ;;  %v739_v19 = vld [vmem:[%s14166_s1 + $0x1630] sm:$0xff]  ;;  %v8720_v3 = vcombine.high %v256_v58, %v260_v59 }
 0x2cf   :  { %7196 = vmatprep.subr.bf16.mxu0 %v9150_v20  ;;  %v9189_v20 = vcombine.low %v727_v6, %v731_v8  ;;  %v9198_v21 = vcombine.high %v735_v17, %v739_v19  ;;  %v264_v6 = vld [vmem:[%s14166_s1 + $0x758] sm:$0xff] }
 0x2d0   :  { %7361 = vmatpush1.bf16.msra.mxu1 %v8639_v25  ;;  %v743_v25 = vld [vmem:[%s14166_s1 + $0x1650] sm:$0xff]  ;;  %v268_v8 = vld [vmem:[%s14166_s1 + $0x778] sm:$0xff] }
 0x2d1   :  { %7362 = vmatprep.subr.bf16.mxu1 %v8648_v29  ;;  %v8687_v29 = vcombine.low %v224_v63, %v228_v15  ;;  %v8728_v63 = vcombine.high %v264_v6, %v268_v8 }
 0x2d2   :  { %7197 = vmatpush1.bf16.msra.mxu0 %v9149_v26  ;;  %v747_v26 = vld [vmem:[%s14166_s1 + $0x1670] sm:$0xff] }
 0x2d3   :  { %7198 = vmatprep.subr.bf16.mxu0 %v9158_v41  ;;  %v9197_v41 = vcombine.low %v735_v17, %v739_v19  ;;  %v9206_v34 = vcombine.high %v743_v25, %v747_v26  ;;  %v272_v17 = vld [vmem:[%s14166_s1 + $0x798] sm:$0xff] }
 0x2d4   :  { %7363 = vmatpush1.bf16.msra.mxu1 %v8647_v36  ;;  %v751_v36 = vld [vmem:[%s14166_s1 + $0x1690] sm:$0xff]  ;;  %v276_v19 = vld [vmem:[%s14166_s1 + $0x7b8] sm:$0xff] }
 0x2d5   :  { %7364 = vmatprep.subr.bf16.mxu1 %v8656_v44  ;;  %v8695_v44 = vcombine.low %v232_v22, %v236_v24  ;;  %v8736_v22 = vcombine.high %v272_v17, %v276_v19 }
 0x2d6   :  { %7199 = vmatpush1.bf16.msra.mxu0 %v9157_v40  ;;  %v755_v40 = vld [vmem:[%s14166_s1 + $0x16b0] sm:$0xff] }
 0x2d7   :  { %7200 = vmatprep.subr.bf16.mxu0 %v9166_v31  ;;  %v9205_v31 = vcombine.low %v743_v25, %v747_v26  ;;  %v9214_v45 = vcombine.high %v751_v36, %v755_v40  ;;  %v280_v25 = vld [vmem:[%s14166_s1 + $0x7d8] sm:$0xff] }
 0x2d8   :  { %7365 = vmatpush1.bf16.msra.mxu1 %v8655_v46  ;;  %v759_v46 = vld [vmem:[%s14166_s1 + $0x16d0] sm:$0xff]  ;;  %v284_v26 = vld [vmem:[%s14166_s1 + $0x7f8] sm:$0xff] }
 0x2d9   :  { %7366 = vmatprep.subr.bf16.mxu1 %v8664_v51  ;;  %v8703_v51 = vcombine.low %v240_v38, %v244_v35  ;;  %v8744_v38 = vcombine.high %v280_v25, %v284_v26 }
 0x2da   :  { %7201 = vmatpush1.bf16.msra.mxu0 %v9165_v50  ;;  %v763_v50 = vld [vmem:[%s14166_s1 + $0x16f0] sm:$0xff] }
 0x2db   :  { %7202 = vmatprep.subr.bf16.mxu0 %v9174_v54  ;;  %v9213_v54 = vcombine.low %v751_v36, %v755_v40  ;;  %v9222_v57 = vcombine.high %v759_v46, %v763_v50  ;;  %v288_v36 = vld [vmem:[%s14166_s1 + $0x818] sm:$0xff] }
 0x2dc   :  { %7367 = vmatpush1.bf16.msra.mxu1 %v8663_v60  ;;  %v767_v60 = vld [vmem:[%s14166_s1 + $0x1710] sm:$0xff]  ;;  %v292_v40 = vld [vmem:[%s14166_s1 + $0x838] sm:$0xff] }
 0x2dd   :  { %7368 = vmatprep.subr.bf16.mxu1 %v8672_v1  ;;  %v8711_v1 = vcombine.low %v248_v48, %v252_v53  ;;  %v8752_v48 = vcombine.high %v288_v36, %v292_v40 }
 0x2de   :  { %7203 = vmatpush1.bf16.msra.mxu0 %v9173_v62  ;;  %v771_v62 = vld [vmem:[%s14166_s1 + $0x1730] sm:$0xff] }
 0x2df   :  { %7204 = vmatprep.subr.bf16.mxu0 %v9182_v2  ;;  %v9221_v2 = vcombine.low %v759_v46, %v763_v50  ;;  %v9230_v4 = vcombine.high %v767_v60, %v771_v62  ;;  %v296_v46 = vld [vmem:[%s14166_s1 + $0x858] sm:$0xff] }
 0x2e0   :  { %7369 = vmatpush1.bf16.msra.mxu1 %v8671_v9  ;;  %v775_v9 = vld [vmem:[%s14166_s1 + $0x1750] sm:$0xff]  ;;  %v300_v50 = vld [vmem:[%s14166_s1 + $0x878] sm:$0xff] }
 0x2e1   :  { %7370 = vmatprep.subr.bf16.mxu1 %v8680_v12  ;;  %v8719_v12 = vcombine.low %v256_v58, %v260_v59  ;;  %v8760_v58 = vcombine.high %v296_v46, %v300_v50 }
 0x2e2   :  { %7205 = vmatpush1.bf16.msra.mxu0 %v9181_v10  ;;  %v779_v10 = vld [vmem:[%s14166_s1 + $0x1770] sm:$0xff] }
 0x2e3   :  { %7206 = vmatprep.subr.bf16.mxu0 %v9190_v13  ;;  %v9229_v13 = vcombine.low %v767_v60, %v771_v62  ;;  %v9238_v15 = vcombine.high %v775_v9, %v779_v10  ;;  %v304_v60 = vld [vmem:[%s14166_s1 + $0x898] sm:$0xff] }
 0x2e4   :  { %7371 = vmatpush1.bf16.msra.mxu1 %v8679_v5  ;;  %v783_v5 = vld [vmem:[%s14166_s1 + $0x1790] sm:$0xff]  ;;  %v308_v62 = vld [vmem:[%s14166_s1 + $0x8b8] sm:$0xff] }
 0x2e5   :  { %7372 = vmatprep.subr.bf16.mxu1 %v8688_v28  ;;  %v8727_v28 = vcombine.low %v264_v6, %v268_v8  ;;  %v8768_v6 = vcombine.high %v304_v60, %v308_v62 }
 0x2e6   :  { %7207 = vmatpush1.bf16.msra.mxu0 %v9189_v20  ;;  %v787_v20 = vld [vmem:[%s14166_s1 + $0x17b0] sm:$0xff] }
 0x2e7   :  { %7208 = vmatprep.subr.bf16.mxu0 %v9198_v21  ;;  %v9237_v21 = vcombine.low %v775_v9, %v779_v10  ;;  %v9246_v24 = vcombine.high %v783_v5, %v787_v20  ;;  %v316_v9 = vld [vmem:[%s14166_s1 + $0x8f8] sm:$0xff]  ;;  %v823_v10 = vld [vmem:[%s14166_s1 + $0x18d0] sm:$0xff] }
 0x2e8   :  { %7373 = vmatpush1.bf16.msra.mxu1 %v8687_v29  ;;  %v791_v29 = vld [vmem:[%s14166_s1 + $0x17d0] sm:$0xff] }
 0x2e9   :  { %7374 = vmatprep.subr.bf16.mxu1 %v8696_v33  ;;  %v8735_v33 = vcombine.low %v272_v17, %v276_v19  ;;  %v320_v19 = vld [vmem:[%s14166_s1 + $0x918] sm:$0xff] }
 0x2ea   :  { %7209 = vmatpush1.bf16.msra.mxu0 %v9197_v41  ;;  %v795_v41 = vld [vmem:[%s14166_s1 + $0x17f0] sm:$0xff] }
 0x2eb   :  { %7210 = vmatprep.subr.bf16.mxu0 %v9206_v34  ;;  %v9245_v34 = vcombine.low %v783_v5, %v787_v20  ;;  %v9254_v35 = vcombine.high %v791_v29, %v795_v41  ;;  %v324_v5 = vld [vmem:[%s14166_s1 + $0x938] sm:$0xff]  ;;  %v835_v20 = vld [vmem:[%s14166_s1 + $0x1930] sm:$0xff] }
 0x2ec   :  { %7375 = vmatpush1.bf16.msra.mxu1 %v8695_v44  ;;  %v799_v44 = vld [vmem:[%s14166_s1 + $0x1810] sm:$0xff] }
 0x2ed   :  { %7376 = vmatprep.subr.bf16.mxu1 %v8704_v11  ;;  %v8743_v11 = vcombine.low %v280_v25, %v284_v26  ;;  %v328_v25 = vld [vmem:[%s14166_s1 + $0x958] sm:$0xff] }
 0x2ee   :  { %7211 = vmatpush1.bf16.msra.mxu0 %v9205_v31  ;;  %v803_v31 = vld [vmem:[%s14166_s1 + $0x1830] sm:$0xff]  ;;  %v332_v26 = vld [vmem:[%s14166_s1 + $0x978] sm:$0xff] }
 0x2ef   :  { %7212 = vmatprep.subr.bf16.mxu0 %v9214_v45  ;;  %v9253_v45 = vcombine.low %v791_v29, %v795_v41  ;;  %v9262_v53 = vcombine.high %v799_v44, %v803_v31  ;;  %v839_v29 = vld [vmem:[%s14166_s1 + $0x1950] sm:$0xff] }
 0x2f0   :  { %7377 = vmatpush1.bf16.msra.mxu1 %v8703_v51  ;;  %v807_v51 = vld [vmem:[%s14166_s1 + $0x1850] sm:$0xff] }
 0x2f1   :  { %7378 = vmatprep.subr.bf16.mxu1 %v8712_v56  ;;  %v8751_v56 = vcombine.low %v288_v36, %v292_v40  ;;  %v843_v41 = vld [vmem:[%s14166_s1 + $0x1970] sm:$0xff]  ;;  %v336_v36 = vld [vmem:[%s14166_s1 + $0x998] sm:$0xff] }
 0x2f2   :  { %7213 = vmatpush1.bf16.msra.mxu0 %v9213_v54  ;;  %v811_v54 = vld [vmem:[%s14166_s1 + $0x1870] sm:$0xff]  ;;  %v340_v40 = vld [vmem:[%s14166_s1 + $0x9b8] sm:$0xff] }
 0x2f3   :  { %7214 = vmatprep.subr.bf16.mxu0 %v9222_v57  ;;  %v9261_v57 = vcombine.low %v799_v44, %v803_v31  ;;  %v9270_v59 = vcombine.high %v807_v51, %v811_v54  ;;  %v847_v44 = vld [vmem:[%s14166_s1 + $0x1990] sm:$0xff] }
 0x2f4   :  { %7379 = vmatpush1.bf16.msra.mxu1 %v8711_v1  ;;  %v815_v1 = vld [vmem:[%s14166_s1 + $0x1890] sm:$0xff] }
 0x2f5   :  { %7380 = vmatprep.subr.bf16.mxu1 %v8720_v3  ;;  %v8759_v3 = vcombine.low %v296_v46, %v300_v50  ;;  %v851_v31 = vld [vmem:[%s14166_s1 + $0x19b0] sm:$0xff]  ;;  %v344_v46 = vld [vmem:[%s14166_s1 + $0x9d8] sm:$0xff] }
 0x2f6   :  { %7215 = vmatpush1.bf16.msra.mxu0 %v9221_v2  ;;  %v819_v2 = vld [vmem:[%s14166_s1 + $0x18b0] sm:$0xff]  ;;  %v348_v50 = vld [vmem:[%s14166_s1 + $0x9f8] sm:$0xff] }
 0x2f7   :  { %7216 = vmatprep.subr.bf16.mxu0 %v9230_v4  ;;  %v9269_v4 = vcombine.low %v807_v51, %v811_v54  ;;  %v9278_v8 = vcombine.high %v815_v1, %v819_v2  ;;  %v855_v51 = vld [vmem:[%s14166_s1 + $0x19d0] sm:$0xff] }
 0x2f8   :  { %7381 = vmatpush1.bf16.msra.mxu1 %v8719_v12  ;;  %v827_v12 = vld [vmem:[%s14166_s1 + $0x18f0] sm:$0xff] }
 0x2f9   :  { %7382 = vmatprep.subr.bf16.mxu1 %v8728_v63  ;;  %v9277_v63 = vcombine.low %v815_v1, %v819_v2  ;;  %v9286_v17 = vcombine.high %v823_v10, %v827_v12  ;;  %v859_v54 = vld [vmem:[%s14166_s1 + $0x19f0] sm:$0xff] }
 0x2fa   :  { %7217 = vmatpush1.bf16.msra.mxu0 %v9229_v13  ;;  %v8767_v13 = vcombine.low %v304_v60, %v308_v62  ;;  %v352_v60 = vld [vmem:[%s14166_s1 + $0xa18] sm:$0xff]  ;;  %v863_v1 = vld [vmem:[%s14166_s1 + $0x1a10] sm:$0xff] }
 0x2fb   :  { %7218 = vmatprep.subr.bf16.mxu0 %v9238_v15  ;;  %v356_v62 = vld [vmem:[%s14166_s1 + $0xa38] sm:$0xff]  ;;  %v867_v2 = vld [vmem:[%s14166_s1 + $0x1a30] sm:$0xff] }
 0x2fc   :  { %7383 = vmatpush1.bf16.msra.mxu1 %v8727_v28 }
 0x2fd   :  { %7384 = vmatprep.subr.bf16.mxu1 %v8736_v22  ;;  %v8784_v22 = vcombine.high %v320_v19, %v324_v5 }
 0x2fe   :  { %7219 = vmatpush1.bf16.msra.mxu0 %v9237_v21  ;;  %v9285_v21 = vcombine.low %v823_v10, %v827_v12  ;;  %v871_v10 = vld [vmem:[%s14166_s1 + $0x1a50] sm:$0xff] }
 0x2ff   :  { %7220 = vmatprep.subr.bf16.mxu0 %v9246_v24  ;;  %v875_v12 = vld [vmem:[%s14166_s1 + $0x1a70] sm:$0xff] }
 0x300   :  { %7385 = vmatpush1.bf16.msra.mxu1 %v8735_v33  ;;  %v8783_v33 = vcombine.low %v320_v19, %v324_v5  ;;  %v368_v19 = vld [vmem:[%s14166_s1 + $0xa98] sm:$0xff] }
 0x301   :  { %7386 = vmatprep.subr.bf16.mxu1 %v8744_v38  ;;  %v8792_v38 = vcombine.high %v328_v25, %v332_v26  ;;  %v372_v5 = vld [vmem:[%s14166_s1 + $0xab8] sm:$0xff] }
 0x302   :  { %7221 = vmatpush1.bf16.msra.mxu0 %v9245_v34 }
 0x303   :  { %7222 = vmatprep.subr.bf16.mxu0 %v9254_v35  ;;  %v9302_v35 = vcombine.high %v839_v29, %v843_v41 }
 0x304   :  { %7387 = vmatpush1.bf16.msra.mxu1 %v8743_v11  ;;  %v8791_v11 = vcombine.low %v328_v25, %v332_v26  ;;  %v376_v25 = vld [vmem:[%s14166_s1 + $0xad8] sm:$0xff] }
 0x305   :  { %7397 = vmatprep.subr.bf16.mxu1 %v8752_v48  ;;  %v8800_v48 = vcombine.high %v336_v36, %v340_v40  ;;  %v380_v26 = vld [vmem:[%s14166_s1 + $0xaf8] sm:$0xff] }
 0x306   :  { %7223 = vmatpush1.bf16.msra.mxu0 %v9253_v45  ;;  %v9301_v45 = vcombine.low %v839_v29, %v843_v41  ;;  %v887_v29 = vld [vmem:[%s14166_s1 + $0x1ad0] sm:$0xff] }
 0x307   :  { %7233 = vmatprep.subr.bf16.mxu0 %v9262_v53  ;;  %7389 = vmatmul.mubr.bf16.vlgmr.msra.gmra.mrb[8].mxu1 %v10901_v52  ;;  %v312_v52 = vld [vmem:[%s14166_s1 + $0x8d8] sm:$0xff]  ;;  %v9310_v53 = vcombine.high %v847_v44, %v851_v31  ;;  %v891_v41 = vld [vmem:[%s14166_s1 + $0x1af0] sm:$0xff] }
 0x308   :  { %7398 = vmatpush1.bf16.msra.mxu1 %v8751_v56  ;;  %7429 = vmatprep.mubr.bf16.mxu1 %v10565_v16  ;;  %v8776_v15 = vcombine.high %v312_v52, %v316_v9  ;;  %v831_v16 = vld [vmem:[%s14166_s1 + $0x1910] sm:$0xff]  ;;  %v8775_v28 = vcombine.low %v312_v52, %v316_v9  ;;  %v8799_v56 = vcombine.low %v336_v36, %v340_v40  ;;  %v360_v52 = vld [vmem:[%s14166_s1 + $0xa58] sm:$0xff] }
 0x309   :  { %7225 = vmatmul.mubr.bf16.vlgmr.msra.gmra.mrb[4].mxu0 %v11319_v0  ;;  %7399 = vmatprep.subr.bf16.mxu1 %v8760_v58  ;;  %v9294_v24 = vcombine.high %v831_v16, %v835_v20  ;;  %v9293_v34 = vcombine.low %v831_v16, %v835_v20  ;;  %v8808_v58 = vcombine.high %v344_v46, %v348_v50  ;;  %v364_v9 = vld [vmem:[%s14166_s1 + $0xa78] sm:$0xff]  ;;  %v879_v16 = vld [vmem:[%s14166_s1 + $0x1a90] sm:$0xff] }
 0x30a   :  { %7234 = vmatpush1.bf16.msra.mxu0 %v9261_v57  ;;  %7265 = vmatprep.mubr.bf16.mxu0 %v11328_v7  ;;  %v9309_v57 = vcombine.low %v847_v44, %v851_v31  ;;  %v883_v20 = vld [vmem:[%s14166_s1 + $0x1ab0] sm:$0xff]  ;;  %v384_v36 = vld [vmem:[%s14166_s1 + $0xb18] sm:$0xff] }
 0x30b   :  { %7235 = vmatprep.subr.bf16.mxu0 %v9270_v59  ;;  %v9318_v59 = vcombine.high %v855_v51, %v859_v54  ;;  %v388_v40 = vld [vmem:[%s14166_s1 + $0xb38] sm:$0xff]  ;;  %v895_v44 = vld [vmem:[%s14166_s1 + $0x1b10] sm:$0xff] }
 0x30c   :  { %7400 = vmatpush1.bf16.msra.mxu1 %v8759_v3  ;;  %v8807_v3 = vcombine.low %v344_v46, %v348_v50  ;;  %v899_v31 = vld [vmem:[%s14166_s1 + $0x1b30] sm:$0xff]  ;;  %v392_v46 = vld [vmem:[%s14166_s1 + $0xb58] sm:$0xff] }
 0x30d   :  { %7401 = vmatprep.subr.bf16.mxu1 %v8768_v6  ;;  %v8816_v6 = vcombine.high %v352_v60, %v356_v62  ;;  %v396_v50 = vld [vmem:[%s14166_s1 + $0xb78] sm:$0xff] }
 0x30e   :  { %7236 = vmatpush1.bf16.msra.mxu0 %v9269_v4  ;;  %v9317_v4 = vcombine.low %v855_v51, %v859_v54  ;;  %v903_v51 = vld [vmem:[%s14166_s1 + $0x1b50] sm:$0xff] }
 0x30f   :  { %7237 = vmatprep.subr.bf16.mxu0 %v9278_v8  ;;  %v9326_v8 = vcombine.high %v863_v1, %v867_v2  ;;  %v907_v54 = vld [vmem:[%s14166_s1 + $0x1b70] sm:$0xff] }
 0x310   :  { %7402 = vmatpush1.bf16.msra.mxu1 %v8767_v13  ;;  %v8815_v13 = vcombine.low %v352_v60, %v356_v62  ;;  %v400_v60 = vld [vmem:[%s14166_s1 + $0xb98] sm:$0xff] }
 0x311   :  { %7403 = vmatprep.subr.bf16.mxu1 %v8776_v15  ;;  %v8824_v15 = vcombine.high %v360_v52, %v364_v9  ;;  %v404_v62 = vld [vmem:[%s14166_s1 + $0xbb8] sm:$0xff] }
 0x312   :  { %7238 = vmatpush1.bf16.msra.mxu0 %v9277_v63  ;;  %v9325_v63 = vcombine.low %v863_v1, %v867_v2  ;;  %v911_v1 = vld [vmem:[%s14166_s1 + $0x1b90] sm:$0xff] }
 0x313   :  { %7239 = vmatprep.subr.bf16.mxu0 %v9286_v17  ;;  %v9334_v17 = vcombine.high %v871_v10, %v875_v12  ;;  %v915_v2 = vld [vmem:[%s14166_s1 + $0x1bb0] sm:$0xff] }
 0x314   :  { %7404 = vmatpush1.bf16.msra.mxu1 %v8775_v28  ;;  %v8823_v28 = vcombine.low %v360_v52, %v364_v9  ;;  %v408_v52 = vld [vmem:[%s14166_s1 + $0xbd8] sm:$0xff] }
 0x315   :  { %7405 = vmatprep.subr.bf16.mxu1 %v8784_v22  ;;  %v8832_v22 = vcombine.high %v368_v19, %v372_v5  ;;  %v412_v9 = vld [vmem:[%s14166_s1 + $0xbf8] sm:$0xff] }
 0x316   :  { %7240 = vmatpush1.bf16.msra.mxu0 %v9285_v21  ;;  %v9333_v21 = vcombine.low %v871_v10, %v875_v12  ;;  %v919_v10 = vld [vmem:[%s14166_s1 + $0x1bd0] sm:$0xff] }
 0x317   :  { %7241 = vmatprep.subr.bf16.mxu0 %v9294_v24  ;;  %v9342_v24 = vcombine.high %v879_v16, %v883_v20  ;;  %v923_v12 = vld [vmem:[%s14166_s1 + $0x1bf0] sm:$0xff] }
 0x318   :  { %7406 = vmatpush1.bf16.msra.mxu1 %v8783_v33  ;;  %v8831_v33 = vcombine.low %v368_v19, %v372_v5  ;;  %v416_v19 = vld [vmem:[%s14166_s1 + $0xc18] sm:$0xff] }
 0x319   :  { %7407 = vmatprep.subr.bf16.mxu1 %v8792_v38  ;;  %v8840_v38 = vcombine.high %v376_v25, %v380_v26  ;;  %v420_v5 = vld [vmem:[%s14166_s1 + $0xc38] sm:$0xff] }
 0x31a   :  { %7242 = vmatpush1.bf16.msra.mxu0 %v9293_v34  ;;  %v9341_v34 = vcombine.low %v879_v16, %v883_v20  ;;  %v927_v16 = vld [vmem:[%s14166_s1 + $0x1c10] sm:$0xff] }
 0x31b   :  { %7243 = vmatprep.subr.bf16.mxu0 %v9302_v35  ;;  %v9350_v35 = vcombine.high %v887_v29, %v891_v41  ;;  %v931_v20 = vld [vmem:[%s14166_s1 + $0x1c30] sm:$0xff] }
 0x31c   :  { %7408 = vmatpush1.bf16.msra.mxu1 %v8791_v11  ;;  %v8839_v11 = vcombine.low %v376_v25, %v380_v26  ;;  %v424_v25 = vld [vmem:[%s14166_s1 + $0xc58] sm:$0xff] }
 0x31d   :  { %7409 = vmatprep.subr.bf16.mxu1 %v8800_v48  ;;  %v8848_v48 = vcombine.high %v384_v36, %v388_v40  ;;  %v428_v26 = vld [vmem:[%s14166_s1 + $0xc78] sm:$0xff] }
 0x31e   :  { %7244 = vmatpush1.bf16.msra.mxu0 %v9301_v45  ;;  %v9349_v45 = vcombine.low %v887_v29, %v891_v41  ;;  %v935_v29 = vld [vmem:[%s14166_s1 + $0x1c50] sm:$0xff] }
 0x31f   :  { %7245 = vmatprep.subr.bf16.mxu0 %v9310_v53  ;;  %v9358_v53 = vcombine.high %v895_v44, %v899_v31  ;;  %v939_v41 = vld [vmem:[%s14166_s1 + $0x1c70] sm:$0xff] }
 0x320   :  { %7410 = vmatpush1.bf16.msra.mxu1 %v8799_v56  ;;  %v8847_v56 = vcombine.low %v384_v36, %v388_v40  ;;  %v432_v36 = vld [vmem:[%s14166_s1 + $0xc98] sm:$0xff] }
 0x321   :  { %7411 = vmatprep.subr.bf16.mxu1 %v8808_v58  ;;  %v8856_v58 = vcombine.high %v392_v46, %v396_v50  ;;  %v436_v40 = vld [vmem:[%s14166_s1 + $0xcb8] sm:$0xff] }
 0x322   :  { %7246 = vmatpush1.bf16.msra.mxu0 %v9309_v57  ;;  %v9357_v57 = vcombine.low %v895_v44, %v899_v31  ;;  %v943_v44 = vld [vmem:[%s14166_s1 + $0x1c90] sm:$0xff] }
 0x323   :  { %7247 = vmatprep.subr.bf16.mxu0 %v9318_v59  ;;  %v9366_v59 = vcombine.high %v903_v51, %v907_v54  ;;  %v947_v31 = vld [vmem:[%s14166_s1 + $0x1cb0] sm:$0xff] }
 0x324   :  { %7412 = vmatpush1.bf16.msra.mxu1 %v8807_v3  ;;  %v8855_v3 = vcombine.low %v392_v46, %v396_v50  ;;  %v444_v46 = vld [vmem:[%s14166_s1 + $0xcf8] sm:$0xff]  ;;  %v951_v50 = vld [vmem:[%s14166_s1 + $0x1cd0] sm:$0xff] }
 0x325   :  { %7413 = vmatprep.subr.bf16.mxu1 %v8816_v6  ;;  %v8864_v6 = vcombine.high %v400_v60, %v404_v62 }
 0x326   :  { %7248 = vmatpush1.bf16.msra.mxu0 %v9317_v4  ;;  %v9365_v4 = vcombine.low %v903_v51, %v907_v54  ;;  %v955_v51 = vld [vmem:[%s14166_s1 + $0x1cf0] sm:$0xff]  ;;  %v8895_v54 = vcombine.low %v432_v36, %v436_v40 }
 0x327   :  { %7249 = vmatprep.subr.bf16.mxu0 %v9326_v8  ;;  %v9374_v8 = vcombine.high %v911_v1, %v915_v2 }
 0x328   :  { %7414 = vmatpush1.bf16.msra.mxu1 %v8815_v13  ;;  %v8863_v13 = vcombine.low %v400_v60, %v404_v62  ;;  %v452_v60 = vld [vmem:[%s14166_s1 + $0xd38] sm:$0xff]  ;;  %v963_v62 = vld [vmem:[%s14166_s1 + $0x1d30] sm:$0xff] }
 0x329   :  { %7415 = vmatprep.subr.bf16.mxu1 %v8824_v15  ;;  %v8872_v15 = vcombine.high %v408_v52, %v412_v9 }
 0x32a   :  { %7250 = vmatpush1.bf16.msra.mxu0 %v9325_v63  ;;  %v9373_v63 = vcombine.low %v911_v1, %v915_v2  ;;  %v9413_v2 = vcombine.low %v951_v50, %v955_v51 }
 0x32b   :  { %7251 = vmatprep.subr.bf16.mxu0 %v9334_v17  ;;  %v9382_v17 = vcombine.high %v919_v10, %v923_v12 }
 0x32c   :  { %7416 = vmatpush1.bf16.msra.mxu1 %v8823_v28  ;;  %v8871_v28 = vcombine.low %v408_v52, %v412_v9  ;;  %v967_v52 = vld [vmem:[%s14166_s1 + $0x1d50] sm:$0xff] }
 0x32d   :  { %7417 = vmatprep.subr.bf16.mxu1 %v8832_v22  ;;  %v8880_v22 = vcombine.high %v416_v19, %v420_v5  ;;  %v971_v9 = vld [vmem:[%s14166_s1 + $0x1d70] sm:$0xff] }
 0x32e   :  { %7252 = vmatpush1.bf16.msra.mxu0 %v9333_v21  ;;  %v9381_v21 = vcombine.low %v919_v10, %v923_v12 }
 0x32f   :  { %7253 = vmatprep.subr.bf16.mxu0 %v9342_v24  ;;  %v9390_v24 = vcombine.high %v927_v16, %v931_v20 }
 0x330   :  { %7418 = vmatpush1.bf16.msra.mxu1 %v8831_v33  ;;  %v8879_v33 = vcombine.low %v416_v19, %v420_v5  ;;  %v975_v19 = vld [vmem:[%s14166_s1 + $0x1d90] sm:$0xff] }
 0x331   :  { %7419 = vmatprep.subr.bf16.mxu1 %v8840_v38  ;;  %v8888_v38 = vcombine.high %v424_v25, %v428_v26  ;;  %v979_v5 = vld [vmem:[%s14166_s1 + $0x1db0] sm:$0xff] }
 0x332   :  { %7254 = vmatpush1.bf16.msra.mxu0 %v9341_v34  ;;  %v9389_v34 = vcombine.low %v927_v16, %v931_v20  ;;  %v9429_v20 = vcombine.low %v967_v52, %v971_v9 }
 0x333   :  { %7255 = vmatprep.subr.bf16.mxu0 %v9350_v35  ;;  %v9398_v35 = vcombine.high %v935_v29, %v939_v41 }
 0x334   :  { %7420 = vmatpush1.bf16.msra.mxu1 %v8839_v11  ;;  %v8887_v11 = vcombine.low %v424_v25, %v428_v26  ;;  %v476_v25 = vld [vmem:[%s14166_s1 + $0xdf8] sm:$0xff] }
 0x335   :  { %7421 = vmatprep.subr.bf16.mxu1 %v8848_v48  ;;  %v8896_v48 = vcombine.high %v432_v36, %v436_v40 }
 0x336   :  { %7256 = vmatpush1.bf16.msra.mxu0 %v9349_v45  ;;  %v9397_v45 = vcombine.low %v935_v29, %v939_v41  ;;  %v983_v29 = vld [vmem:[%s14166_s1 + $0x1dd0] sm:$0xff] }
 0x337   :  { %7257 = vmatprep.subr.bf16.mxu0 %v9358_v53  ;;  %v9406_v53 = vcombine.high %v943_v44, %v947_v31  ;;  %v987_v41 = vld [vmem:[%s14166_s1 + $0x1df0] sm:$0xff] }
 0x338   :  { %7422 = vmatpush1.bf16.msra.mxu1 %v8847_v56  ;;  %v9405_v56 = vcombine.low %v943_v44, %v947_v31  ;;  %v9446_v40 = vcombine.high %v983_v29, %v987_v41  ;;  %v480_v44 = vld [vmem:[%s14166_s1 + $0xe18] sm:$0xff] }
 0x339   :  { %7423 = vmatprep.subr.bf16.mxu1 %v8856_v58  ;;  %v9414_v58 = vcombine.high %v951_v50, %v955_v51  ;;  %v484_v31 = vld [vmem:[%s14166_s1 + $0xe38] sm:$0xff] }
 0x33a   :  { %7258 = vmatpush1.bf16.msra.mxu0 %v9357_v57  ;;  %v488_v50 = vld [vmem:[%s14166_s1 + $0xe58] sm:$0xff] }
 0x33b   :  { %7259 = vmatprep.subr.bf16.mxu0 %v9366_v59  ;;  %v448_v59 = vld [vmem:[%s14166_s1 + $0xd18] sm:$0xff] }
 0x33c   :  { %7424 = vmatpush1.bf16.msra.mxu1 %v8855_v3  ;;  %v8912_v3 = vcombine.high %v448_v59, %v452_v60  ;;  %v8911_v10 = vcombine.low %v448_v59, %v452_v60  ;;  %v492_v51 = vld [vmem:[%s14166_s1 + $0xe78] sm:$0xff] }
 0x33d   :  { %7425 = vmatprep.subr.bf16.mxu1 %v8864_v6  ;;  %v456_v6 = vld [vmem:[%s14166_s1 + $0xd58] sm:$0xff]  ;;  %v8952_v59 = vcombine.high %v488_v50, %v492_v51 }
 0x33e   :  { %7260 = vmatpush1.bf16.msra.mxu0 %v9365_v4 }
 0x33f   :  { %7261 = vmatprep.subr.bf16.mxu0 %v9374_v8  ;;  %v460_v8 = vld [vmem:[%s14166_s1 + $0xd78] sm:$0xff] }
 0x340   :  { %7426 = vmatpush1.bf16.msra.mxu1 %v8863_v13  ;;  %v8920_v13 = vcombine.high %v456_v6, %v460_v8  ;;  %v8919_v16 = vcombine.low %v456_v6, %v460_v8 }
 0x341   :  { %7427 = vmatprep.subr.bf16.mxu1 %v8872_v15  ;;  %v464_v15 = vld [vmem:[%s14166_s1 + $0xd98] sm:$0xff] }
 0x342   :  { %7262 = vmatpush1.bf16.msra.mxu0 %v9373_v63  ;;  %v9430_v63 = vcombine.high %v967_v52, %v971_v9  ;;  %v504_v52 = vld [vmem:[%s14166_s1 + $0xed8] sm:$0xff] }
 0x343   :  { %7263 = vmatprep.subr.bf16.mxu0 %v9382_v17  ;;  %v468_v17 = vld [vmem:[%s14166_s1 + $0xdb8] sm:$0xff] }
 0x344   :  { %7428 = vmatpush1.bf16.msra.mxu1 %v8871_v28  ;;  %v8928_v28 = vcombine.high %v464_v15, %v468_v17  ;;  %v508_v9 = vld [vmem:[%s14166_s1 + $0xef8] sm:$0xff] }
 0x345   :  { %7438 = vmatprep.subr.bf16.mxu1 %v8880_v22  ;;  %v9438_v22 = vcombine.high %v975_v19, %v979_v5 }
 0x346   :  { %7264 = vmatpush1.bf16.msra.mxu0 %v9381_v21 }
 0x347   :  { %7274 = vmatprep.subr.bf16.mxu0 %v9390_v24  ;;  %7430 = vmatmul.mubr.bf16.vlgmr.msra.gmra.mrb[8].mxu1 %v10682_v32  ;;  %v440_v32 = vld [vmem:[%s14166_s1 + $0xcd8] sm:$0xff] }
 0x348   :  { %7439 = vmatpush1.bf16.msra.mxu1 %v8879_v33  ;;  %7470 = vmatprep.mubr.bf16.mxu1 %v10703_v39  ;;  %v8904_v57 = vcombine.high %v440_v32, %v444_v46  ;;  %v959_v39 = vld [vmem:[%s14166_s1 + $0x1d10] sm:$0xff]  ;;  %v8903_v1 = vcombine.low %v440_v32, %v444_v46  ;;  %v472_v24 = vld [vmem:[%s14166_s1 + $0xdd8] sm:$0xff]  ;;  %v8944_v32 = vcombine.high %v480_v44, %v484_v31 }
 0x349   :  { %7266 = vmatmul.mubr.bf16.vlgmr.msra.gmra.mrb[4].mxu0 %v11522_v42  ;;  %7440 = vmatprep.subr.bf16.mxu1 %v8888_v38  ;;  %v9422_v4 = vcombine.high %v959_v39, %v963_v62  ;;  %v9421_v12 = vcombine.low %v959_v39, %v963_v62  ;;  %v8936_v36 = vcombine.high %v472_v24, %v476_v25  ;;  %v496_v39 = vld [vmem:[%s14166_s1 + $0xe98] sm:$0xff] }
 0x34a   :  { %7275 = vmatpush1.bf16.msra.mxu0 %v9389_v34  ;;  %7306 = vmatprep.mubr.bf16.mxu0 %v11532_v49  ;;  %v8927_v34 = vcombine.low %v464_v15, %v468_v17  ;;  %v500_v62 = vld [vmem:[%s14166_s1 + $0xeb8] sm:$0xff]  ;;  %v8968_v15 = vcombine.high %v504_v52, %v508_v9 }
 0x34b   :  { %7276 = vmatprep.subr.bf16.mxu0 %v9398_v35  ;;  %v9437_v35 = vcombine.low %v975_v19, %v979_v5  ;;  %v8960_v6 = vcombine.high %v496_v39, %v500_v62  ;;  %v512_v19 = vld [vmem:[%s14166_s1 + $0xf18] sm:$0xff] }
 0x34c   :  { %7441 = vmatpush1.bf16.msra.mxu1 %v8887_v11  ;;  %v991_v11 = vld [vmem:[%s14166_s1 + $0x1e10] sm:$0xff]  ;;  %v516_v5 = vld [vmem:[%s14166_s1 + $0xf38] sm:$0xff] }
 0x34d   :  { %7442 = vmatprep.subr.bf16.mxu1 %v8896_v48  ;;  %v8935_v48 = vcombine.low %v472_v24, %v476_v25  ;;  %v8976_v24 = vcombine.high %v512_v19, %v516_v5 }
 0x34e   :  { %7277 = vmatpush1.bf16.msra.mxu0 %v9397_v45  ;;  %v995_v45 = vld [vmem:[%s14166_s1 + $0x1e30] sm:$0xff] }
 0x34f   :  { %7278 = vmatprep.subr.bf16.mxu0 %v9406_v53  ;;  %v9445_v53 = vcombine.low %v983_v29, %v987_v41  ;;  %v9454_v46 = vcombine.high %v991_v11, %v995_v45  ;;  %v520_v29 = vld [vmem:[%s14166_s1 + $0xf58] sm:$0xff] }
 0x350   :  { %7443 = vmatpush1.bf16.msra.mxu1 %v8895_v54  ;;  %v999_v54 = vld [vmem:[%s14166_s1 + $0x1e50] sm:$0xff]  ;;  %v524_v41 = vld [vmem:[%s14166_s1 + $0xf78] sm:$0xff] }
 0x351   :  { %7444 = vmatprep.subr.bf16.mxu1 %v8904_v57  ;;  %v8943_v57 = vcombine.low %v480_v44, %v484_v31  ;;  %v528_v44 = vld [vmem:[%s14166_s1 + $0xf98] sm:$0xff] }
 0x352   :  { %7279 = vmatpush1.bf16.msra.mxu0 %v9405_v56  ;;  %v1003_v56 = vld [vmem:[%s14166_s1 + $0x1e70] sm:$0xff]  ;;  %v532_v31 = vld [vmem:[%s14166_s1 + $0xfb8] sm:$0xff] }
 0x353   :  { %7280 = vmatprep.subr.bf16.mxu0 %v9414_v58  ;;  %v9453_v58 = vcombine.low %v991_v11, %v995_v45  ;;  %v9462_v60 = vcombine.high %v999_v54, %v1003_v56  ;;  %v1039_v11 = vld [vmem:[%s14166_s1 + $0x1f90] sm:$0xff] }
 0x354   :  { %7445 = vmatpush1.bf16.msra.mxu1 %v8903_v1  ;;  %v1007_v1 = vld [vmem:[%s14166_s1 + $0x1e90] sm:$0xff] }
 0x355   :  { %7446 = vmatprep.subr.bf16.mxu1 %v8912_v3  ;;  %v8951_v3 = vcombine.low %v488_v50, %v492_v51  ;;  %v1043_v45 = vld [vmem:[%s14166_s1 + $0x1fb0] sm:$0xff]  ;;  %v536_v50 = vld [vmem:[%s14166_s1 + $0xfd8] sm:$0xff] }
 0x356   :  { %7281 = vmatpush1.bf16.msra.mxu0 %v9413_v2  ;;  %v1011_v2 = vld [vmem:[%s14166_s1 + $0x1eb0] sm:$0xff]  ;;  %v540_v51 = vld [vmem:[%s14166_s1 + $0xff8] sm:$0xff] }
 0x357   :  { %7282 = vmatprep.subr.bf16.mxu0 %v9422_v4  ;;  %v9461_v4 = vcombine.low %v999_v54, %v1003_v56  ;;  %v9470_v8 = vcombine.high %v1007_v1, %v1011_v2  ;;  %v1047_v54 = vld [vmem:[%s14166_s1 + $0x1fd0] sm:$0xff] }
 0x358   :  { %7447 = vmatpush1.bf16.msra.mxu1 %v8911_v10  ;;  %v1015_v10 = vld [vmem:[%s14166_s1 + $0x1ed0] sm:$0xff] }
 0x359   :  { %7448 = vmatprep.subr.bf16.mxu1 %v8920_v13  ;;  %v8959_v13 = vcombine.low %v496_v39, %v500_v62  ;;  %v1051_v56 = vld [vmem:[%s14166_s1 + $0x1ff0] sm:$0xff]  ;;  %v544_v39 = vld [vmem:[%s14166_s1 + $0x1018] sm:$0xff] }
 0x35a   :  { %7283 = vmatpush1.bf16.msra.mxu0 %v9421_v12  ;;  %v13183_v21 = vpop.f32.mrb[4].mxu1  ;;  %v1019_v12 = vld [vmem:[%s14166_s1 + $0x1ef0] sm:$0xff]  ;;  %v548_v62 = vld [vmem:[%s14166_s1 + $0x1038] sm:$0xff] }
 0x35b   :  { %7284 = vmatprep.subr.bf16.mxu0 %v9430_v63  ;;  %v13191_v26 = vpop.f32.mrb[5].mxu1  ;;  %v9469_v63 = vcombine.low %v1007_v1, %v1011_v2  ;;  %v9478_v17 = vcombine.high %v1015_v10, %v1019_v12  ;;  %v8999_v1 = vcombine.low %v536_v50, %v540_v51  ;;  %v9509_v2 = vcombine.low %v1047_v54, %v1051_v56 }
 0x35c   :  { %v6984_v33 = vpop.f32.mrb[6].mxu1  ;;  %7449 = vmatpush1.bf16.msra.mxu1 %v8919_v16  ;;  %v1023_v16 = vld [vmem:[%s14166_s1 + $0x1f10] sm:$0xff] }
 0x35d   :  { %v6985_v38 = vpop.f32.mrb[7].mxu1  ;;  %7450 = vmatprep.subr.bf16.mxu1 %v8928_v28  ;;  %v8967_v28 = vcombine.low %v504_v52, %v508_v9  ;;  %v1031_v33 = vld [vmem:[%s14166_s1 + $0x1f50] sm:$0xff]  ;;  %v9007_v52 = vcombine.low %v544_v39, %v548_v62  ;;  %v10176_v9 = vld [vmem:[%s14168_s3] ss:$8 sps:$4 sm:$0xff]  }
 0x35e   :  { %7285 = vmatpush1.bf16.msra.mxu0 %v9429_v20  ;;  %v1027_v20 = vld [vmem:[%s14166_s1 + $0x1f30] sm:$0xff]  ;;  %v8975_v38 = vcombine.low %v512_v19, %v516_v5 }
 0x35f   :  { %7286 = vmatprep.subr.bf16.mxu0 %v9438_v22  ;;  %v9477_v22 = vcombine.low %v1015_v10, %v1019_v12  ;;  %v9486_v25 = vcombine.high %v1023_v16, %v1027_v20  ;;  %v10177_v12 = vld [vmem:[%s14168_s3 + $0x14] ss:$8 sps:$4 sm:$0xff]   ;;  %v10179_v19 = vld [vmem:[%s14168_s3 + $0x10] ss:$8 sps:$4 sm:$0xff]  }
 0x360   :  { %7451 = vmatpush1.bf16.msra.mxu1 %v8927_v34  ;;  %v1035_v34 = vld [vmem:[%s14166_s1 + $0x1f70] sm:$0xff] }
 0x361   :  { %7452 = vmatprep.subr.bf16.mxu1 %v8936_v36  ;;  %v8984_v36 = vcombine.high %v520_v29, %v524_v41 }
 0x362   :  { %7287 = vmatpush1.bf16.msra.mxu0 %v9437_v35  ;;  %v9485_v35 = vcombine.low %v1023_v16, %v1027_v20  ;;  %v10180_v16 = vld [vmem:[%s14168_s3 + $0x24] ss:$8 sps:$4 sm:$0xff]  }
 0x363   :  { %7288 = vmatprep.subr.bf16.mxu0 %v9446_v40  ;;  %v9494_v40 = vcombine.high %v1031_v33, %v1035_v34 }
 0x364   :  { %7453 = vmatpush1.bf16.msra.mxu1 %v8935_v48  ;;  %v8983_v48 = vcombine.low %v520_v29, %v524_v41  ;;  %v10185_v41 = vld [vmem:[%s14168_s3 + $0x30] ss:$8 sps:$4 sm:$0xff]  }
 0x365   :  { %7454 = vmatprep.subr.bf16.mxu1 %v8944_v32  ;;  %v8992_v32 = vcombine.high %v528_v44, %v532_v31 }
 0x366   :  { %7289 = vmatpush1.bf16.msra.mxu0 %v9445_v53  ;;  %v9493_v53 = vcombine.low %v1031_v33, %v1035_v34  ;;  %v10186_v34 = vld [vmem:[%s14168_s3 + $0x44] ss:$8 sps:$4 sm:$0xff]  }
 0x367   :  { %7290 = vmatprep.subr.bf16.mxu0 %v9454_v46  ;;  %v9502_v46 = vcombine.high %v1039_v11, %v1043_v45 }
 0x368   :  { %7455 = vmatpush1.bf16.msra.mxu1 %v8943_v57  ;;  %v8991_v57 = vcombine.low %v528_v44, %v532_v31  ;;  %v10189_v31 = vld [vmem:[%s14168_s3 + $0x54] ss:$8 sps:$4 sm:$0xff]  }
 0x369   :  { %7456 = vmatprep.subr.bf16.mxu1 %v8952_v59  ;;  %v9000_v59 = vcombine.high %v536_v50, %v540_v51  ;;  %v600_v50 = vld [vmem:[%s14166_s1 + $0x11d8] sm:$0xff] }
 0x36a   :  { %7291 = vmatpush1.bf16.msra.mxu0 %v9453_v58  ;;  %v9501_v58 = vcombine.low %v1039_v11, %v1043_v45  ;;  %v592_v11 = vld [vmem:[%s14166_s1 + $0x1198] sm:$0xff] }
 0x36b   :  { %7292 = vmatprep.subr.bf16.mxu0 %v9462_v60  ;;  %v9510_v60 = vcombine.high %v1047_v54, %v1051_v56  ;;  %v596_v45 = vld [vmem:[%s14166_s1 + $0x11b8] sm:$0xff]  ;;  %v10194_v56 = vld [vmem:[%s14168_s3 + $0x60] ss:$8 sps:$4 sm:$0xff]  }
 0x36c   :  { %7457 = vmatpush1.bf16.msra.mxu1 %v8951_v3  ;;  %v9008_v3 = vcombine.high %v544_v39, %v548_v62  ;;  %v604_v51 = vld [vmem:[%s14166_s1 + $0x11f8] sm:$0xff]  ;;  %v9055_v54 = vcombine.low %v592_v11, %v596_v45 }
 0x36d   :  { %7458 = vmatprep.subr.bf16.mxu1 %v8960_v6  ;;  %v552_v6 = vld [vmem:[%s14166_s1 + $0x1058] sm:$0xff]  ;;  %v9063_v39 = vcombine.low %v600_v50, %v604_v51 }
 0x36e   :  { %7293 = vmatpush1.bf16.msra.mxu0 %v9461_v4  ;;  %v10174_v4 = vld [vmem:[%s14168_s3 + $0x4] ss:$8 sps:$4 sm:$0xff]   ;;  %v10197_v62 = vld [vmem:[%s14168_s3 + $0x70] ss:$8 sps:$4 sm:$0xff]  }
 0x36f   :  { %7294 = vmatprep.subr.bf16.mxu0 %v9470_v8  ;;  %v556_v8 = vld [vmem:[%s14166_s1 + $0x1078] sm:$0xff] }
 0x370   :  { %7459 = vmatpush1.bf16.msra.mxu1 %v8959_v13  ;;  %v9016_v10 = vcombine.high %v552_v6, %v556_v8  ;;  %v560_v13 = vld [vmem:[%s14166_s1 + $0x1098] sm:$0xff] }
 0x371   :  { %7460 = vmatprep.subr.bf16.mxu1 %v8968_v15  ;;  %v7644_v15 = vmax.f32 %v12409_v18, 0.0  ;;  %v572_v18 = vld [vmem:[%s14166_s1 + $0x10f8] sm:$0xff] }
 0x372   :  { %7295 = vmatpush1.bf16.msra.mxu0 %v9469_v63  ;;  %v564_v63 = vld [vmem:[%s14166_s1 + $0x10b8] sm:$0xff] }
 0x373   :  { %7296 = vmatprep.subr.bf16.mxu0 %v9478_v17  ;;  %v9015_v17 = vcombine.low %v552_v6, %v556_v8  ;;  %v9024_v5 = vcombine.high %v560_v13, %v564_v63  ;;  %v9023_v20 = vcombine.low %v560_v13, %v564_v63  ;;  %v10200_v8 = vld [vmem:[%s14168_s3 + $0x80] ss:$8 sps:$4 sm:$0xff]   ;;  %v10203_v63 = vld [vmem:[%s14168_s3 + $0x90] ss:$8 sps:$4 sm:$0xff]  }
 0x374   :  { %7461 = vmatpush1.bf16.msra.mxu1 %v8967_v28  ;;  %v10182_v28 = vld [vmem:[%s14168_s3 + $0x20] ss:$8 sps:$4 sm:$0xff]  }
 0x375   :  { %7462 = vmatprep.subr.bf16.mxu1 %v8976_v24  ;;  %v10183_v24 = vld [vmem:[%s14168_s3 + $0x34] ss:$8 sps:$4 sm:$0xff]  }
 0x376   :  { %7297 = vmatpush1.bf16.msra.mxu0 %v9477_v22 }
 0x377   :  { %7298 = vmatprep.subr.bf16.mxu0 %v9486_v25  ;;  %v576_v25 = vld [vmem:[%s14166_s1 + $0x1118] sm:$0xff] }
 0x378   :  { %7463 = vmatpush1.bf16.msra.mxu1 %v8975_v38  ;;  %v584_v38 = vld [vmem:[%s14166_s1 + $0x1158] sm:$0xff] }
 0x379   :  { %7464 = vmatprep.subr.bf16.mxu1 %v8984_v36 }
 0x37a   :  { %7299 = vmatpush1.bf16.msra.mxu0 %v9485_v35  ;;  %v588_v35 = vld [vmem:[%s14166_s1 + $0x1178] sm:$0xff] }
 0x37b   :  { %7300 = vmatprep.subr.bf16.mxu0 %v9494_v40  ;;  %v10188_v40 = vld [vmem:[%s14168_s3 + $0x40] ss:$8 sps:$4 sm:$0xff]   ;;  %v9048_v44 = vcombine.high %v584_v38, %v588_v35 }
 0x37c   :  { %7465 = vmatpush1.bf16.msra.mxu1 %v8983_v48  ;;  %v9047_v48 = vcombine.low %v584_v38, %v588_v35  ;;  %v10212_v38 = vld [vmem:[%s14168_s3 + $0xc0] ss:$8 sps:$4 sm:$0xff]  }
 0x37d   :  { %7466 = vmatprep.subr.bf16.mxu1 %v8992_v32  ;;  %v9056_v32 = vcombine.high %v592_v11, %v596_v45  ;;  %v10215_v11 = vld [vmem:[%s14168_s3 + $0xd0] ss:$8 sps:$4 sm:$0xff]  }
 0x37e   :  { %7301 = vmatpush1.bf16.msra.mxu0 %v9493_v53  ;;  %v10191_v53 = vld [vmem:[%s14168_s3 + $0x50] ss:$8 sps:$4 sm:$0xff]  }
 0x37f   :  { %7302 = vmatprep.subr.bf16.mxu0 %v9502_v46  ;;  %v10192_v46 = vld [vmem:[%s14168_s3 + $0x64] ss:$8 sps:$4 sm:$0xff]  }
 0x380   :  { %7467 = vmatpush1.bf16.msra.mxu1 %v8991_v57  ;;  %v9064_v57 = vcombine.high %v600_v50, %v604_v51  ;;  %v10218_v51 = vld [vmem:[%s14168_s3 + $0xe0] ss:$8 sps:$4 sm:$0xff]  }
 0x381   :  { %7468 = vmatprep.subr.bf16.mxu1 %v9000_v59  ;;  %v608_v59 = vld [vmem:[%s14166_s1 + $0x1218] sm:$0xff] }
 0x382   :  { %7303 = vmatpush1.bf16.msra.mxu0 %v9501_v58  ;;  %v10195_v58 = vld [vmem:[%s14168_s3 + $0x74] ss:$8 sps:$4 sm:$0xff]  }
 0x383   :  { %7304 = vmatprep.subr.bf16.mxu0 %v9510_v60  ;;  %v612_v60 = vld [vmem:[%s14166_s1 + $0x1238] sm:$0xff] }
 0x384   :  { %7469 = vmatpush1.bf16.msra.mxu1 %v8999_v1  ;;  %v9072_v1 = vcombine.high %v608_v59, %v612_v60  ;;  %v9071_v6 = vcombine.low %v608_v59, %v612_v60  ;;  %v13498_v59 = vld [vmem:[%s14167_s2] sm:$0xff] }
 0x385   :  { %7479 = vmatprep.subr.bf16.mxu1 %v9008_v3  ;;  %v616_v3 = vld [vmem:[%s14166_s1 + $0x1258] sm:$0xff] }
 0x386   :  { %7305 = vmatpush1.bf16.msra.mxu0 %v9509_v2  ;;  %v10198_v2 = vld [vmem:[%s14168_s3 + $0x84] ss:$8 sps:$4 sm:$0xff]  }
 0x387   :  { %9629 = vmatprep.subr.bf16.mxu0 %v10174_v4  ;;  %7471 = vmatmul.mubr.bf16.vlgmr.msra.gmra.mrb[8].mxu1 %v10905_v55  ;;  %v568_v55 = vld [vmem:[%s14166_s1 + $0x10d8] sm:$0xff] }
 0x388   :  { %7480 = vmatpush1.bf16.msra.mxu1 %v9007_v52  ;;  %7511 = vmatprep.mubr.bf16.mxu1 %v10914_v61  ;;  %v9032_v22 = vcombine.high %v568_v55, %v572_v18  ;;  %v580_v61 = vld [vmem:[%s14166_s1 + $0x1138] sm:$0xff]  ;;  %v9031_v29 = vcombine.low %v568_v55, %v572_v18  ;;  %v10206_v55 = vld [vmem:[%s14168_s3 + $0xa0] ss:$8 sps:$4 sm:$0xff]  }
 0x389   :  { %7307 = vmatmul.mubr.bf16.vlgmr.msra.gmra.mrb[4].mxu0 %v11730_v27  ;;  %7481 = vmatprep.subr.bf16.mxu1 %v9016_v10  ;;  %v9040_v33 = vcombine.high %v576_v25, %v580_v61  ;;  %v9039_v36 = vcombine.low %v576_v25, %v580_v61  ;;  %v620_v4 = vld [vmem:[%s14166_s1 + $0x1278] sm:$0xff] }
 0x38a   :  { %9631 = vmatpush1.bf16.msra.mxu0 %v10176_v9  ;;  %8111 = vmatprep.mubr.f32.mxu0 %v7644_v15  ;;  %v9080_v52 = vcombine.high %v616_v3, %v620_v4  ;;  %v10201_v9 = vld [vmem:[%s14168_s3 + $0x94] ss:$8 sps:$4 sm:$0xff]   ;;  %v9079_v13 = vcombine.low %v616_v3, %v620_v4  ;;  %v10209_v25 = vld [vmem:[%s14168_s3 + $0xb0] ss:$8 sps:$4 sm:$0xff]  }
 0x38b   :  { %9633 = vmatprep.subr.bf16.mxu0 %v10177_v12  ;;  %v624_v10 = vld [vmem:[%s14166_s1 + $0x1298] sm:$0xff] }
 0x38c   :  { %7482 = vmatpush1.bf16.msra.mxu1 %v9015_v17  ;;  %v628_v12 = vld [vmem:[%s14166_s1 + $0x12b8] sm:$0xff]  ;;  %v10204_v17 = vld [vmem:[%s14168_s3 + $0xa4] ss:$8 sps:$4 sm:$0xff]  }
 0x38d   :  { %7483 = vmatprep.subr.bf16.mxu1 %v9024_v5  ;;  %v9088_v15 = vcombine.high %v624_v10, %v628_v12  ;;  %v636_v5 = vld [vmem:[%s14166_s1 + $0x12f8] sm:$0xff] }
 0x38e   :  { %9635 = vmatpush1.bf16.msra.mxu0 %v10179_v19  ;;  %v632_v19 = vld [vmem:[%s14166_s1 + $0x12d8] sm:$0xff] }
 0x38f   :  { %9637 = vmatprep.subr.bf16.mxu0 %v10180_v16  ;;  %v9087_v16 = vcombine.low %v624_v10, %v628_v12  ;;  %v9096_v18 = vcombine.high %v632_v19, %v636_v5  ;;  %v680_v4 = vld [vmem:[%s14166_s1 + $0x1458] sm:$0xff] }
 0x390   :  { %7484 = vmatpush1.bf16.msra.mxu1 %v9023_v20  ;;  %v10207_v20 = vld [vmem:[%s14168_s3 + $0xb4] ss:$8 sps:$4 sm:$0xff]  }
 0x391   :  { %7485 = vmatprep.subr.bf16.mxu1 %v9032_v22  ;;  %v644_v22 = vld [vmem:[%s14166_s1 + $0x1338] sm:$0xff] }
 0x392   :  { %9639 = vmatpush1.bf16.msra.mxu0 %v10182_v28  ;;  %v640_v28 = vld [vmem:[%s14166_s1 + $0x1318] sm:$0xff] }
 0x393   :  { %9641 = vmatprep.subr.bf16.mxu0 %v10183_v24  ;;  %v9095_v24 = vcombine.low %v632_v19, %v636_v5  ;;  %v9104_v61 = vcombine.high %v640_v28, %v644_v22  ;;  %v10225_v10 = vld [vmem:[%s14168_s3 + $0x114] ss:$8 sps:$4 sm:$0xff]   ;;  %v10228_v19 = vld [vmem:[%s14168_s3 + $0x124] ss:$8 sps:$4 sm:$0xff]  }
 0x394   :  { %7486 = vmatpush1.bf16.msra.mxu1 %v9031_v29  ;;  %v10210_v29 = vld [vmem:[%s14168_s3 + $0xc4] ss:$8 sps:$4 sm:$0xff]   ;;  %v688_v12 = vld [vmem:[%s14166_s1 + $0x1498] sm:$0xff] }
 0x395   :  { %7487 = vmatprep.subr.bf16.mxu1 %v9040_v33  ;;  %v652_v33 = vld [vmem:[%s14166_s1 + $0x1378] sm:$0xff] }
 0x396   :  { %9643 = vmatpush1.bf16.msra.mxu0 %v10185_v41  ;;  %v648_v41 = vld [vmem:[%s14166_s1 + $0x1358] sm:$0xff] }
 0x397   :  { %9645 = vmatprep.subr.bf16.mxu0 %v10186_v34  ;;  %v9103_v34 = vcombine.low %v640_v28, %v644_v22  ;;  %v9112_v35 = vcombine.high %v648_v41, %v652_v33  ;;  %v700_v5 = vld [vmem:[%s14166_s1 + $0x14f8] sm:$0xff] }
 0x398   :  { %7488 = vmatpush1.bf16.msra.mxu1 %v9039_v36  ;;  %v10213_v36 = vld [vmem:[%s14168_s3 + $0xd4] ss:$8 sps:$4 sm:$0xff]  }
 0x399   :  { %7489 = vmatprep.subr.bf16.mxu1 %v9048_v44  ;;  %v660_v44 = vld [vmem:[%s14166_s1 + $0x13b8] sm:$0xff] }
 0x39a   :  { %9647 = vmatpush1.bf16.msra.mxu0 %v10188_v40  ;;  %v656_v40 = vld [vmem:[%s14166_s1 + $0x1398] sm:$0xff] }
 0x39b   :  { %9649 = vmatprep.subr.bf16.mxu0 %v10189_v31  ;;  %v9111_v31 = vcombine.low %v648_v41, %v652_v33  ;;  %v9120_v45 = vcombine.high %v656_v40, %v660_v44  ;;  %v9119_v50 = vcombine.low %v656_v40, %v660_v44  ;;  %v704_v28 = vld [vmem:[%s14166_s1 + $0x1518] sm:$0xff] }
 0x39c   :  { %7490 = vmatpush1.bf16.msra.mxu1 %v9047_v48  ;;  %v10216_v48 = vld [vmem:[%s14168_s3 + $0xe4] ss:$8 sps:$4 sm:$0xff]   ;;  %v716_v41 = vld [vmem:[%s14166_s1 + $0x1578] sm:$0xff] }
 0x39d   :  { %7491 = vmatprep.subr.bf16.mxu1 %v9056_v32  ;;  %v668_v32 = vld [vmem:[%s14166_s1 + $0x13f8] sm:$0xff] }
 0x39e   :  { %9651 = vmatpush1.bf16.msra.mxu0 %v10191_v53  ;;  %v664_v53 = vld [vmem:[%s14166_s1 + $0x13d8] sm:$0xff] }
 0x39f   :  { %9653 = vmatprep.subr.bf16.mxu0 %v10192_v46  ;;  %v1069_v46 = vsub.s32 3, %v10500_v43  ;;  %v724_v40 = vld [vmem:[%s14166_s1 + $0x15b8] sm:$0xff] }
 0x3a0   :  { %7492 = vmatpush1.bf16.msra.mxu1 %v9055_v54  ;;  %v9128_v54 = vcombine.high %v664_v53, %v668_v32 }
 0x3a1   :  { %7493 = vmatprep.subr.bf16.mxu1 %v9064_v57  ;;  %v672_v57 = vld [vmem:[%s14166_s1 + $0x1418] sm:$0xff]  ;;  %v1070_v60 = vrot.slane %v13498_v59, %v1069_v46  ;;  %v10242_v46 = vld [vmem:[%s14168_s3 + $0x160] ss:$8 sps:$4 sm:$0xff]  }
 0x3a2   :  { %9655 = vmatpush1.bf16.msra.mxu0 %v10194_v56  ;;  %v10219_v56 = vld [vmem:[%s14168_s3 + $0xf4] ss:$8 sps:$4 sm:$0xff]  }
 0x3a3   :  { %9657 = vmatprep.subr.bf16.mxu0 %v10195_v58  ;;  %v676_v58 = vld [vmem:[%s14166_s1 + $0x1438] sm:$0xff]  ;;  %v9921_v3 = vadd.f32 %v13191_v26, %v1070_v60 }
 0x3a4   :  { %7494 = vmatpush1.bf16.msra.mxu1 %v9063_v39  ;;  %v9127_v39 = vcombine.low %v664_v53, %v668_v32  ;;  %v732_v53 = vld [vmem:[%s14166_s1 + $0x15f8] sm:$0xff] }
 0x3a5   :  { %7495 = vmatprep.subr.bf16.mxu1 %v9072_v1  ;;  %v9136_v1 = vcombine.high %v672_v57, %v676_v58 }
 0x3a6   :  { %9659 = vmatpush1.bf16.msra.mxu0 %v10197_v62  ;;  %v10221_v62 = vld [vmem:[%s14168_s3 + $0xf0] ss:$8 sps:$4 sm:$0xff]  }
 0x3a7   :  { %9661 = vmatprep.subr.bf16.mxu0 %v10198_v2  ;;  %v10222_v2 = vld [vmem:[%s14168_s3 + $0x104] ss:$8 sps:$4 sm:$0xff]  }
 0x3a8   :  { %7496 = vmatpush1.bf16.msra.mxu1 %v9071_v6  ;;  %v684_v6 = vld [vmem:[%s14166_s1 + $0x1478] sm:$0xff] }
 0x3a9   :  { %7497 = vmatprep.subr.bf16.mxu1 %v9080_v52  ;;  %v10224_v52 = vld [vmem:[%s14168_s3 + $0x100] ss:$8 sps:$4 sm:$0xff]   ;;  %v9144_v26 = vcombine.high %v680_v4, %v684_v6 }
 0x3aa   :  { %9663 = vmatpush1.bf16.msra.mxu0 %v10200_v8  ;;  %v9135_v8 = vcombine.low %v672_v57, %v676_v58  ;;  %v10245_v58 = vld [vmem:[%s14168_s3 + $0x170] ss:$8 sps:$4 sm:$0xff]  }
 0x3ab   :  { %9665 = vmatprep.subr.bf16.mxu0 %v10201_v9  ;;  %v7643_v9 = vmax.f32 %v12407_v14, 0.0  ;;  %v9143_v14 = vcombine.low %v680_v4, %v684_v6  ;;  %v10249_v6 = vld [vmem:[%s14168_s3 + $0x194] ss:$8 sps:$4 sm:$0xff]  }
 0x3ac   :  { %7498 = vmatpush1.bf16.msra.mxu1 %v9079_v13  ;;  %v692_v13 = vld [vmem:[%s14166_s1 + $0x14b8] sm:$0xff] }
 0x3ad   :  { %7499 = vmatprep.subr.bf16.mxu1 %v9088_v15  ;;  %v10227_v15 = vld [vmem:[%s14168_s3 + $0x110] ss:$8 sps:$4 sm:$0xff]  }
 0x3ae   :  { %9667 = vmatpush1.bf16.msra.mxu0 %v10203_v63  ;;  %v7646_v63 = vmax.f32 %v9921_v3, 0.0  ;;  %v10248_v3 = vld [vmem:[%s14168_s3 + $0x180] ss:$8 sps:$4 sm:$0xff]  }
 0x3af   :  { %9669 = vmatprep.subr.bf16.mxu0 %v10204_v17  ;;  %v9152_v17 = vcombine.high %v688_v12, %v692_v13 }
 0x3b0   :  { %7500 = vmatpush1.bf16.msra.mxu1 %v9087_v16  ;;  %v9151_v16 = vcombine.low %v688_v12, %v692_v13  ;;  %v10252_v12 = vld [vmem:[%s14168_s3 + $0x1a4] ss:$8 sps:$4 sm:$0xff]   ;;  %v760_v13 = vld [vmem:[%s14166_s1 + $0x16d8] sm:$0xff] }
 0x3b1   :  { %7501 = vmatprep.subr.bf16.mxu1 %v9096_v18 }
 0x3b2   :  { %9671 = vmatpush1.bf16.msra.mxu0 %v10206_v55  ;;  %v10230_v55 = vld [vmem:[%s14168_s3 + $0x120] ss:$8 sps:$4 sm:$0xff]  }
 0x3b3   :  { %9673 = vmatprep.subr.bf16.mxu0 %v10207_v20  ;;  %v10231_v20 = vld [vmem:[%s14168_s3 + $0x134] ss:$8 sps:$4 sm:$0xff]  }
 0x3b4   :  { %7502 = vmatpush1.bf16.msra.mxu1 %v9095_v24  ;;  %v10233_v24 = vld [vmem:[%s14168_s3 + $0x130] ss:$8 sps:$4 sm:$0xff]  }
 0x3b5   :  { %7503 = vmatprep.subr.bf16.mxu1 %v9104_v61  ;;  %v10234_v61 = vld [vmem:[%s14168_s3 + $0x144] ss:$8 sps:$4 sm:$0xff]  }
 0x3b6   :  { %9675 = vmatpush1.bf16.msra.mxu0 %v10209_v25 }
 0x3b7   :  { %9677 = vmatprep.subr.bf16.mxu0 %v10210_v29  ;;  %v712_v29 = vld [vmem:[%s14166_s1 + $0x1558] sm:$0xff] }
 0x3b8   :  { %7504 = vmatpush1.bf16.msra.mxu1 %v9103_v34  ;;  %v10236_v34 = vld [vmem:[%s14168_s3 + $0x140] ss:$8 sps:$4 sm:$0xff]   ;;  %v9175_v44 = vcombine.low %v712_v29, %v716_v41 }
 0x3b9   :  { %7505 = vmatprep.subr.bf16.mxu1 %v9112_v35  ;;  %v10237_v35 = vld [vmem:[%s14168_s3 + $0x154] ss:$8 sps:$4 sm:$0xff]  }
 0x3ba   :  { %9679 = vmatpush1.bf16.msra.mxu0 %v10212_v38  ;;  %v9176_v38 = vcombine.high %v712_v29, %v716_v41  ;;  %v784_v29 = vld [vmem:[%s14166_s1 + $0x1798] sm:$0xff] }
 0x3bb   :  { %9681 = vmatprep.subr.bf16.mxu0 %v10213_v36  ;;  %v720_v36 = vld [vmem:[%s14166_s1 + $0x1598] sm:$0xff] }
 0x3bc   :  { %7506 = vmatpush1.bf16.msra.mxu1 %v9111_v31  ;;  %v10239_v31 = vld [vmem:[%s14168_s3 + $0x150] ss:$8 sps:$4 sm:$0xff]   ;;  %v9183_v32 = vcombine.low %v720_v36, %v724_v40 }
 0x3bd   :  { %7507 = vmatprep.subr.bf16.mxu1 %v9120_v45  ;;  %v10240_v45 = vld [vmem:[%s14168_s3 + $0x164] ss:$8 sps:$4 sm:$0xff]   ;;  %v788_v41 = vld [vmem:[%s14166_s1 + $0x17b8] sm:$0xff] }
 0x3be   :  { %9683 = vmatpush1.bf16.msra.mxu0 %v10215_v11  ;;  %v9184_v11 = vcombine.high %v720_v36, %v724_v40  ;;  %v10264_v36 = vld [vmem:[%s14168_s3 + $0x1e4] ss:$8 sps:$4 sm:$0xff]   ;;  %v792_v40 = vld [vmem:[%s14166_s1 + $0x17d8] sm:$0xff] }
 0x3bf   :  { %9685 = vmatprep.subr.bf16.mxu0 %v10216_v48  ;;  %v728_v48 = vld [vmem:[%s14166_s1 + $0x15d8] sm:$0xff] }
 0x3c0   :  { %7508 = vmatpush1.bf16.msra.mxu1 %v9119_v50  ;;  %v9192_v50 = vcombine.high %v728_v48, %v732_v53  ;;  %v9191_v57 = vcombine.low %v728_v48, %v732_v53  ;;  %v10267_v53 = vld [vmem:[%s14168_s3 + $0x1f4] ss:$8 sps:$4 sm:$0xff]  }
 0x3c1   :  { %7509 = vmatprep.subr.bf16.mxu1 %v9128_v54  ;;  %v736_v54 = vld [vmem:[%s14166_s1 + $0x1618] sm:$0xff] }
 0x3c2   :  { %9687 = vmatpush1.bf16.msra.mxu0 %v10218_v51  ;;  %v10243_v51 = vld [vmem:[%s14168_s3 + $0x174] ss:$8 sps:$4 sm:$0xff]  }
 0x3c3   :  { %9689 = vmatprep.subr.bf16.mxu0 %v10219_v56  ;;  %v740_v56 = vld [vmem:[%s14166_s1 + $0x1638] sm:$0xff] }
 0x3c4   :  { %7510 = vmatpush1.bf16.msra.mxu1 %v9127_v39  ;;  %v9200_v60 = vcombine.high %v736_v54, %v740_v56  ;;  %v10246_v39 = vld [vmem:[%s14168_s3 + $0x184] ss:$8 sps:$4 sm:$0xff]  }
 0x3c5   :  { %7520 = vmatprep.subr.bf16.mxu1 %v9136_v1  ;;  %v748_v1 = vld [vmem:[%s14166_s1 + $0x1678] sm:$0xff] }
 0x3c6   :  { %9691 = vmatpush1.bf16.msra.mxu0 %v10221_v62  ;;  %v744_v62 = vld [vmem:[%s14166_s1 + $0x1658] sm:$0xff] }
 0x3c7   :  { %9693 = vmatprep.subr.bf16.mxu0 %v10222_v2  ;;  %7512 = vmatmul.mubr.bf16.vlgmr.msra.gmra.mrb[8].mxu1 %v11108_v23  ;;  %v696_v23 = vld [vmem:[%s14166_s1 + $0x14d8] sm:$0xff]  ;;  %v9199_v2 = vcombine.low %v736_v54, %v740_v56  ;;  %v9208_v4 = vcombine.high %v744_v62, %v748_v1 }
 0x3c8   :  { %7521 = vmatpush1.bf16.msra.mxu1 %v9135_v8  ;;  %7552 = vmatprep.mubr.bf16.mxu1 %v11118_v30  ;;  %v9160_v18 = vcombine.high %v696_v23, %v700_v5  ;;  %v708_v30 = vld [vmem:[%s14166_s1 + $0x1538] sm:$0xff]  ;;  %v9159_v22 = vcombine.low %v696_v23, %v700_v5 }
 0x3c9   :  { %8112 = vmatmul.mubr.f32.vlgmr.msra.gmra.mrb[8].mxu0 %v7643_v9  ;;  %7522 = vmatprep.subr.bf16.mxu1 %v9144_v26  ;;  %v9168_v25 = vcombine.high %v704_v28, %v708_v30  ;;  %v9167_v33 = vcombine.low %v704_v28, %v708_v30  ;;  %v752_v8 = vld [vmem:[%s14166_s1 + $0x1698] sm:$0xff]  ;;  %v9207_v9 = vcombine.low %v744_v62, %v748_v1 }
 0x3ca   :  { %9695 = vmatpush1.bf16.msra.mxu0 %v10224_v52  ;;  %8182 = vmatprep.mubr.f32.mxu0 %v7646_v63  ;;  %v756_v52 = vld [vmem:[%s14166_s1 + $0x16b8] sm:$0xff] }
 0x3cb   :  { %9697 = vmatprep.subr.bf16.mxu0 %v10225_v10  ;;  %v10251_v26 = vld [vmem:[%s14168_s3 + $0x190] ss:$8 sps:$4 sm:$0xff]   ;;  %v9216_v10 = vcombine.high %v752_v8, %v756_v52 }
 0x3cc   :  { %7523 = vmatpush1.bf16.msra.mxu1 %v9143_v14  ;;  %v764_v63 = vld [vmem:[%s14166_s1 + $0x16f8] sm:$0xff]  ;;  %v9215_v14 = vcombine.low %v752_v8, %v756_v52 }
 0x3cd   :  { %7524 = vmatprep.subr.bf16.mxu1 %v9152_v17  ;;  %v9224_v17 = vcombine.high %v760_v13, %v764_v63  ;;  %v768_v23 = vld [vmem:[%s14166_s1 + $0x1718] sm:$0xff] }
 0x3ce   :  { %9699 = vmatpush1.bf16.msra.mxu0 %v10227_v15  ;;  %v10254_v15 = vld [vmem:[%s14168_s3 + $0x1a0] ss:$8 sps:$4 sm:$0xff]   ;;  %v772_v5 = vld [vmem:[%s14166_s1 + $0x1738] sm:$0xff] }
 0x3cf   :  { %9701 = vmatprep.subr.bf16.mxu0 %v10228_v19  ;;  %v10255_v19 = vld [vmem:[%s14168_s3 + $0x1b4] ss:$8 sps:$4 sm:$0xff]   ;;  %v10275_v52 = vld [vmem:[%s14168_s3 + $0x210] ss:$8 sps:$4 sm:$0xff]  }
 0x3d0   :  { %7525 = vmatpush1.bf16.msra.mxu1 %v9151_v16  ;;  %v9223_v16 = vcombine.low %v760_v13, %v764_v63  ;;  %v776_v28 = vld [vmem:[%s14166_s1 + $0x1758] sm:$0xff]  ;;  %v10278_v13 = vld [vmem:[%s14168_s3 + $0x220] ss:$8 sps:$4 sm:$0xff]  }
 0x3d1   :  { %7526 = vmatprep.subr.bf16.mxu1 %v9160_v18  ;;  %v9232_v18 = vcombine.high %v768_v23, %v772_v5  ;;  %v780_v30 = vld [vmem:[%s14166_s1 + $0x1778] sm:$0xff] }
 0x3d2   :  { %9703 = vmatpush1.bf16.msra.mxu0 %v10230_v55  ;;  %v10257_v55 = vld [vmem:[%s14168_s3 + $0x1b0] ss:$8 sps:$4 sm:$0xff]  }
 0x3d3   :  { %9705 = vmatprep.subr.bf16.mxu0 %v10231_v20  ;;  %v10258_v20 = vld [vmem:[%s14168_s3 + $0x1c4] ss:$8 sps:$4 sm:$0xff]   ;;  %v832_v63 = vld [vmem:[%s14166_s1 + $0x1918] sm:$0xff] }
 0x3d4   :  { %7527 = vmatpush1.bf16.msra.mxu1 %v9159_v22  ;;  %v9231_v22 = vcombine.low %v768_v23, %v772_v5  ;;  %v840_v23 = vld [vmem:[%s14166_s1 + $0x1958] sm:$0xff] }
 0x3d5   :  { %7528 = vmatprep.subr.bf16.mxu1 %v9168_v25  ;;  %v9240_v25 = vcombine.high %v776_v28, %v780_v30  ;;  %v844_v5 = vld [vmem:[%s14166_s1 + $0x1978] sm:$0xff] }
 0x3d6   :  { %9707 = vmatpush1.bf16.msra.mxu0 %v10233_v24  ;;  %v10260_v24 = vld [vmem:[%s14168_s3 + $0x1c0] ss:$8 sps:$4 sm:$0xff]  }
 0x3d7   :  { %9709 = vmatprep.subr.bf16.mxu0 %v10234_v61  ;;  %v10261_v61 = vld [vmem:[%s14168_s3 + $0x1d4] ss:$8 sps:$4 sm:$0xff]  }
 0x3d8   :  { %7529 = vmatpush1.bf16.msra.mxu1 %v9167_v33  ;;  %v9239_v33 = vcombine.low %v776_v28, %v780_v30  ;;  %v848_v28 = vld [vmem:[%s14166_s1 + $0x1998] sm:$0xff] }
 0x3d9   :  { %7530 = vmatprep.subr.bf16.mxu1 %v9176_v38  ;;  %v9248_v38 = vcombine.high %v784_v29, %v788_v41  ;;  %v852_v30 = vld [vmem:[%s14166_s1 + $0x19b8] sm:$0xff] }
 0x3da   :  { %9711 = vmatpush1.bf16.msra.mxu0 %v10236_v34  ;;  %v10263_v34 = vld [vmem:[%s14168_s3 + $0x1d0] ss:$8 sps:$4 sm:$0xff]  }
 0x3db   :  { %9713 = vmatprep.subr.bf16.mxu0 %v10237_v35  ;;  %v1065_v35 = vsub.s32 2, %v10500_v43 }
 0x3dc   :  { %7531 = vmatpush1.bf16.msra.mxu1 %v9175_v44  ;;  %v796_v44 = vld [vmem:[%s14166_s1 + $0x17f8] sm:$0xff] }
 0x3dd   :  { %7532 = vmatprep.subr.bf16.mxu1 %v9184_v11  ;;  %v10266_v11 = vld [vmem:[%s14168_s3 + $0x1e0] ss:$8 sps:$4 sm:$0xff]   ;;  %v1066_v48 = vrot.slane %v13498_v59, %v1065_v35 }
 0x3de   :  { %9715 = vmatpush1.bf16.msra.mxu0 %v10239_v31  ;;  %v9247_v31 = vcombine.low %v784_v29, %v788_v41  ;;  %v856_v29 = vld [vmem:[%s14166_s1 + $0x19d8] sm:$0xff]  ;;  %v10290_v35 = vld [vmem:[%s14168_s3 + $0x260] ss:$8 sps:$4 sm:$0xff]  }
 0x3df   :  { %9717 = vmatprep.subr.bf16.mxu0 %v10240_v45  ;;  %v9256_v45 = vcombine.high %v792_v40, %v796_v44  ;;  %v9920_v56 = vadd.f32 %v13183_v21, %v1066_v48  ;;  %v10272_v21 = vld [vmem:[%s14168_s3 + $0x200] ss:$8 sps:$4 sm:$0xff]   ;;  %v860_v41 = vld [vmem:[%s14166_s1 + $0x19f8] sm:$0xff] }
 0x3e0   :  { %7533 = vmatpush1.bf16.msra.mxu1 %v9183_v32  ;;  %v800_v32 = vld [vmem:[%s14166_s1 + $0x1818] sm:$0xff] }
 0x3e1   :  { %7534 = vmatprep.subr.bf16.mxu1 %v9192_v50  ;;  %v9255_v50 = vcombine.low %v792_v40, %v796_v44  ;;  %v7645_v1 = vmax.f32 %v9920_v56, 0.0  ;;  %v868_v40 = vld [vmem:[%s14166_s1 + $0x1a38] sm:$0xff] }
 0x3e2   :  { %9719 = vmatpush1.bf16.msra.mxu0 %v10242_v46  ;;  %v804_v46 = vld [vmem:[%s14166_s1 + $0x1838] sm:$0xff] }
 0x3e3   :  { %9721 = vmatprep.subr.bf16.mxu0 %v10243_v51  ;;  %v10269_v51 = vld [vmem:[%s14168_s3 + $0x1f0] ss:$8 sps:$4 sm:$0xff]   ;;  %v9264_v54 = vcombine.high %v800_v32, %v804_v46  ;;  %v10291_v44 = vld [vmem:[%s14168_s3 + $0x274] ss:$8 sps:$4 sm:$0xff]  }
 0x3e4   :  { %7535 = vmatpush1.bf16.msra.mxu1 %v9191_v57  ;;  %v808_v57 = vld [vmem:[%s14166_s1 + $0x1858] sm:$0xff] }
 0x3e5   :  { %7536 = vmatprep.subr.bf16.mxu1 %v9200_v60  ;;  %v10270_v60 = vld [vmem:[%s14168_s3 + $0x204] ss:$8 sps:$4 sm:$0xff]   ;;  %v872_v48 = vld [vmem:[%s14166_s1 + $0x1a58] sm:$0xff] }
 0x3e6   :  { %9723 = vmatpush1.bf16.msra.mxu0 %v10245_v58  ;;  %v812_v58 = vld [vmem:[%s14166_s1 + $0x1878] sm:$0xff] }
 0x3e7   :  { %9725 = vmatprep.subr.bf16.mxu0 %v10246_v39  ;;  %v9263_v39 = vcombine.low %v800_v32, %v804_v46  ;;  %v9272_v62 = vcombine.high %v808_v57, %v812_v58  ;;  %v10294_v32 = vld [vmem:[%s14168_s3 + $0x284] ss:$8 sps:$4 sm:$0xff]   ;;  %v884_v56 = vld [vmem:[%s14166_s1 + $0x1ab8] sm:$0xff] }
 0x3e8   :  { %7537 = vmatpush1.bf16.msra.mxu1 %v9199_v2  ;;  %v816_v2 = vld [vmem:[%s14166_s1 + $0x1898] sm:$0xff] }
 0x3e9   :  { %7538 = vmatprep.subr.bf16.mxu1 %v9208_v4  ;;  %v10273_v4 = vld [vmem:[%s14168_s3 + $0x214] ss:$8 sps:$4 sm:$0xff]  }
 0x3ea   :  { %9727 = vmatpush1.bf16.msra.mxu0 %v10248_v3  ;;  %v820_v3 = vld [vmem:[%s14166_s1 + $0x18b8] sm:$0xff] }
 0x3eb   :  { %9729 = vmatprep.subr.bf16.mxu0 %v10249_v6  ;;  %v9271_v6 = vcombine.low %v808_v57, %v812_v58  ;;  %v9280_v8 = vcombine.high %v816_v2, %v820_v3  ;;  %v10297_v57 = vld [vmem:[%s14168_s3 + $0x294] ss:$8 sps:$4 sm:$0xff]  }
 0x3ec   :  { %7539 = vmatpush1.bf16.msra.mxu1 %v9207_v9  ;;  %v824_v9 = vld [vmem:[%s14166_s1 + $0x18d8] sm:$0xff] }
 0x3ed   :  { %7540 = vmatprep.subr.bf16.mxu1 %v9216_v10  ;;  %v9279_v10 = vcombine.low %v816_v2, %v820_v3 }
 0x3ee   :  { %9731 = vmatpush1.bf16.msra.mxu0 %v10251_v26  ;;  %v828_v26 = vld [vmem:[%s14166_s1 + $0x18f8] sm:$0xff] }
 0x3ef   :  { %9733 = vmatprep.subr.bf16.mxu0 %v10252_v12  ;;  %v9288_v12 = vcombine.high %v824_v9, %v828_v26 }
 0x3f0   :  { %7541 = vmatpush1.bf16.msra.mxu1 %v9215_v14  ;;  %v836_v14 = vld [vmem:[%s14166_s1 + $0x1938] sm:$0xff] }
 0x3f1   :  { %7542 = vmatprep.subr.bf16.mxu1 %v9224_v17  ;;  %v9296_v17 = vcombine.high %v832_v63, %v836_v14 }
 0x3f2   :  { %9735 = vmatpush1.bf16.msra.mxu0 %v10254_v15  ;;  %v9287_v15 = vcombine.low %v824_v9, %v828_v26 }
 0x3f3   :  { %9737 = vmatprep.subr.bf16.mxu0 %v10255_v19  ;;  %v10281_v19 = vld [vmem:[%s14168_s3 + $0x230] ss:$8 sps:$4 sm:$0xff]  }
 0x3f4   :  { %7543 = vmatpush1.bf16.msra.mxu1 %v9223_v16  ;;  %v10282_v16 = vld [vmem:[%s14168_s3 + $0x244] ss:$8 sps:$4 sm:$0xff]  }
 0x3f5   :  { %7544 = vmatprep.subr.bf16.mxu1 %v9232_v18  ;;  %v9304_v18 = vcombine.high %v840_v23, %v844_v5 }
 0x3f6   :  { %9739 = vmatpush1.bf16.msra.mxu0 %v10257_v55  ;;  %v9295_v55 = vcombine.low %v832_v63, %v836_v14 }
 0x3f7   :  { %9741 = vmatprep.subr.bf16.mxu0 %v10258_v20  ;;  %v10284_v20 = vld [vmem:[%s14168_s3 + $0x240] ss:$8 sps:$4 sm:$0xff]  }
 0x3f8   :  { %7545 = vmatpush1.bf16.msra.mxu1 %v9231_v22  ;;  %v10285_v22 = vld [vmem:[%s14168_s3 + $0x254] ss:$8 sps:$4 sm:$0xff]  }
 0x3f9   :  { %7546 = vmatprep.subr.bf16.mxu1 %v9240_v25  ;;  %v9312_v25 = vcombine.high %v848_v28, %v852_v30 }
 0x3fa   :  { %9743 = vmatpush1.bf16.msra.mxu0 %v10260_v24  ;;  %v9303_v24 = vcombine.low %v840_v23, %v844_v5 }
 0x3fb   :  { %9745 = vmatprep.subr.bf16.mxu0 %v10261_v61  ;;  %v10287_v61 = vld [vmem:[%s14168_s3 + $0x250] ss:$8 sps:$4 sm:$0xff]  }
 0x3fc   :  { %7547 = vmatpush1.bf16.msra.mxu1 %v9239_v33  ;;  %v10288_v33 = vld [vmem:[%s14168_s3 + $0x264] ss:$8 sps:$4 sm:$0xff]  }
 0x3fd   :  { %7548 = vmatprep.subr.bf16.mxu1 %v9248_v38  ;;  %v9320_v38 = vcombine.high %v856_v29, %v860_v41 }
 0x3fe   :  { %9747 = vmatpush1.bf16.msra.mxu0 %v10263_v34  ;;  %v9311_v34 = vcombine.low %v848_v28, %v852_v30 }
 0x3ff   :  { %9749 = vmatprep.subr.bf16.mxu0 %v10264_v36  ;;  %v864_v36 = vld [vmem:[%s14166_s1 + $0x1a18] sm:$0xff] }
 0x400   :  { %7549 = vmatpush1.bf16.msra.mxu1 %v9247_v31  ;;  %v9319_v31 = vcombine.low %v856_v29, %v860_v41  ;;  %v9327_v46 = vcombine.low %v864_v36, %v868_v40 }
 0x401   :  { %7550 = vmatprep.subr.bf16.mxu1 %v9256_v45  ;;  %v10293_v45 = vld [vmem:[%s14168_s3 + $0x270] ss:$8 sps:$4 sm:$0xff]  }
 0x402   :  { %9751 = vmatpush1.bf16.msra.mxu0 %v10266_v11  ;;  %v9328_v11 = vcombine.high %v864_v36, %v868_v40 }
 0x403   :  { %9753 = vmatprep.subr.bf16.mxu0 %v10267_v53  ;;  %v876_v53 = vld [vmem:[%s14166_s1 + $0x1a78] sm:$0xff] }
 0x404   :  { %7551 = vmatpush1.bf16.msra.mxu1 %v9255_v50  ;;  %v9336_v50 = vcombine.high %v872_v48, %v876_v53  ;;  %v9335_v58 = vcombine.low %v872_v48, %v876_v53  ;;  %v952_v48 = vld [vmem:[%s14166_s1 + $0x1cd8] sm:$0xff] }
 0x405   :  { %7561 = vmatprep.subr.bf16.mxu1 %v9264_v54  ;;  %v880_v54 = vld [vmem:[%s14166_s1 + $0x1a98] sm:$0xff] }
 0x406   :  { %9755 = vmatpush1.bf16.msra.mxu0 %v10269_v51  ;;  %v10296_v51 = vld [vmem:[%s14168_s3 + $0x280] ss:$8 sps:$4 sm:$0xff]   ;;  %v9343_v2 = vcombine.low %v880_v54, %v884_v56  ;;  %v956_v53 = vld [vmem:[%s14166_s1 + $0x1cf8] sm:$0xff] }
 0x407   :  { %9757 = vmatprep.subr.bf16.mxu0 %v10270_v60  ;;  %7553 = vmatmul.mubr.bf16.vlgmr.msra.gmra.mrb[8].mxu1 %v11319_v0  ;;  %v10276_v0 = vld [vmem:[%s14168_s3 + $0x224] ss:$8 sps:$4 sm:$0xff]   ;;  %v9344_v60 = vcombine.high %v880_v54, %v884_v56  ;;  %v968_v54 = vld [vmem:[%s14166_s1 + $0x1d58] sm:$0xff] }
 0x408   :  { %7562 = vmatpush1.bf16.msra.mxu1 %v9263_v39  ;;  %7593 = vmatprep.mubr.bf16.mxu1 %v11328_v7  ;;  %v10279_v7 = vld [vmem:[%s14168_s3 + $0x234] ss:$8 sps:$4 sm:$0xff]   ;;  %v10299_v39 = vld [vmem:[%s14168_s3 + $0x290] ss:$8 sps:$4 sm:$0xff]  }
 0x409   :  { %8183 = vmatmul.mubr.f32.vlgmr.msra.gmra.mrb[8].mxu0 %v7645_v1  ;;  %7563 = vmatprep.subr.bf16.mxu1 %v9272_v62  ;;  %v888_v62 = vld [vmem:[%s14166_s1 + $0x1ad8] sm:$0xff]  ;;  %v10300_v1 = vld [vmem:[%s14168_s3 + $0x2a4] ss:$8 sps:$4 sm:$0xff]  }
 0x40a   :  { %9759 = vmatpush1.bf16.msra.mxu0 %v10272_v21  ;;  %v892_v21 = vld [vmem:[%s14166_s1 + $0x1af8] sm:$0xff] }
 0x40b   :  { %9761 = vmatprep.subr.bf16.mxu0 %v10273_v4  ;;  %v9352_v3 = vcombine.high %v888_v62, %v892_v21  ;;  %v10302_v4 = vld [vmem:[%s14168_s3 + $0x2a0] ss:$8 sps:$4 sm:$0xff]   ;;  %v9351_v9 = vcombine.low %v888_v62, %v892_v21  ;;  %v972_v56 = vld [vmem:[%s14166_s1 + $0x1d78] sm:$0xff] }
 0x40c   :  { %7564 = vmatpush1.bf16.msra.mxu1 %v9271_v6  ;;  %v896_v6 = vld [vmem:[%s14166_s1 + $0x1b18] sm:$0xff] }
 0x40d   :  { %7565 = vmatprep.subr.bf16.mxu1 %v9280_v8  ;;  %v900_v8 = vld [vmem:[%s14166_s1 + $0x1b38] sm:$0xff] }
 0x40e   :  { %9763 = vmatpush1.bf16.msra.mxu0 %v10275_v52  ;;  %v10303_v52 = vld [vmem:[%s14168_s3 + $0x2b4] ss:$8 sps:$4 sm:$0xff]   ;;  %v9360_v26 = vcombine.high %v896_v6, %v900_v8  ;;  %v9359_v63 = vcombine.low %v896_v6, %v900_v8 }
 0x40f   :  { %9765 = vmatprep.subr.bf16.mxu0 %v10276_v0  ;;  %v10305_v0 = vld [vmem:[%s14168_s3 + $0x2b0] ss:$8 sps:$4 sm:$0xff]  }
 0x410   :  { %7566 = vmatpush1.bf16.msra.mxu1 %v9279_v10  ;;  %v904_v10 = vld [vmem:[%s14166_s1 + $0x1b58] sm:$0xff] }
 0x411   :  { %7567 = vmatprep.subr.bf16.mxu1 %v9288_v12  ;;  %v908_v12 = vld [vmem:[%s14166_s1 + $0x1b78] sm:$0xff] }
 0x412   :  { %9767 = vmatpush1.bf16.msra.mxu0 %v10278_v13  ;;  %v10306_v13 = vld [vmem:[%s14168_s3 + $0x2c4] ss:$8 sps:$4 sm:$0xff]   ;;  %v9368_v14 = vcombine.high %v904_v10, %v908_v12  ;;  %v9367_v23 = vcombine.low %v904_v10, %v908_v12  ;;  %v976_v62 = vld [vmem:[%s14166_s1 + $0x1d98] sm:$0xff] }
 0x413   :  { %9769 = vmatprep.subr.bf16.mxu0 %v10279_v7  ;;  %v10308_v7 = vld [vmem:[%s14168_s3 + $0x2c0] ss:$8 sps:$4 sm:$0xff]   ;;  %v980_v21 = vld [vmem:[%s14166_s1 + $0x1db8] sm:$0xff] }
 0x414   :  { %7568 = vmatpush1.bf16.msra.mxu1 %v9287_v15  ;;  %v912_v15 = vld [vmem:[%s14166_s1 + $0x1b98] sm:$0xff] }
 0x415   :  { %7569 = vmatprep.subr.bf16.mxu1 %v9296_v17  ;;  %v916_v17 = vld [vmem:[%s14166_s1 + $0x1bb8] sm:$0xff] }
 0x416   :  { %9771 = vmatpush1.bf16.msra.mxu0 %v10281_v19  ;;  %v10309_v19 = vld [vmem:[%s14168_s3 + $0x2d4] ss:$8 sps:$4 sm:$0xff]   ;;  %v9376_v5 = vcombine.high %v912_v15, %v916_v17  ;;  %v9375_v28 = vcombine.low %v912_v15, %v916_v17  ;;  %v10320_v15 = vld [vmem:[%s14168_s3 + $0x300] ss:$8 sps:$4 sm:$0xff]  }
 0x417   :  { %9773 = vmatprep.subr.bf16.mxu0 %v10282_v16  ;;  %v10311_v16 = vld [vmem:[%s14168_s3 + $0x2d0] ss:$8 sps:$4 sm:$0xff]  }
 0x418   :  { %7570 = vmatpush1.bf16.msra.mxu1 %v9295_v55  ;;  %v920_v55 = vld [vmem:[%s14166_s1 + $0x1bd8] sm:$0xff] }
 0x419   :  { %7571 = vmatprep.subr.bf16.mxu1 %v9304_v18  ;;  %v924_v18 = vld [vmem:[%s14166_s1 + $0x1bf8] sm:$0xff] }
 0x41a   :  { %9775 = vmatpush1.bf16.msra.mxu0 %v10284_v20  ;;  %v10312_v20 = vld [vmem:[%s14168_s3 + $0x2e4] ss:$8 sps:$4 sm:$0xff]   ;;  %v9384_v30 = vcombine.high %v920_v55, %v924_v18  ;;  %v9383_v29 = vcombine.low %v920_v55, %v924_v18  ;;  %v984_v6 = vld [vmem:[%s14166_s1 + $0x1dd8] sm:$0xff] }
 0x41b   :  { %9777 = vmatprep.subr.bf16.mxu0 %v10285_v22  ;;  %v10314_v22 = vld [vmem:[%s14168_s3 + $0x2e0] ss:$8 sps:$4 sm:$0xff]   ;;  %v988_v8 = vld [vmem:[%s14166_s1 + $0x1df8] sm:$0xff] }
 0x41c   :  { %7572 = vmatpush1.bf16.msra.mxu1 %v9303_v24  ;;  %v928_v24 = vld [vmem:[%s14166_s1 + $0x1c18] sm:$0xff] }
 0x41d   :  { %7573 = vmatprep.subr.bf16.mxu1 %v9312_v25  ;;  %v932_v25 = vld [vmem:[%s14166_s1 + $0x1c38] sm:$0xff] }
 0x41e   :  { %9779 = vmatpush1.bf16.msra.mxu0 %v10287_v61  ;;  %v10315_v61 = vld [vmem:[%s14168_s3 + $0x2f4] ss:$8 sps:$4 sm:$0xff]   ;;  %v9392_v41 = vcombine.high %v928_v24, %v932_v25  ;;  %v9391_v36 = vcombine.low %v928_v24, %v932_v25  ;;  %v10323_v18 = vld [vmem:[%s14168_s3 + $0x310] ss:$8 sps:$4 sm:$0xff]   ;;  %v10326_v25 = vld [vmem:[%s14168_s3 + $0x320] ss:$8 sps:$4 sm:$0xff]  }
 0x41f   :  { %9781 = vmatprep.subr.bf16.mxu0 %v10288_v33  ;;  %v10317_v33 = vld [vmem:[%s14168_s3 + $0x2f0] ss:$8 sps:$4 sm:$0xff]  }
 0x420   :  { %7574 = vmatpush1.bf16.msra.mxu1 %v9311_v34  ;;  %v936_v34 = vld [vmem:[%s14166_s1 + $0x1c58] sm:$0xff] }
 0x421   :  { %7575 = vmatprep.subr.bf16.mxu1 %v9320_v38  ;;  %v940_v38 = vld [vmem:[%s14166_s1 + $0x1c78] sm:$0xff] }
 0x422   :  { %9783 = vmatpush1.bf16.msra.mxu0 %v10290_v35  ;;  %v10318_v35 = vld [vmem:[%s14168_s3 + $0x304] ss:$8 sps:$4 sm:$0xff]   ;;  %v9400_v40 = vcombine.high %v936_v34, %v940_v38  ;;  %v1004_v55 = vld [vmem:[%s14166_s1 + $0x1e78] sm:$0xff] }
 0x423   :  { %9785 = vmatprep.subr.bf16.mxu0 %v10291_v44  ;;  %v944_v44 = vld [vmem:[%s14166_s1 + $0x1c98] sm:$0xff] }
 0x424   :  { %7576 = vmatpush1.bf16.msra.mxu1 %v9319_v31  ;;  %v948_v31 = vld [vmem:[%s14166_s1 + $0x1cb8] sm:$0xff] }
 0x425   :  { %7577 = vmatprep.subr.bf16.mxu1 %v9328_v11  ;;  %v9399_v11 = vcombine.low %v936_v34, %v940_v38  ;;  %v1012_v24 = vld [vmem:[%s14166_s1 + $0x1eb8] sm:$0xff] }
 0x426   :  { %9787 = vmatpush1.bf16.msra.mxu0 %v10293_v45  ;;  %v9408_v45 = vcombine.high %v944_v44, %v948_v31  ;;  %v1020_v34 = vld [vmem:[%s14166_s1 + $0x1ef8] sm:$0xff] }
 0x427   :  { %9789 = vmatprep.subr.bf16.mxu0 %v10294_v32  ;;  %v9407_v32 = vcombine.low %v944_v44, %v948_v31  ;;  %v10329_v38 = vld [vmem:[%s14168_s3 + $0x330] ss:$8 sps:$4 sm:$0xff]  }
 0x428   :  { %7578 = vmatpush1.bf16.msra.mxu1 %v9327_v46  ;;  %v9416_v46 = vcombine.high %v952_v48, %v956_v53  ;;  %v1024_v44 = vld [vmem:[%s14166_s1 + $0x1f18] sm:$0xff] }
 0x429   :  { %7579 = vmatprep.subr.bf16.mxu1 %v9336_v50  ;;  %v9415_v50 = vcombine.low %v952_v48, %v956_v53  ;;  %v1028_v31 = vld [vmem:[%s14166_s1 + $0x1f38] sm:$0xff] }
 0x42a   :  { %9791 = vmatpush1.bf16.msra.mxu0 %v10296_v51  ;;  %v10333_v48 = vld [vmem:[%s14168_s3 + $0x354] ss:$8 sps:$4 sm:$0xff]   ;;  %v9488_v53 = vcombine.high %v1024_v44, %v1028_v31 }
 0x42b   :  { %9793 = vmatprep.subr.bf16.mxu0 %v10297_v57 }
 0x42c   :  { %7580 = vmatpush1.bf16.msra.mxu1 %v9335_v58  ;;  %v1073_v58 = vsub.s32 4, %v10500_v43 }
 0x42d   :  { %7581 = vmatprep.subr.bf16.mxu1 %v9344_v60  ;;  %v1077_v60 = vsub.s32 5, %v10500_v43 }
 0x42e   :  { %9795 = vmatpush1.bf16.msra.mxu0 %v10299_v39  ;;  %v9432_v39 = vcombine.high %v968_v54, %v972_v56 }
 0x42f   :  { %9797 = vmatprep.subr.bf16.mxu0 %v10300_v1  ;;  %v1074_v1 = vrot.slane %v13498_v59, %v1073_v58 }
 0x430   :  { %7582 = vmatpush1.bf16.msra.mxu1 %v9343_v2  ;;  %v9431_v2 = vcombine.low %v968_v54, %v972_v56  ;;  %v1040_v54 = vld [vmem:[%s14166_s1 + $0x1f98] sm:$0xff] }
 0x431   :  { %7583 = vmatprep.subr.bf16.mxu1 %v9352_v3  ;;  %v1078_v3 = vrot.slane %v13498_v59, %v1077_v60  ;;  %v1044_v56 = vld [vmem:[%s14166_s1 + $0x1fb8] sm:$0xff] }
 0x432   :  { %9799 = vmatpush1.bf16.msra.mxu0 %v10302_v4  ;;  %v9440_v4 = vcombine.high %v976_v62, %v980_v21  ;;  %v10339_v60 = vld [vmem:[%s14168_s3 + $0x374] ss:$8 sps:$4 sm:$0xff]  }
 0x433   :  { %9801 = vmatprep.subr.bf16.mxu0 %v10303_v52 }
 0x434   :  { %7584 = vmatpush1.bf16.msra.mxu1 %v9351_v9 }
 0x435   :  { %7585 = vmatprep.subr.bf16.mxu1 %v9360_v26 }
 0x436   :  { %9803 = vmatpush1.bf16.msra.mxu0 %v10305_v0  ;;  %v9439_v0 = vcombine.low %v976_v62, %v980_v21  ;;  %v1048_v62 = vld [vmem:[%s14166_s1 + $0x1fd8] sm:$0xff] }
 0x437   :  { %9805 = vmatprep.subr.bf16.mxu0 %v10306_v13  ;;  %v9448_v13 = vcombine.high %v984_v6, %v988_v8  ;;  %v1052_v21 = vld [vmem:[%s14166_s1 + $0x1ff8] sm:$0xff] }
 0x438   :  { %7586 = vmatpush1.bf16.msra.mxu1 %v9359_v63  ;;  %v992_v63 = vld [vmem:[%s14166_s1 + $0x1e18] sm:$0xff] }
 0x439   :  { %7587 = vmatprep.subr.bf16.mxu1 %v9368_v14  ;;  %v996_v14 = vld [vmem:[%s14166_s1 + $0x1e38] sm:$0xff] }
 0x43a   :  { %9807 = vmatpush1.bf16.msra.mxu0 %v10308_v7 }
 0x43b   :  { %9809 = vmatprep.subr.bf16.mxu0 %v10309_v19  ;;  %v9447_v19 = vcombine.low %v984_v6, %v988_v8  ;;  %v10344_v6 = vld [vmem:[%s14168_s3 + $0x380] ss:$8 sps:$4 sm:$0xff]   ;;  %v9511_v8 = vcombine.low %v1048_v62, %v1052_v21 }
 0x43c   :  { %7588 = vmatpush1.bf16.msra.mxu1 %v9367_v23  ;;  %v10321_v23 = vld [vmem:[%s14168_s3 + $0x314] ss:$8 sps:$4 sm:$0xff]  }
 0x43d   :  { %7589 = vmatprep.subr.bf16.mxu1 %v9376_v5  ;;  %v9456_v5 = vcombine.high %v992_v63, %v996_v14 }
 0x43e   :  { %9811 = vmatpush1.bf16.msra.mxu0 %v10311_v16  ;;  %v1000_v16 = vld [vmem:[%s14166_s1 + $0x1e58] sm:$0xff] }
 0x43f   :  { %9813 = vmatprep.subr.bf16.mxu0 %v10312_v20  ;;  %v9455_v20 = vcombine.low %v992_v63, %v996_v14  ;;  %v10359_v63 = vld [vmem:[%s14168_s3 + $0x3d0] ss:$8 sps:$4 sm:$0xff]   ;;  %v10360_v14 = vld [vmem:[%s14168_s3 + $0x3e4] ss:$8 sps:$4 sm:$0xff]  }
 0x440   :  { %7590 = vmatpush1.bf16.msra.mxu1 %v9375_v28  ;;  %v10324_v28 = vld [vmem:[%s14168_s3 + $0x324] ss:$8 sps:$4 sm:$0xff]  }
 0x441   :  { %7591 = vmatprep.subr.bf16.mxu1 %v9384_v30  ;;  %v9464_v30 = vcombine.high %v1000_v16, %v1004_v55 }
 0x442   :  { %9815 = vmatpush1.bf16.msra.mxu0 %v10314_v22  ;;  %v1008_v22 = vld [vmem:[%s14166_s1 + $0x1e98] sm:$0xff] }
 0x443   :  { %9817 = vmatprep.subr.bf16.mxu0 %v10315_v61  ;;  %v9463_v61 = vcombine.low %v1000_v16, %v1004_v55  ;;  %v9578_v16 = vld [vmem:[%s14170_s5 + $0x8] sm:$0xff]   ;;  %v9587_v55 = vld [vmem:[%s14170_s5 + $0x50] sm:$0xff]  }
 0x444   :  { %7592 = vmatpush1.bf16.msra.mxu1 %v9383_v29  ;;  %v10327_v29 = vld [vmem:[%s14168_s3 + $0x334] ss:$8 sps:$4 sm:$0xff]  }
 0x445   :  { %7602 = vmatprep.subr.bf16.mxu1 %v9392_v41  ;;  %v9472_v41 = vcombine.high %v1008_v22, %v1012_v24 }
 0x446   :  { %9819 = vmatpush1.bf16.msra.mxu0 %v10317_v33  ;;  %v1016_v33 = vld [vmem:[%s14166_s1 + $0x1ed8] sm:$0xff] }
 0x447   :  { %9821 = vmatprep.subr.bf16.mxu0 %v10318_v35  ;;  %7594 = vmatmul.mubr.bf16.vlgmr.msra.gmra.mrb[8].mxu1 %v11522_v42  ;;  %v960_v42 = vld [vmem:[%s14166_s1 + $0x1d18] sm:$0xff]  ;;  %v9471_v35 = vcombine.low %v1008_v22, %v1012_v24  ;;  %v9581_v22 = vld [vmem:[%s14170_s5 + $0x20] sm:$0xff]   ;;  %v9590_v24 = vld [vmem:[%s14170_s5 + $0x68] sm:$0xff]  }
 0x448   :  { %7603 = vmatpush1.bf16.msra.mxu1 %v9391_v36  ;;  %7634 = vmatprep.mubr.bf16.mxu1 %v11532_v49  ;;  %v964_v49 = vld [vmem:[%s14166_s1 + $0x1d38] sm:$0xff]  ;;  %v10330_v36 = vld [vmem:[%s14168_s3 + $0x344] ss:$8 sps:$4 sm:$0xff]  }
 0x449   :  { %7604 = vmatprep.subr.bf16.mxu1 %v9400_v40  ;;  %v9424_v51 = vcombine.high %v960_v42, %v964_v49  ;;  %v9423_v57 = vcombine.low %v960_v42, %v964_v49  ;;  %v9480_v40 = vcombine.high %v1016_v33, %v1020_v34  ;;  %v10335_v42 = vld [vmem:[%s14168_s3 + $0x350] ss:$8 sps:$4 sm:$0xff]   ;;  %v9487_v49 = vcombine.low %v1024_v44, %v1028_v31 }
 0x44c   :  { %7605 = vmatpush1.bf16.msra.mxu1 %v9399_v11  ;;  %v10332_v11 = vld [vmem:[%s14168_s3 + $0x340] ss:$8 sps:$4 sm:$0xff]  }
 0x44d   :  { %7606 = vmatprep.subr.bf16.mxu1 %v9408_v45  ;;  %v9479_v45 = vcombine.low %v1016_v33, %v1020_v34  ;;  %v10367_v33 = vld [vmem:[%s14167_s2] sm:$0xff] }
 0x450   :  { %7607 = vmatpush1.bf16.msra.mxu1 %v9407_v32  ;;  %v1032_v32 = vld [vmem:[%s14166_s1 + $0x1f58] sm:$0xff] }
 0x451   :  { %7608 = vmatprep.subr.bf16.mxu1 %v9416_v46  ;;  %v1036_v46 = vld [vmem:[%s14166_s1 + $0x1f78] sm:$0xff] }
 0x452   :  { %v9495_v58 = vcombine.low %v1032_v32, %v1036_v46 }
 0x454   :  { %7609 = vmatpush1.bf16.msra.mxu1 %v9415_v50  ;;  %v10336_v50 = vld [vmem:[%s14168_s3 + $0x364] ss:$8 sps:$4 sm:$0xff]  }
 0x455   :  { %7610 = vmatprep.subr.bf16.mxu1 %v9424_v51  ;;  %v9496_v51 = vcombine.high %v1032_v32, %v1036_v46  ;;  %v9592_v32 = vld [vmem:[%s14170_s5 + $0x78] sm:$0xff]  }
 0x456   :  { %v9584_v46 = vld [vmem:[%s14170_s5 + $0x38] sm:$0xff]  }
 0x458   :  { %7611 = vmatpush1.bf16.msra.mxu1 %v9423_v57  ;;  %v10338_v57 = vld [vmem:[%s14168_s3 + $0x360] ss:$8 sps:$4 sm:$0xff]  }
 0x459   :  { %7612 = vmatprep.subr.bf16.mxu1 %v9432_v39  ;;  %v9504_v39 = vcombine.high %v1040_v54, %v1044_v56 }
 0x45c   :  { %v7308_v52 = vpop.f32.mrb[4].mxu0  ;;  %7613 = vmatpush1.bf16.msra.mxu1 %v9431_v2  ;;  %v9503_v2 = vcombine.low %v1040_v54, %v1044_v56 }
 0x45d   :  { %v9922_v9 = vadd.f32 %v7308_v52, %v1074_v1  ;;  %v7310_v26 = vpop.f32.mrb[5].mxu0  ;;  %7614 = vmatprep.subr.bf16.mxu1 %v9440_v4  ;;  %v10341_v1 = vld [vmem:[%s14168_s3 + $0x370] ss:$8 sps:$4 sm:$0xff]   ;;  %v9512_v4 = vcombine.high %v1048_v62, %v1052_v21  ;;  %v10345_v52 = vld [vmem:[%s14168_s3 + $0x394] ss:$8 sps:$4 sm:$0xff]  }
 0x45e   :  { %v9923_v10 = vadd.f32 %v7310_v26, %v1078_v3  ;;  %v7312_v12 = vpop.f32.mrb[6].mxu0  ;;  %v10342_v3 = vld [vmem:[%s14168_s3 + $0x384] ss:$8 sps:$4 sm:$0xff]   ;;  %v9513_v21 = vld [vmem:[%s14171_s6] ss:$0 sm:$0xff] }
 0x45f   :  { %v7313_v59 = vpop.f32.mrb[7].mxu0  ;;  %v7647_v17 = vmax.f32 %v9922_v9, 0.0  ;;  %v10347_v9 = vld [vmem:[%s14168_s3 + $0x390] ss:$8 sps:$4 sm:$0xff]   ;;  %v10348_v26 = vld [vmem:[%s14168_s3 + $0x3a4] ss:$8 sps:$4 sm:$0xff]  }
 0x460   :  { %v7648_v7 = vmax.f32 %v9923_v10, 0.0  ;;  %7615 = vmatpush1.bf16.msra.mxu1 %v9439_v0  ;;  %v10350_v0 = vld [vmem:[%s14168_s3 + $0x3a0] ss:$8 sps:$4 sm:$0xff]   ;;  %v10351_v10 = vld [vmem:[%s14168_s3 + $0x3b4] ss:$8 sps:$4 sm:$0xff]  }
 0x461   :  { %7616 = vmatprep.subr.bf16.mxu1 %v9448_v13  ;;  %v10353_v12 = vld [vmem:[%s14168_s3 + $0x3b0] ss:$8 sps:$4 sm:$0xff]   ;;  %v10356_v13 = vld [vmem:[%s14168_s3 + $0x3c0] ss:$8 sps:$4 sm:$0xff]   ;;  %v10357_v59 = vld [vmem:[%s14168_s3 + $0x3d4] ss:$8 sps:$4 sm:$0xff]  }
 0x462   :  { %8253 = vmatprep.mubr.f32.mxu0 %v7648_v7  ;;  %v10362_v7 = vld [vmem:[%s14168_s3 + $0x3e0] ss:$8 sps:$4 sm:$0xff]  }
 0x463   :  { %8254 = vmatmul.mubr.f32.vlgmr.msra.gmra.mrb[8].mxu0 %v7647_v17  ;;  %v10365_v17 = vld [vmem:[%s14168_s3 + $0x3f0] ss:$8 sps:$4 sm:$0xff]  }
 0x464   :  { %9823 = vmatpush1.bf16.msra.mxu0 %v10320_v15  ;;  %7617 = vmatpush1.bf16.msra.mxu1 %v9447_v19  ;;  %v10363_v15 = vld [vmem:[%s14168_s3 + $0x3f4] ss:$8 sps:$4 sm:$0xff]   ;;  %v9585_v19 = vld [vmem:[%s14170_s5 + $0x40] sm:$0xff]  }
 0x465   :  { %9825 = vmatprep.subr.bf16.mxu0 %v10321_v23  ;;  %7618 = vmatprep.subr.bf16.mxu1 %v9456_v5  ;;  %v9515_v23 = vld [vmem:[%s14170_s5] sm:$0xff]   ;;  %v9586_v5 = vld [vmem:[%s14170_s5 + $0x48] sm:$0xff]  }
 0x468   :  { %9827 = vmatpush1.bf16.msra.mxu0 %v10323_v18  ;;  %7619 = vmatpush1.bf16.msra.mxu1 %v9455_v20  ;;  %v9579_v18 = vld [vmem:[%s14170_s5 + $0x10] sm:$0xff]   ;;  %v9588_v20 = vld [vmem:[%s14170_s5 + $0x58] sm:$0xff]  }
 0x469   :  { %9829 = vmatprep.subr.bf16.mxu0 %v10324_v28  ;;  %7620 = vmatprep.subr.bf16.mxu1 %v9464_v30  ;;  %v9580_v28 = vld [vmem:[%s14170_s5 + $0x18] sm:$0xff]   ;;  %v9589_v30 = vld [vmem:[%s14170_s5 + $0x60] sm:$0xff]  }
 0x46c   :  { %9831 = vmatpush1.bf16.msra.mxu0 %v10326_v25  ;;  %7621 = vmatpush1.bf16.msra.mxu1 %v9463_v61  ;;  %v9582_v25 = vld [vmem:[%s14170_s5 + $0x28] sm:$0xff]   ;;  %v9591_v61 = vld [vmem:[%s14170_s5 + $0x70] sm:$0xff]  }
 0x46d   :  { %9833 = vmatprep.subr.bf16.mxu0 %v10327_v29  ;;  %7622 = vmatprep.subr.bf16.mxu1 %v9472_v41  ;;  %v1081_v29 = vsub.s32 6, %v10500_v43  ;;  %v1085_v41 = vsub.s32 7, %v10500_v43 }
 0x46f   :  { %v1082_v34 = vrot.slane %v10367_v33, %v1081_v29 }
 0x470   :  { %9835 = vmatpush1.bf16.msra.mxu0 %v10329_v38  ;;  %7623 = vmatpush1.bf16.msra.mxu1 %v9471_v35  ;;  %v1086_v38 = vrot.slane %v10367_v33, %v1085_v41 }
 0x471   :  { %9837 = vmatprep.subr.bf16.mxu0 %v10330_v36  ;;  %7624 = vmatprep.subr.bf16.mxu1 %v9480_v40 }
 0x474   :  { %9839 = vmatpush1.bf16.msra.mxu0 %v10332_v11  ;;  %7625 = vmatpush1.bf16.msra.mxu1 %v9479_v45 }
 0x475   :  { %9841 = vmatprep.subr.bf16.mxu0 %v10333_v48  ;;  %7626 = vmatprep.subr.bf16.mxu1 %v9488_v53  ;;  %v9583_v53 = vld [vmem:[%s14170_s5 + $0x30] sm:$0xff]  }
 0x478   :  { %9843 = vmatpush1.bf16.msra.mxu0 %v10335_v42  ;;  %7627 = vmatpush1.bf16.msra.mxu1 %v9487_v49  ;;  %v8035_v42 = vld [vmem:[%s14169_s4] sm:$0x3]  ;;  %s10393_s4 = smov [#allocation2]  }
 0x479   :  { %9845 = vmatprep.subr.bf16.mxu0 %v10336_v50  ;;  %7628 = vmatprep.subr.bf16.mxu1 %v9496_v51  ;;  %v8040_v49 = vrot.slane %v8035_v42, %v1057_v37  ;;  %v8044_v50 = vrot.slane %v8035_v42, %v1061_v47  ;;  %s8481_s26 = sshll.u32 %s10393_s4, 4  ;;  %s8482_s26 = int_to_ptr.vmem [resolvable:$true] %s8481_s26 }
 0x47a   :  { %s10368_s27 = scalar_lea.vmem %s8482_s26, 32  ;;  %p10373_p1 = scmp.lt.s32.totalorder %s8482_s26, %s8482_s26 }
 0x47b   :  { %p10369_p0 = scmp.ne.s32.totalorder %s8482_s26, %s10368_s27  ;;  %p10374_p2 = scmp.lt.s32.totalorder %s10368_s27, %s10368_s27 }
 0x47c   :  { %9847 = vmatpush1.bf16.msra.mxu0 %v10338_v57  ;;  %7629 = vmatpush1.bf16.msra.mxu1 %v9495_v58 }
 0x47d   :  { %9849 = vmatprep.subr.bf16.mxu0 %v10339_v60  ;;  %7630 = vmatprep.subr.bf16.mxu1 %v9504_v39  ;;  %p10375_p3 = por %p10374_p2, %p10373_p1 }
 0x47f   :  { %p10376_p4 = pnand %p10375_p3, %p10369_p0 }
 0x480   :  { %9851 = vmatpush1.bf16.msra.mxu0 %v10341_v1  ;;  %7631 = vmatpush1.bf16.msra.mxu1 %v9503_v2 }
 0x481   :  { %9853 = vmatprep.subr.bf16.mxu0 %v10342_v3  ;;  %7632 = vmatprep.subr.bf16.mxu1 %v9512_v4 }
 0x484   :  { %9855 = vmatpush1.bf16.msra.mxu0 %v10344_v6  ;;  %7633 = vmatpush1.bf16.msra.mxu1 %v9511_v8 }
 0x485   :  { %9857 = vmatprep.subr.bf16.mxu0 %v10345_v52  ;;  %9885 = vmatprep.subr.bf16.mxu1 %v9585_v19 }
 0x487   :  { %7635 = vmatmul.mubr.bf16.vlgmr.msra.gmra.mrb[8].mxu1 %v11730_v27  ;;  %v10354_v27 = vld [vmem:[%s14168_s3 + $0x3c4] ss:$8 sps:$4 sm:$0xff]  }
 0x488   :  { %9859 = vmatpush1.bf16.msra.mxu0 %v10347_v9  ;;  %9887 = vmatpush3.bf16.msra.mxu1 %v9515_v23 }
 0x489   :  { %9861 = vmatprep.subr.bf16.mxu0 %v10348_v26  ;;  %9889 = vmatprep.subr.bf16.mxu1 %v9586_v5 }
 0x48c   :  { %9863 = vmatpush1.bf16.msra.mxu0 %v10350_v0  ;;  %9891 = vmatpush3.bf16.msra.mxu1 %v9578_v16 }
 0x48d   :  { %9865 = vmatprep.subr.bf16.mxu0 %v10351_v10  ;;  %9893 = vmatprep.subr.bf16.mxu1 %v9587_v55 }
 0x490   :  { %9867 = vmatpush1.bf16.msra.mxu0 %v10353_v12  ;;  %9895 = vmatpush3.bf16.msra.mxu1 %v9579_v18 }
 0x491   :  { %9869 = vmatprep.subr.bf16.mxu0 %v10354_v27  ;;  %9897 = vmatprep.subr.bf16.mxu1 %v9588_v20 }
 0x494   :  { %9871 = vmatpush1.bf16.msra.mxu0 %v10356_v13  ;;  %9899 = vmatpush3.bf16.msra.mxu1 %v9580_v28 }
 0x495   :  { %9873 = vmatprep.subr.bf16.mxu0 %v10357_v59  ;;  %9901 = vmatprep.subr.bf16.mxu1 %v9589_v30 }
 0x498   :  { %9875 = vmatpush1.bf16.msra.mxu0 %v10359_v63  ;;  %9903 = vmatpush3.bf16.msra.mxu1 %v9581_v22 }
 0x499   :  { %9877 = vmatprep.subr.bf16.mxu0 %v10360_v14  ;;  %9905 = vmatprep.subr.bf16.mxu1 %v9590_v24 }
 0x49c   :  { %9879 = vmatpush1.bf16.msra.mxu0 %v10362_v7  ;;  %9907 = vmatpush3.bf16.msra.mxu1 %v9582_v25 }
 0x49d   :  { %9881 = vmatprep.subr.bf16.mxu0 %v10363_v15  ;;  %9909 = vmatprep.subr.bf16.mxu1 %v9591_v61 }
 0x4a0   :  { %9883 = vmatpush1.bf16.msra.mxu0 %v10365_v17  ;;  %9911 = vmatpush3.bf16.msra.mxu1 %v9583_v53 }
 0x4a1   :  { %9913 = vmatprep.subr.bf16.mxu1 %v9592_v32 }
 0x4a4   :  { %9915 = vmatpush3.bf16.msra.mxu1 %v9584_v46 }
 0x55a   :  { %v7636_v35 = vpop.f32.mrb[8].mxu1 }
 0x55b   :  { %v9924_v36 = vadd.f32 %v7636_v35, %v1082_v34  ;;  %v7638_v40 = vpop.f32.mrb[9].mxu1 }
 0x55c   :  { %v9925_v44 = vadd.f32 %v7638_v40, %v1086_v38  ;;  %v7640_v31 = vpop.f32.mrb[10].mxu1 }
 0x55d   :  { %v7641_v11 = vpop.f32.mrb[11].mxu1  ;;  %v7649_v48 = vmax.f32 %v9924_v36, 0.0 }
 0x55e   :  { %v7650_v45 = vmax.f32 %v9925_v44, 0.0 }
 0x560   :  { %8324 = vmatprep.mubr.f32.mxu0 %v7650_v45 }
 0x561   :  { %8325 = vmatmul.mubr.f32.vlgmr.msra.gmra.mrb[8].mxu0 %v7649_v48 }
 0x634   :  { %v8326_v51 = vpop.f32.mrb[8].mxu0 }
 0x635   :  { %v9926_v54 = vadd.f32 %v8326_v51, %v8040_v49  ;;  %v8328_v56 = vpop.f32.mrb[9].mxu0 }
 0x636   :  { %v9927_v57 = vadd.f32 %v8328_v56, %v8044_v50 }
 0x637   :  { %v8331_v60 = vmax.f32 %v9926_v54, 0.0 }
 0x638   :  { %v8332_v58 = vmax.f32 %v9927_v57, 0.0 }
 0x63a   :  { %8468 = vmatprep.mubr.f32.mxu1 %v8332_v58 }
 0x63b   :  { %8469 = vmatmul.mubr.f32.vlgmr.msra.gmra.mrb[12].mxu1 %v8331_v60 }
 0x70e   :  { %v9625_v39 = vpop.f32.mrb[12].mxu1 }
 0x70f   :  { %v9626_v62 = vpop.f32.mrb[13].mxu1 }
 0x710   :  { %v9627_v37 = vadd.f32 %v9626_v62, %v9625_v39 }
 0x712   :  { %v8471_v1 = vadd.f32 %v9627_v37, %v9513_v21 }
 0x714   :  { %8474 = vst [vmem:[#allocation2] sm:$0x3] %v8471_v1 }
 0x715   :  { %10379 = shalt.err (!%p10376_p4)
}
 0x716   :  { %s10380_s30 = scalar_lea.hbm %s14172_s7, 32 }
 0x717   :  { %p10381_p5 = scmp.ne.s32.totalorder %s14172_s7, %s10380_s30  ;;  %p10384_p6 = scmp.lt.u32.totalorder %s10380_s30, %s14172_s7 }
 0x719   :  { %p10386_p7 = pnand %p10384_p6, %p10381_p5 }
 0x71b   :  { %10389 = shalt.err (!%p10386_p7)
}
 0x71c   :  { %8484 = dma.vmem_to_hbm [thread:$0]  %s8482_s26, 32, %s14172_s7, [#allocation3]  }
 0x71d   :  { %10390 = dma.done.wait [#allocation3], 32  }
 0x71e   :  { %10391 = vsyncadd [#allocation3], 4294967264 }
 0x71f   :  { %8488 = vsyncpa [#allocation3], 1 }

</bundles_post_ra>
